<compile_context>
chip_gen: v7x
topology: tpu7x:2x2x1
jax: 0.10.0
libtpu: 0.0.40
codegen_flags: <defaults>
</compile_context>

<pallas_src>
import functools

import jax
import jax.numpy as jnp
from jax.experimental import pallas as pl
from jax.experimental.pallas import tpu as pltpu

# ----------------------- scaled-down DistilHuBERT config -----------------------
CONV_LAYERS = [(32, 10, 5), (32, 3, 2), (32, 2, 2)]   # (dim, kernel, stride)
EMBED_DIM = 64
FFN_DIM = 128
NUM_HEADS = 4
NUM_LAYERS = 2
CONV_POS = 8            # positional conv kernel (even -> SamePad drops last frame)
CONV_POS_GROUPS = 4
FINAL_DIM = 32
N_TASKS = 2             # task_emb_type == "expand-last"
EPS = 1e-5
MXU_DTYPE = jnp.bfloat16   # MXU operand dtype (f32 accumulation); jnp.float32 for exact


# ------------------------------ in-kernel helpers -------------------------------


def _mm(a, b):
    """MXU matmul with bf16 operands / f32 accumulation (weights are already bf16)."""
    return jnp.dot(a.astype(MXU_DTYPE), b.astype(MXU_DTYPE),
                   preferred_element_type=jnp.float32)


def _gelu(x):
    # TODO(synk): PyTorch nn.GELU default is exact erf GELU; the tanh approximation is
    # used in-kernel (EUP tanh lowering) — max abs deviation ~1e-3.
    return jax.nn.gelu(x, approximate=True)


def _layernorm(x, g, b, eps):
    mu = jnp.mean(x, axis=-1, keepdims=True)
    var = jnp.mean((x - mu) ** 2, axis=-1, keepdims=True)
    return (x - mu) * jax.lax.rsqrt(var + eps) * g + b


# ------------------------------- Pallas kernels --------------------------------


def _conv0_gn_gelu_kernel(p_ref, w_ref, b_ref, g_ref, gb_ref, o_ref, *, eps):
    """Per-batch: conv0 (as matmul) -> GroupNorm(groups==channels, over time) -> GELU."""
    y = _mm(p_ref[0], w_ref[...]) + b_ref[...]              # (T0, C)
    mu = jnp.mean(y, axis=0, keepdims=True)                 # per-channel over time
    var = jnp.mean((y - mu) ** 2, axis=0, keepdims=True)
    y = (y - mu) * jax.lax.rsqrt(var + eps) * g_ref[...] + gb_ref[...]
    o_ref[0] = _gelu(y)


def _conv_gelu_kernel(p_ref, w_ref, b_ref, o_ref):
    """Per-batch: conv (as matmul) + GELU."""
    o_ref[0] = _gelu(_mm(p_ref[0], w_ref[...]) + b_ref[...])


def _conv_proj_kernel(p_ref, w_ref, b_ref, pw_ref, pb_ref, feat_ref, ff_ref):
    """Per-batch: last conv layer + GELU, then post_extract_proj — two outputs."""
    y = _gelu(_mm(p_ref[0], w_ref[...]) + b_ref[...])       # feat (T, C)
    feat_ref[0] = y
    ff_ref[0] = _mm(y, pw_ref[...]) + pb_ref[...]           # feat_final (T, D)


def _encoder_pred_kernel(pos_p_ref, x_ref, kb_ref,
                         pw_ref, pb_ref, eg_ref, eb_ref,
                         wqkv_ref, bqkv_ref, wo_ref, bo_ref,
                         ln1g_ref, ln1b_ref, w1_ref, b1_ref, w2_ref, b2_ref,
                         ln2g_ref, ln2b_ref,
                         ow1_ref, ob1_ref, ow2_ref, ob2_ref,
                         hid_ref, pred_ref,
                         x_sc,
                         *, H, scale, eps):
    """Fused per-(batch, layer) grid step of the whole transformer stage.

    grid = (B, NUM_LAYERS); x_sc is a persistent (Tp, D) f32 VMEM scratch carrying the
    activations across layer steps of the same batch row.
      l == 0     : grouped positional conv (block-diag weight) + GELU + residual + LN
      every l    : one post-LN transformer layer (QKV fused, out-proj folded per head)
      l == last  : write hidden and run the prediction head.
    """
    l = pl.program_id(1)

    @pl.when(l == 0)
    def _():
        y = _gelu(_mm(pos_p_ref[0], pw_ref[...]) + pb_ref[...])   # (Tp, D), SamePad folded
        x_sc[...] = _layernorm(x_ref[0] + y, eg_ref[...], eb_ref[...], eps)

    x = x_sc[...]                                           # (Tp, D) f32
    Tq, D = x.shape
    dh = D // H
    qkv = _mm(x, wqkv_ref[0]) + bqkv_ref[0]                 # (Tp, 3D) fused QKV
    wo = wo_ref[0]                                          # (D, D)
    kb = kb_ref[0]                                          # (1, Tp) key-padding bias
    attn = jnp.zeros((Tq, D), jnp.float32)
    for h in range(H):                                      # static unroll; out-proj folded
        q = qkv[:, h * dh:(h + 1) * dh]
        k = qkv[:, D + h * dh:D + (h + 1) * dh]
        v = qkv[:, 2 * D + h * dh:2 * D + (h + 1) * dh]
        s = jax.lax.dot_general(
            q.astype(MXU_DTYPE), k.astype(MXU_DTYPE),
            (((1,), (1,)), ((), ())),
            preferred_element_type=jnp.float32) * scale
        s = s + kb                                          # mask padded keys (f32 safe)
        s = s - jnp.max(s, axis=-1, keepdims=True)
        p = jnp.exp(s)
        p = p * pl.reciprocal(jnp.sum(p, axis=-1, keepdims=True), approx=True)
        attn = attn + _mm(_mm(p, v), wo[h * dh:(h + 1) * dh, :])
    attn = attn + bo_ref[0]
    x = _layernorm(x + attn, ln1g_ref[0], ln1b_ref[0], eps)
    f = _gelu(_mm(x, w1_ref[0]) + b1_ref[0])
    f = _mm(f, w2_ref[0]) + b2_ref[0]
    x = _layernorm(x + f, ln2g_ref[0], ln2b_ref[0], eps)
    x_sc[...] = x

    @pl.when(l == pl.num_programs(1) - 1)
    def _():
        hid_ref[0] = x
        h1 = _gelu(_mm(x, ow1_ref[...]) + ob1_ref[...])
        pred_ref[0] = _mm(h1, ow2_ref[...]) + ob2_ref[...]


# ------------------------------ kernel wrappers ---------------------------------


def conv0_gn_gelu(patches, w, b, gn_g, gn_b):
    B, T0, CK = patches.shape
    C = w.shape[1]
    return pl.pallas_call(
        functools.partial(_conv0_gn_gelu_kernel, eps=EPS),
        out_shape=jax.ShapeDtypeStruct((B, T0, C), jnp.float32),
        grid=(B,),
        in_specs=[
            pl.BlockSpec((1, T0, CK), lambda i: (i, 0, 0)),
            pl.BlockSpec((CK, C), lambda i: (0, 0)),
            pl.BlockSpec((1, C), lambda i: (0, 0)),
            pl.BlockSpec((1, C), lambda i: (0, 0)),
            pl.BlockSpec((1, C), lambda i: (0, 0)),
        ],
        out_specs=pl.BlockSpec((1, T0, C), lambda i: (i, 0, 0)),
        compiler_params=pltpu.CompilerParams(dimension_semantics=("parallel",)),
    )(patches, w, b, gn_g, gn_b)


def conv_gelu(patches, w, b):
    B, T, CK = patches.shape
    C = w.shape[1]
    return pl.pallas_call(
        _conv_gelu_kernel,
        out_shape=jax.ShapeDtypeStruct((B, T, C), jnp.float32),
        grid=(B,),
        in_specs=[
            pl.BlockSpec((1, T, CK), lambda i: (i, 0, 0)),
            pl.BlockSpec((CK, C), lambda i: (0, 0)),
            pl.BlockSpec((1, C), lambda i: (0, 0)),
        ],
        out_specs=pl.BlockSpec((1, T, C), lambda i: (i, 0, 0)),
        compiler_params=pltpu.CompilerParams(dimension_semantics=("parallel",)),
    )(patches, w, b)


def conv_gelu_proj(patches, w, b, pw, pb):
    B, T, CK = patches.shape
    C = w.shape[1]
    D = pw.shape[1]
    return pl.pallas_call(
        _conv_proj_kernel,
        out_shape=(jax.ShapeDtypeStruct((B, T, C), jnp.float32),
                   jax.ShapeDtypeStruct((B, T, D), jnp.float32)),
        grid=(B,),
        in_specs=[
            pl.BlockSpec((1, T, CK), lambda i: (i, 0, 0)),
            pl.BlockSpec((CK, C), lambda i: (0, 0)),
            pl.BlockSpec((1, C), lambda i: (0, 0)),
            pl.BlockSpec((C, D), lambda i: (0, 0)),
            pl.BlockSpec((1, D), lambda i: (0, 0)),
        ],
        out_specs=(pl.BlockSpec((1, T, C), lambda i: (i, 0, 0)),
                   pl.BlockSpec((1, T, D), lambda i: (i, 0, 0))),
        compiler_params=pltpu.CompilerParams(dimension_semantics=("parallel",)),
    )(patches, w, b, pw, pb)


def encoder_and_pred(params, x, pad_mask):
    """Fused positional conv + transformer layers + pred head.

    x: (B, T, D) feat_final, pad_mask: (B, T).  Returns (hidden (B,T,D), pred (B,T,O)).
    """
    B, T, D = x.shape
    Tp = ((T + 7) // 8) * 8                  # sublane-aligned time axis, kept padded
    O = N_TASKS * FINAL_DIM
    F = FFN_DIM
    K = CONV_POS
    scale = (D // NUM_HEADS) ** -0.5

    # x[padding_mask] = 0, then zero-pad the time axis to Tp.
    x = jnp.where(pad_mask[..., None] > 0, x, 0.0)
    x = jnp.pad(x, ((0, 0), (0, Tp - T), (0, 0)))
    maskp = jnp.pad(pad_mask, ((0, 0), (0, Tp - T)))
    key_bias = jnp.where(maskp > 0, 0.0, -1e30).astype(jnp.float32).reshape(B, 1, Tp)

    # positional-conv patches; SamePad (drop last frame of the even-kernel conv) is
    # folded in by only building Tp patch rows.
    pad = K // 2
    x_ct = jnp.pad(jnp.transpose(x, (0, 2, 1)), ((0, 0), (0, 0), (pad, pad)))
    pos_patches = _im2col_1d(x_ct, K, 1, t_out=Tp)           # (B, Tp, D*K)

    operands = (
        pos_patches, x, key_bias,
        params["pos_w"], params["pos_b"], params["enc_ln_g"], params["enc_ln_b"],
        params["L_wqkv"], params["L_bqkv"], params["L_wo"], params["L_bo"],
        params["L_ln1_g"], params["L_ln1_b"], params["L_w1"], params["L_b1"],
        params["L_w2"], params["L_b2"], params["L_ln2_g"], params["L_ln2_b"],
        params["out_w1"], params["out_b1"], params["out_w2"], params["out_b2"],
    )

    batch3 = lambda b, l: (b, 0, 0)
    layer3 = lambda b, l: (l, 0, 0)
    shared2 = lambda b, l: (0, 0)

    in_specs = [
        pl.BlockSpec((1, Tp, D * K), batch3),      # pos conv patches
        pl.BlockSpec((1, Tp, D), batch3),          # x (masked, padded)
        pl.BlockSpec((1, 1, Tp), batch3),          # key-padding bias
        pl.BlockSpec((D * K, D), shared2),         # pos conv weight (block-diag)
        pl.BlockSpec((1, D), shared2),             # pos conv bias
        pl.BlockSpec((1, D), shared2),             # encoder LN gamma
        pl.BlockSpec((1, D), shared2),             # encoder LN beta
        pl.BlockSpec((1, D, 3 * D), layer3),       # wqkv
        pl.BlockSpec((1, 1, 3 * D), layer3),       # bqkv
        pl.BlockSpec((1, D, D), layer3),           # wo
        pl.BlockSpec((1, 1, D), layer3),           # bo
        pl.BlockSpec((1, 1, D), layer3),           # ln1 gamma
        pl.BlockSpec((1, 1, D), layer3),           # ln1 beta
        pl.BlockSpec((1, D, F), layer3),           # w1
        pl.BlockSpec((1, 1, F), layer3),           # b1
        pl.BlockSpec((1, F, D), layer3),           # w2
        pl.BlockSpec((1, 1, D), layer3),           # b2
        pl.BlockSpec((1, 1, D), layer3),           # ln2 gamma
        pl.BlockSpec((1, 1, D), layer3),           # ln2 beta
        pl.BlockSpec((D, 2 * D), shared2),         # pred head w1
        pl.BlockSpec((1, 2 * D), shared2),         # pred head b1
        pl.BlockSpec((2 * D, O), shared2),         # pred head w2
        pl.BlockSpec((1, O), shared2),             # pred head b2
    ]
    out_specs = (pl.BlockSpec((1, Tp, D), batch3),
                 pl.BlockSpec((1, Tp, O), batch3))

    # Advisory cost estimate so XLA schedules this custom call sensibly.
    dh = D // NUM_HEADS
    per_layer = (2 * Tp * D * 3 * D
                 + NUM_HEADS * (4 * Tp * Tp * dh + 2 * Tp * dh * D)
                 + 4 * Tp * D * F)
    flops = B * (2 * Tp * (D * K) * D + NUM_LAYERS * per_layer
                 + 2 * Tp * D * 2 * D + 2 * Tp * 2 * D * O)
    trans = B * (Tp * D + NUM_LAYERS * (NUM_HEADS * Tp * Tp + Tp * F) + Tp * 2 * D)
    bytes_accessed = (sum(int(a.size) * a.dtype.itemsize for a in operands)
                      + 4 * B * Tp * (D + O))
    cost = pl.CostEstimate(flops=int(flops), transcendentals=int(trans),
                           bytes_accessed=int(bytes_accessed))

    hid, pred = pl.pallas_call(
        functools.partial(_encoder_pred_kernel, H=NUM_HEADS, scale=scale, eps=EPS),
        out_shape=(jax.ShapeDtypeStruct((B, Tp, D), jnp.float32),
                   jax.ShapeDtypeStruct((B, Tp, O), jnp.float32)),
        grid=(B, NUM_LAYERS),
        in_specs=in_specs,
        out_specs=out_specs,
        scratch_shapes=[pltpu.VMEM((Tp, D), jnp.float32)],
        compiler_params=pltpu.CompilerParams(
            dimension_semantics=("parallel", "arbitrary")),
        cost_estimate=cost,
    )(*operands)
    return hid[:, :T, :], pred[:, :T, :]


# ----------------------------- model building blocks -----------------------------


def _im2col_1d(x, kernel, stride, t_out=None):
    """x: (B, C, T) -> patches (B, T_out, C*kernel) via k strided slices (no gather)."""
    b, c, t = x.shape
    if t_out is None:
        t_out = (t - kernel) // stride + 1
    span = (t_out - 1) * stride + 1
    cols = [x[:, :, j:j + span:stride] for j in range(kernel)]   # each (B, C, T_out)
    patches = jnp.stack(cols, axis=-1)                           # (B, C, T_out, k)
    return jnp.transpose(patches, (0, 2, 1, 3)).reshape(b, t_out, c * kernel)


def conv_feature_extractor(params, wave):
    """wave (B, S) -> feat (B, T, C) and feat_final (B, T, D).
    extractor_mode='default', conv_bias=False; GroupNorm+GELU fused into conv0,
    GELU fused into conv1, GELU+post_extract_proj fused into conv2."""
    x = wave[:, None, :]                                     # (B, 1, S)

    _, k0, s0 = CONV_LAYERS[0]
    p0 = _im2col_1d(x, k0, s0)                               # (B, T0, k0)
    y0 = conv0_gn_gelu(p0, params["conv0_w"], params["conv0_b"],
                       params["gn_g"], params["gn_b"])       # (B, T0, C0)

    _, k1, s1 = CONV_LAYERS[1]
    p1 = _im2col_1d(jnp.transpose(y0, (0, 2, 1)), k1, s1)    # (B, T1, C0*k1)
    y1 = conv_gelu(p1, params["conv1_w"], params["conv1_b"])

    _, k2, s2 = CONV_LAYERS[2]
    p2 = _im2col_1d(jnp.transpose(y1, (0, 2, 1)), k2, s2)    # (B, T2, C1*k2)
    feat, feat_final = conv_gelu_proj(p2, params["conv2_w"], params["conv2_b"],
                                      params["proj_w"], params["proj_b"])
    return feat, feat_final


def cal_pad_mask(pad_mask, max_len):
    pad_len = jnp.sum((pad_mask > 0).astype(jnp.int32), axis=1)
    for _, ks, st in CONV_LAYERS:
        pad_len = (pad_len - ks) // st + 1
    return (jnp.arange(max_len)[None, :] < pad_len[:, None]).astype(jnp.float32)


def distiller_model_forward(params, wave, pad_mask, no_pred=False):
    feat, feat_final = conv_feature_extractor(params, wave)  # (B, T, C), (B, T, D)
    b, t, _ = feat.shape
    pad_mask = cal_pad_mask(pad_mask, t)                     # (B, T)
    _hidden, pred_flat = encoder_and_pred(params, feat_final, pad_mask)
    if no_pred:
        pred = None
    else:
        # expand-last: (B, T, n_tasks * final_dim) -> (B, n_tasks, T, final_dim)
        pred = pred_flat.reshape(b, t, N_TASKS, FINAL_DIM).transpose(0, 2, 1, 3)
    return feat, feat_final, pred, pad_mask


def pretrained_distiller_forward(params, wave_inputs, get_hidden=False, no_pred=False):
    """Mirrors PretrainedDistiller.forward: list of 1-D waves -> pad_sequence -> model."""
    # TODO(synk): get_hidden=True would additionally return per-layer hiddens; omitted.
    del get_hidden
    wave_len = [int(w.shape[0]) for w in wave_inputs]
    max_len = max(wave_len)
    wave = jnp.stack(
        [jnp.pad(w, (0, max_len - w.shape[0])) for w in wave_inputs]
    ).astype(jnp.float32)
    pad_mask = (
        jnp.arange(max_len)[None, :] < jnp.array(wave_len)[:, None]
    ).astype(jnp.float32)
    fwd = jax.jit(distiller_model_forward, static_argnames=("no_pred",))
    return fwd(params, wave, pad_mask, no_pred=no_pred)


# -------------------------- deterministic parameter init --------------------------


def init_params(key):
    params = {}
    keys = iter(jax.random.split(key, 256))

    def w_init(din, dout, scale=0.05):
        return jax.random.normal(next(keys), (din, dout), jnp.float32) * scale

    def b_init(dout, scale=0.05):
        return jax.random.normal(next(keys), (1, dout), jnp.float32) * scale

    c_in = 1
    for li, (dim, ks, _) in enumerate(CONV_LAYERS):
        params[f"conv{li}_w"] = w_init(c_in * ks, dim).astype(MXU_DTYPE)
        params[f"conv{li}_b"] = jnp.zeros((1, dim), jnp.float32)   # extractor_conv_bias=False
        c_in = dim
    c0 = CONV_LAYERS[0][0]
    params["gn_g"] = 1.0 + 0.1 * jax.random.normal(next(keys), (1, c0), jnp.float32)
    params["gn_b"] = 0.1 * jax.random.normal(next(keys), (1, c0), jnp.float32)

    params["proj_w"] = w_init(CONV_LAYERS[-1][0], EMBED_DIM).astype(MXU_DTYPE)
    params["proj_b"] = b_init(EMBED_DIM)

    # grouped positional conv -> block-diagonal weight (one lane-dense matmul)
    cg = EMBED_DIM // CONV_POS_GROUPS
    pos_w = jnp.zeros((EMBED_DIM * CONV_POS, EMBED_DIM), jnp.float32)
    pos_b = jnp.zeros((1, EMBED_DIM), jnp.float32)
    for g in range(CONV_POS_GROUPS):
        wg = w_init(cg * CONV_POS, cg)
        bg = b_init(cg)
        pos_w = pos_w.at[g * cg * CONV_POS:(g + 1) * cg * CONV_POS,
                         g * cg:(g + 1) * cg].set(wg)
        pos_b = pos_b.at[:, g * cg:(g + 1) * cg].set(bg)
    params["pos_w"] = pos_w.astype(MXU_DTYPE)
    params["pos_b"] = pos_b
    params["enc_ln_g"] = jnp.ones((1, EMBED_DIM), jnp.float32)
    params["enc_ln_b"] = jnp.zeros((1, EMBED_DIM), jnp.float32)

    # per-layer weights stacked on a leading (NUM_LAYERS, ...) axis for the fused kernel
    names = ["wqkv", "bqkv", "wo", "bo", "ln1_g", "ln1_b",
             "w1", "b1", "w2", "b2", "ln2_g", "ln2_b"]
    stacks = {n: [] for n in names}
    for _ in range(NUM_LAYERS):
        wq, wk, wv = (w_init(EMBED_DIM, EMBED_DIM) for _ in range(3))
        bq, bk, bv = (b_init(EMBED_DIM) for _ in range(3))
        stacks["wqkv"].append(jnp.concatenate([wq, wk, wv], axis=1))    # (D, 3D)
        stacks["bqkv"].append(jnp.concatenate([bq, bk, bv], axis=1))    # (1, 3D)
        stacks["wo"].append(w_init(EMBED_DIM, EMBED_DIM))
        stacks["bo"].append(b_init(EMBED_DIM))
        stacks["w1"].append(w_init(EMBED_DIM, FFN_DIM))
        stacks["b1"].append(b_init(FFN_DIM))
        stacks["w2"].append(w_init(FFN_DIM, EMBED_DIM))
        stacks["b2"].append(b_init(EMBED_DIM))
        stacks["ln1_g"].append(jnp.ones((1, EMBED_DIM), jnp.float32))
        stacks["ln1_b"].append(jnp.zeros((1, EMBED_DIM), jnp.float32))
        stacks["ln2_g"].append(jnp.ones((1, EMBED_DIM), jnp.float32))
        stacks["ln2_b"].append(jnp.zeros((1, EMBED_DIM), jnp.float32))
    for n, lst in stacks.items():
        arr = jnp.stack(lst)                                           # (L, ...)
        if n in ("wqkv", "wo", "w1", "w2"):
            arr = arr.astype(MXU_DTYPE)
        params[f"L_{n}"] = arr

    params["out_w1"] = w_init(EMBED_DIM, EMBED_DIM * 2).astype(MXU_DTYPE)
    params["out_b1"] = b_init(EMBED_DIM * 2)
    params["out_w2"] = w_init(EMBED_DIM * 2, N_TASKS * FINAL_DIM).astype(MXU_DTYPE)
    params["out_b2"] = b_init(N_TASKS * FINAL_DIM)
    return params


# -------------------------------------- main --------------------------------------

if __name__ == "__main__":
    key = jax.random.PRNGKey(0)
    k_w0, k_w1, k_p = jax.random.split(key, 3)
    # two variable-length waveforms (list input, like PretrainedDistiller.forward)
    wave_inputs = [
        jax.random.normal(k_w0, (800,), jnp.float32),
        jax.random.normal(k_w1, (640,), jnp.float32),
    ]
    params = init_params(k_p)

    feat, feat_final, pred, pad_mask = pretrained_distiller_forward(params, wave_inputs)
    jax.block_until_ready((feat, feat_final, pred, pad_mask))

    # sanity on shapes: feat (2, 39, 32), feat_final (2, 39, 64),
    # pred (2, 2, 39, 32), pad_mask (2, 39)
    assert feat.shape == (2, 39, CONV_LAYERS[-1][0])
    assert feat_final.shape == (2, 39, EMBED_DIM)
    assert pred.shape == (2, N_TASKS, 39, FINAL_DIM)
    assert pad_mask.shape == (2, 39)
    assert bool(jnp.all(jnp.isfinite(feat)))
    assert bool(jnp.all(jnp.isfinite(feat_final)))
    assert bool(jnp.all(jnp.isfinite(pred)))
    print("KERNEL_OK")
</pallas_src>

<mosaic_0001>
module attributes {stable_mosaic.version = 11 : i64} {
  func.func @_conv0_gn_gelu_kernel(%arg0: i32, %arg1: memref<1x159x10xf32, #tpu.memory_space<vmem>>, %arg2: memref<10x32xbf16, #tpu.memory_space<vmem>>, %arg3: memref<1x32xf32, #tpu.memory_space<vmem>>, %arg4: memref<1x32xf32, #tpu.memory_space<vmem>>, %arg5: memref<1x32xf32, #tpu.memory_space<vmem>>, %arg6: memref<1x159x32xf32, #tpu.memory_space<vmem>>) attributes {dimension_semantics = [#tpu.dimension_semantics<parallel>], iteration_bounds = array<i64: 2>, scalar_prefetch = 0 : i64, scratch_operands = 0 : i64, tpu.core_type = #tpu.core_type<tc>, window_params = [{transform_indices = @transform_0, window_bounds = array<i64: 1, 159, 10>}, {pipeline_mode = #tpu.pipeline_mode<synchronous>, transform_indices = @transform_1, window_bounds = array<i64: 10, 32>}, {pipeline_mode = #tpu.pipeline_mode<synchronous>, transform_indices = @transform_2, window_bounds = array<i64: 1, 32>}, {pipeline_mode = #tpu.pipeline_mode<synchronous>, transform_indices = @transform_3, window_bounds = array<i64: 1, 32>}, {pipeline_mode = #tpu.pipeline_mode<synchronous>, transform_indices = @transform_4, window_bounds = array<i64: 1, 32>}, {transform_indices = @transform_5, window_bounds = array<i64: 1, 159, 32>}]} {
    %c0 = arith.constant 0 : index
    %c0_0 = arith.constant 0 : index
    %c0_1 = arith.constant 0 : index
    %0 = vector.load %arg1[%c0, %c0_0, %c0_1] : memref<1x159x10xf32, #tpu.memory_space<vmem>>, vector<1x159x10xf32>
    %1 = vector.shape_cast %0 : vector<1x159x10xf32> to vector<159x10xf32>
    %c0_2 = arith.constant 0 : index
    %c0_3 = arith.constant 0 : index
    %2 = vector.load %arg2[%c0_2, %c0_3] : memref<10x32xbf16, #tpu.memory_space<vmem>>, vector<10x32xbf16>
    %3 = arith.truncf %1 : vector<159x10xf32> to vector<159x10xbf16>
    %cst = arith.constant dense<0.000000e+00> : vector<159x32xf32>
    %4 = tpu.matmul %3, %2, %cst {dimension_numbers = #tpu.dot_dimension_numbers<[1], [0], [0], [1], [0, 0, 1, 1], [], []>} : vector<159x10xbf16>, vector<10x32xbf16>, vector<159x32xf32> -> vector<159x32xf32>
    %c0_4 = arith.constant 0 : index
    %c0_5 = arith.constant 0 : index
    %5 = vector.load %arg3[%c0_4, %c0_5] : memref<1x32xf32, #tpu.memory_space<vmem>>, vector<1x32xf32>
    %6 = vector.broadcast %5 : vector<1x32xf32> to vector<159x32xf32>
    %7 = arith.addf %4, %6 : vector<159x32xf32>
    %cst_6 = arith.constant dense<0.000000e+00> : vector<32xf32>
    %8 = vector.multi_reduction <add>, %7, %cst_6 [0] : vector<159x32xf32> to vector<32xf32>
    %9 = vector.shape_cast %8 : vector<32xf32> to vector<1x32xf32>
    %cst_7 = arith.constant 1.590000e+02 : f32
    %10 = vector.broadcast %cst_7 : f32 to vector<1x32xf32>
    %11 = arith.divf %9, %10 : vector<1x32xf32>
    %12 = vector.broadcast %11 : vector<1x32xf32> to vector<159x32xf32>
    %13 = arith.subf %7, %12 : vector<159x32xf32>
    %14 = arith.mulf %13, %13 : vector<159x32xf32>
    %cst_8 = arith.constant dense<0.000000e+00> : vector<32xf32>
    %15 = vector.multi_reduction <add>, %14, %cst_8 [0] : vector<159x32xf32> to vector<32xf32>
    %16 = vector.shape_cast %15 : vector<32xf32> to vector<1x32xf32>
    %cst_9 = arith.constant 1.590000e+02 : f32
    %17 = vector.broadcast %cst_9 : f32 to vector<1x32xf32>
    %18 = arith.divf %16, %17 : vector<1x32xf32>
    %19 = vector.broadcast %11 : vector<1x32xf32> to vector<159x32xf32>
    %20 = arith.subf %7, %19 : vector<159x32xf32>
    %cst_10 = arith.constant 9.99999974E-6 : f32
    %21 = vector.broadcast %cst_10 : f32 to vector<1x32xf32>
    %22 = arith.addf %18, %21 : vector<1x32xf32>
    %23 = math.rsqrt %22 : vector<1x32xf32>
    %24 = vector.broadcast %23 : vector<1x32xf32> to vector<159x32xf32>
    %25 = arith.mulf %20, %24 : vector<159x32xf32>
    %c0_11 = arith.constant 0 : index
    %c0_12 = arith.constant 0 : index
    %26 = vector.load %arg4[%c0_11, %c0_12] : memref<1x32xf32, #tpu.memory_space<vmem>>, vector<1x32xf32>
    %27 = vector.broadcast %26 : vector<1x32xf32> to vector<159x32xf32>
    %28 = arith.mulf %25, %27 : vector<159x32xf32>
    %c0_13 = arith.constant 0 : index
    %c0_14 = arith.constant 0 : index
    %29 = vector.load %arg5[%c0_13, %c0_14] : memref<1x32xf32, #tpu.memory_space<vmem>>, vector<1x32xf32>
    %30 = vector.broadcast %29 : vector<1x32xf32> to vector<159x32xf32>
    %31 = arith.addf %28, %30 : vector<159x32xf32>
    %32 = arith.mulf %31, %31 : vector<159x32xf32>
    %33 = arith.mulf %31, %32 : vector<159x32xf32>
    %cst_15 = arith.constant 4.471500e-02 : f32
    %34 = vector.broadcast %cst_15 : f32 to vector<159x32xf32>
    %35 = arith.mulf %34, %33 : vector<159x32xf32>
    %36 = arith.addf %31, %35 : vector<159x32xf32>
    %cst_16 = arith.constant 0.797884583 : f32
    %37 = vector.broadcast %cst_16 : f32 to vector<159x32xf32>
    %38 = arith.mulf %37, %36 : vector<159x32xf32>
    %39 = math.tanh %38 : vector<159x32xf32>
    %cst_17 = arith.constant 1.000000e+00 : f32
    %40 = vector.broadcast %cst_17 : f32 to vector<159x32xf32>
    %41 = arith.addf %40, %39 : vector<159x32xf32>
    %cst_18 = arith.constant 5.000000e-01 : f32
    %42 = vector.broadcast %cst_18 : f32 to vector<159x32xf32>
    %43 = arith.mulf %42, %41 : vector<159x32xf32>
    %44 = arith.mulf %31, %43 : vector<159x32xf32>
    %c0_19 = arith.constant 0 : index
    %c0_20 = arith.constant 0 : index
    %c0_21 = arith.constant 0 : index
    %45 = vector.load %arg6[%c0_19, %c0_20, %c0_21] : memref<1x159x32xf32, #tpu.memory_space<vmem>>, vector<1x159x32xf32>
    %46 = vector.shape_cast %45 : vector<1x159x32xf32> to vector<159x32xf32>
    %47 = vector.shape_cast %44 : vector<159x32xf32> to vector<1x159x32xf32>
    tpu.vector_store %arg6[%c0_19, %c0_20, %c0_21], %47 {strides = array<i32>} : memref<1x159x32xf32, #tpu.memory_space<vmem>>, vector<1x159x32xf32>,
    return
  }
  func.func @transform_0(%arg0: i32) -> (i32, i32, i32) {
    %c0_i32 = arith.constant 0 : i32
    %c0_i32_0 = arith.constant 0 : i32
    %c0_i32_1 = arith.constant 0 : i32
    return %arg0, %c0_i32, %c0_i32_0 : i32, i32, i32
  }
  func.func @transform_1(%arg0: i32) -> (i32, i32) {
    %c0_i32 = arith.constant 0 : i32
    %c0_i32_0 = arith.constant 0 : i32
    %c0_i32_1 = arith.constant 0 : i32
    return %c0_i32, %c0_i32_0 : i32, i32
  }
  func.func @transform_2(%arg0: i32) -> (i32, i32) {
    %c0_i32 = arith.constant 0 : i32
    %c0_i32_0 = arith.constant 0 : i32
    %c0_i32_1 = arith.constant 0 : i32
    return %c0_i32, %c0_i32_0 : i32, i32
  }
  func.func @transform_3(%arg0: i32) -> (i32, i32) {
    %c0_i32 = arith.constant 0 : i32
    %c0_i32_0 = arith.constant 0 : i32
    %c0_i32_1 = arith.constant 0 : i32
    return %c0_i32, %c0_i32_0 : i32, i32
  }
  func.func @transform_4(%arg0: i32) -> (i32, i32) {
    %c0_i32 = arith.constant 0 : i32
    %c0_i32_0 = arith.constant 0 : i32
    %c0_i32_1 = arith.constant 0 : i32
    return %c0_i32, %c0_i32_0 : i32, i32
  }
  func.func @transform_5(%arg0: i32) -> (i32, i32, i32) {
    %c0_i32 = arith.constant 0 : i32
    %c0_i32_0 = arith.constant 0 : i32
    %c0_i32_1 = arith.constant 0 : i32
    return %arg0, %c0_i32, %c0_i32_0 : i32, i32, i32
  }
}

module attributes {stable_mosaic.version = 11 : i64} {
  func.func @_conv_gelu_kernel(%arg0: i32, %arg1: memref<1x79x96xf32, #tpu.memory_space<vmem>>, %arg2: memref<96x32xbf16, #tpu.memory_space<vmem>>, %arg3: memref<1x32xf32, #tpu.memory_space<vmem>>, %arg4: memref<1x79x32xf32, #tpu.memory_space<vmem>>) attributes {dimension_semantics = [#tpu.dimension_semantics<parallel>], iteration_bounds = array<i64: 2>, scalar_prefetch = 0 : i64, scratch_operands = 0 : i64, tpu.core_type = #tpu.core_type<tc>, window_params = [{transform_indices = @transform_0, window_bounds = array<i64: 1, 79, 96>}, {pipeline_mode = #tpu.pipeline_mode<synchronous>, transform_indices = @transform_1, window_bounds = array<i64: 96, 32>}, {pipeline_mode = #tpu.pipeline_mode<synchronous>, transform_indices = @transform_2, window_bounds = array<i64: 1, 32>}, {transform_indices = @transform_3, window_bounds = array<i64: 1, 79, 32>}]} {
    %c0 = arith.constant 0 : index
    %c0_0 = arith.constant 0 : index
    %c0_1 = arith.constant 0 : index
    %0 = vector.load %arg1[%c0, %c0_0, %c0_1] : memref<1x79x96xf32, #tpu.memory_space<vmem>>, vector<1x79x96xf32>
    %1 = vector.shape_cast %0 : vector<1x79x96xf32> to vector<79x96xf32>
    %c0_2 = arith.constant 0 : index
    %c0_3 = arith.constant 0 : index
    %2 = vector.load %arg2[%c0_2, %c0_3] : memref<96x32xbf16, #tpu.memory_space<vmem>>, vector<96x32xbf16>
    %3 = arith.truncf %1 : vector<79x96xf32> to vector<79x96xbf16>
    %cst = arith.constant dense<0.000000e+00> : vector<79x32xf32>
    %4 = tpu.matmul %3, %2, %cst {dimension_numbers = #tpu.dot_dimension_numbers<[1], [0], [0], [1], [0, 0, 1, 1], [], []>} : vector<79x96xbf16>, vector<96x32xbf16>, vector<79x32xf32> -> vector<79x32xf32>
    %c0_4 = arith.constant 0 : index
    %c0_5 = arith.constant 0 : index
    %5 = vector.load %arg3[%c0_4, %c0_5] : memref<1x32xf32, #tpu.memory_space<vmem>>, vector<1x32xf32>
    %6 = vector.broadcast %5 : vector<1x32xf32> to vector<79x32xf32>
    %7 = arith.addf %4, %6 : vector<79x32xf32>
    %8 = arith.mulf %7, %7 : vector<79x32xf32>
    %9 = arith.mulf %7, %8 : vector<79x32xf32>
    %cst_6 = arith.constant 4.471500e-02 : f32
    %10 = vector.broadcast %cst_6 : f32 to vector<79x32xf32>
    %11 = arith.mulf %10, %9 : vector<79x32xf32>
    %12 = arith.addf %7, %11 : vector<79x32xf32>
    %cst_7 = arith.constant 0.797884583 : f32
    %13 = vector.broadcast %cst_7 : f32 to vector<79x32xf32>
    %14 = arith.mulf %13, %12 : vector<79x32xf32>
    %15 = math.tanh %14 : vector<79x32xf32>
    %cst_8 = arith.constant 1.000000e+00 : f32
    %16 = vector.broadcast %cst_8 : f32 to vector<79x32xf32>
    %17 = arith.addf %16, %15 : vector<79x32xf32>
    %cst_9 = arith.constant 5.000000e-01 : f32
    %18 = vector.broadcast %cst_9 : f32 to vector<79x32xf32>
    %19 = arith.mulf %18, %17 : vector<79x32xf32>
    %20 = arith.mulf %7, %19 : vector<79x32xf32>
    %c0_10 = arith.constant 0 : index
    %c0_11 = arith.constant 0 : index
    %c0_12 = arith.constant 0 : index
    %21 = vector.load %arg4[%c0_10, %c0_11, %c0_12] : memref<1x79x32xf32, #tpu.memory_space<vmem>>, vector<1x79x32xf32>
    %22 = vector.shape_cast %21 : vector<1x79x32xf32> to vector<79x32xf32>
    %23 = vector.shape_cast %20 : vector<79x32xf32> to vector<1x79x32xf32>
    tpu.vector_store %arg4[%c0_10, %c0_11, %c0_12], %23 {strides = array<i32>} : memref<1x79x32xf32, #tpu.memory_space<vmem>>, vector<1x79x32xf32>,
    return
  }
  func.func @transform_0(%arg0: i32) -> (i32, i32, i32) {
    %c0_i32 = arith.constant 0 : i32
    %c0_i32_0 = arith.constant 0 : i32
    %c0_i32_1 = arith.constant 0 : i32
    return %arg0, %c0_i32, %c0_i32_0 : i32, i32, i32
  }
  func.func @transform_1(%arg0: i32) -> (i32, i32) {
    %c0_i32 = arith.constant 0 : i32
    %c0_i32_0 = arith.constant 0 : i32
    %c0_i32_1 = arith.constant 0 : i32
    return %c0_i32, %c0_i32_0 : i32, i32
  }
  func.func @transform_2(%arg0: i32) -> (i32, i32) {
    %c0_i32 = arith.constant 0 : i32
    %c0_i32_0 = arith.constant 0 : i32
    %c0_i32_1 = arith.constant 0 : i32
    return %c0_i32, %c0_i32_0 : i32, i32
  }
  func.func @transform_3(%arg0: i32) -> (i32, i32, i32) {
    %c0_i32 = arith.constant 0 : i32
    %c0_i32_0 = arith.constant 0 : i32
    %c0_i32_1 = arith.constant 0 : i32
    return %arg0, %c0_i32, %c0_i32_0 : i32, i32, i32
  }
}

module attributes {stable_mosaic.version = 11 : i64} {
  func.func @_conv_proj_kernel(%arg0: i32, %arg1: memref<1x39x64xf32, #tpu.memory_space<vmem>>, %arg2: memref<64x32xbf16, #tpu.memory_space<vmem>>, %arg3: memref<1x32xf32, #tpu.memory_space<vmem>>, %arg4: memref<32x64xbf16, #tpu.memory_space<vmem>>, %arg5: memref<1x64xf32, #tpu.memory_space<vmem>>, %arg6: memref<1x39x32xf32, #tpu.memory_space<vmem>>, %arg7: memref<1x39x64xf32, #tpu.memory_space<vmem>>) attributes {dimension_semantics = [#tpu.dimension_semantics<parallel>], iteration_bounds = array<i64: 2>, scalar_prefetch = 0 : i64, scratch_operands = 0 : i64, tpu.core_type = #tpu.core_type<tc>, window_params = [{transform_indices = @transform_0, window_bounds = array<i64: 1, 39, 64>}, {pipeline_mode = #tpu.pipeline_mode<synchronous>, transform_indices = @transform_1, window_bounds = array<i64: 64, 32>}, {pipeline_mode = #tpu.pipeline_mode<synchronous>, transform_indices = @transform_2, window_bounds = array<i64: 1, 32>}, {pipeline_mode = #tpu.pipeline_mode<synchronous>, transform_indices = @transform_3, window_bounds = array<i64: 32, 64>}, {pipeline_mode = #tpu.pipeline_mode<synchronous>, transform_indices = @transform_4, window_bounds = array<i64: 1, 64>}, {transform_indices = @transform_5, window_bounds = array<i64: 1, 39, 32>}, {transform_indices = @transform_6, window_bounds = array<i64: 1, 39, 64>}]} {
    %c0 = arith.constant 0 : index
    %c0_0 = arith.constant 0 : index
    %c0_1 = arith.constant 0 : index
    %0 = vector.load %arg1[%c0, %c0_0, %c0_1] : memref<1x39x64xf32, #tpu.memory_space<vmem>>, vector<1x39x64xf32>
    %1 = vector.shape_cast %0 : vector<1x39x64xf32> to vector<39x64xf32>
    %c0_2 = arith.constant 0 : index
    %c0_3 = arith.constant 0 : index
    %2 = vector.load %arg2[%c0_2, %c0_3] : memref<64x32xbf16, #tpu.memory_space<vmem>>, vector<64x32xbf16>
    %3 = arith.truncf %1 : vector<39x64xf32> to vector<39x64xbf16>
    %cst = arith.constant dense<0.000000e+00> : vector<39x32xf32>
    %4 = tpu.matmul %3, %2, %cst {dimension_numbers = #tpu.dot_dimension_numbers<[1], [0], [0], [1], [0, 0, 1, 1], [], []>} : vector<39x64xbf16>, vector<64x32xbf16>, vector<39x32xf32> -> vector<39x32xf32>
    %c0_4 = arith.constant 0 : index
    %c0_5 = arith.constant 0 : index
    %5 = vector.load %arg3[%c0_4, %c0_5] : memref<1x32xf32, #tpu.memory_space<vmem>>, vector<1x32xf32>
    %6 = vector.broadcast %5 : vector<1x32xf32> to vector<39x32xf32>
    %7 = arith.addf %4, %6 : vector<39x32xf32>
    %8 = arith.mulf %7, %7 : vector<39x32xf32>
    %9 = arith.mulf %7, %8 : vector<39x32xf32>
    %cst_6 = arith.constant 4.471500e-02 : f32
    %10 = vector.broadcast %cst_6 : f32 to vector<39x32xf32>
    %11 = arith.mulf %10, %9 : vector<39x32xf32>
    %12 = arith.addf %7, %11 : vector<39x32xf32>
    %cst_7 = arith.constant 0.797884583 : f32
    %13 = vector.broadcast %cst_7 : f32 to vector<39x32xf32>
    %14 = arith.mulf %13, %12 : vector<39x32xf32>
    %15 = math.tanh %14 : vector<39x32xf32>
    %cst_8 = arith.constant 1.000000e+00 : f32
    %16 = vector.broadcast %cst_8 : f32 to vector<39x32xf32>
    %17 = arith.addf %16, %15 : vector<39x32xf32>
    %cst_9 = arith.constant 5.000000e-01 : f32
    %18 = vector.broadcast %cst_9 : f32 to vector<39x32xf32>
    %19 = arith.mulf %18, %17 : vector<39x32xf32>
    %20 = arith.mulf %7, %19 : vector<39x32xf32>
    %c0_10 = arith.constant 0 : index
    %c0_11 = arith.constant 0 : index
    %c0_12 = arith.constant 0 : index
    %21 = vector.load %arg6[%c0_10, %c0_11, %c0_12] : memref<1x39x32xf32, #tpu.memory_space<vmem>>, vector<1x39x32xf32>
    %22 = vector.shape_cast %21 : vector<1x39x32xf32> to vector<39x32xf32>
    %23 = vector.shape_cast %20 : vector<39x32xf32> to vector<1x39x32xf32>
    tpu.vector_store %arg6[%c0_10, %c0_11, %c0_12], %23 {strides = array<i32>} : memref<1x39x32xf32, #tpu.memory_space<vmem>>, vector<1x39x32xf32>,
    %c0_13 = arith.constant 0 : index
    %c0_14 = arith.constant 0 : index
    %24 = vector.load %arg4[%c0_13, %c0_14] : memref<32x64xbf16, #tpu.memory_space<vmem>>, vector<32x64xbf16>
    %25 = arith.truncf %20 : vector<39x32xf32> to vector<39x32xbf16>
    %cst_15 = arith.constant dense<0.000000e+00> : vector<39x64xf32>
    %26 = tpu.matmul %25, %24, %cst_15 {dimension_numbers = #tpu.dot_dimension_numbers<[1], [0], [0], [1], [0, 0, 1, 1], [], []>} : vector<39x32xbf16>, vector<32x64xbf16>, vector<39x64xf32> -> vector<39x64xf32>
    %c0_16 = arith.constant 0 : index
    %c0_17 = arith.constant 0 : index
    %27 = vector.load %arg5[%c0_16, %c0_17] : memref<1x64xf32, #tpu.memory_space<vmem>>, vector<1x64xf32>
    %28 = vector.broadcast %27 : vector<1x64xf32> to vector<39x64xf32>
    %29 = arith.addf %26, %28 : vector<39x64xf32>
    %c0_18 = arith.constant 0 : index
    %c0_19 = arith.constant 0 : index
    %c0_20 = arith.constant 0 : index
    %30 = vector.load %arg7[%c0_18, %c0_19, %c0_20] : memref<1x39x64xf32, #tpu.memory_space<vmem>>, vector<1x39x64xf32>
    %31 = vector.shape_cast %30 : vector<1x39x64xf32> to vector<39x64xf32>
    %32 = vector.shape_cast %29 : vector<39x64xf32> to vector<1x39x64xf32>
    tpu.vector_store %arg7[%c0_18, %c0_19, %c0_20], %32 {strides = array<i32>} : memref<1x39x64xf32, #tpu.memory_space<vmem>>, vector<1x39x64xf32>,
    return
  }
  func.func @transform_0(%arg0: i32) -> (i32, i32, i32) {
    %c0_i32 = arith.constant 0 : i32
    %c0_i32_0 = arith.constant 0 : i32
    %c0_i32_1 = arith.constant 0 : i32
    return %arg0, %c0_i32, %c0_i32_0 : i32, i32, i32
  }
  func.func @transform_1(%arg0: i32) -> (i32, i32) {
    %c0_i32 = arith.constant 0 : i32
    %c0_i32_0 = arith.constant 0 : i32
    %c0_i32_1 = arith.constant 0 : i32
    return %c0_i32, %c0_i32_0 : i32, i32
  }
  func.func @transform_2(%arg0: i32) -> (i32, i32) {
    %c0_i32 = arith.constant 0 : i32
    %c0_i32_0 = arith.constant 0 : i32
    %c0_i32_1 = arith.constant 0 : i32
    return %c0_i32, %c0_i32_0 : i32, i32
  }
  func.func @transform_3(%arg0: i32) -> (i32, i32) {
    %c0_i32 = arith.constant 0 : i32
    %c0_i32_0 = arith.constant 0 : i32
    %c0_i32_1 = arith.constant 0 : i32
    return %c0_i32, %c0_i32_0 : i32, i32
  }
  func.func @transform_4(%arg0: i32) -> (i32, i32) {
    %c0_i32 = arith.constant 0 : i32
    %c0_i32_0 = arith.constant 0 : i32
    %c0_i32_1 = arith.constant 0 : i32
    return %c0_i32, %c0_i32_0 : i32, i32
  }
  func.func @transform_5(%arg0: i32) -> (i32, i32, i32) {
    %c0_i32 = arith.constant 0 : i32
    %c0_i32_0 = arith.constant 0 : i32
    %c0_i32_1 = arith.constant 0 : i32
    return %arg0, %c0_i32, %c0_i32_0 : i32, i32, i32
  }
  func.func @transform_6(%arg0: i32) -> (i32, i32, i32) {
    %c0_i32 = arith.constant 0 : i32
    %c0_i32_0 = arith.constant 0 : i32
    %c0_i32_1 = arith.constant 0 : i32
    return %arg0, %c0_i32, %c0_i32_0 : i32, i32, i32
  }
}

module attributes {stable_mosaic.version = 11 : i64} {
  func.func @_encoder_pred_kernel(%arg0: i32, %arg1: i32, %arg2: memref<1x40x512xf32, #tpu.memory_space<vmem>>, %arg3: memref<1x40x64xf32, #tpu.memory_space<vmem>>, %arg4: memref<1x1x40xf32, #tpu.memory_space<vmem>>, %arg5: memref<512x64xbf16, #tpu.memory_space<vmem>>, %arg6: memref<1x64xf32, #tpu.memory_space<vmem>>, %arg7: memref<1x64xf32, #tpu.memory_space<vmem>>, %arg8: memref<1x64xf32, #tpu.memory_space<vmem>>, %arg9: memref<1x64x192xbf16, #tpu.memory_space<vmem>>, %arg10: memref<1x1x192xf32, #tpu.memory_space<vmem>>, %arg11: memref<1x64x64xbf16, #tpu.memory_space<vmem>>, %arg12: memref<1x1x64xf32, #tpu.memory_space<vmem>>, %arg13: memref<1x1x64xf32, #tpu.memory_space<vmem>>, %arg14: memref<1x1x64xf32, #tpu.memory_space<vmem>>, %arg15: memref<1x64x128xbf16, #tpu.memory_space<vmem>>, %arg16: memref<1x1x128xf32, #tpu.memory_space<vmem>>, %arg17: memref<1x128x64xbf16, #tpu.memory_space<vmem>>, %arg18: memref<1x1x64xf32, #tpu.memory_space<vmem>>, %arg19: memref<1x1x64xf32, #tpu.memory_space<vmem>>, %arg20: memref<1x1x64xf32, #tpu.memory_space<vmem>>, %arg21: memref<64x128xbf16, #tpu.memory_space<vmem>>, %arg22: memref<1x128xf32, #tpu.memory_space<vmem>>, %arg23: memref<128x64xbf16, #tpu.memory_space<vmem>>, %arg24: memref<1x64xf32, #tpu.memory_space<vmem>>, %arg25: memref<1x40x64xf32, #tpu.memory_space<vmem>>, %arg26: memref<1x40x64xf32, #tpu.memory_space<vmem>>, %arg27: memref<40x64xf32, #tpu.memory_space<vmem>>) attributes {dimension_semantics = [#tpu.dimension_semantics<parallel>, #tpu.dimension_semantics<arbitrary>], iteration_bounds = array<i64: 2, 2>, scalar_prefetch = 0 : i64, scratch_operands = 1 : i64, tpu.core_type = #tpu.core_type<tc>, window_params = [{transform_indices = @transform_0, window_bounds = array<i64: 1, 40, 512>}, {transform_indices = @transform_1, window_bounds = array<i64: 1, 40, 64>}, {transform_indices = @transform_2, window_bounds = array<i64: 1, 1, 40>}, {pipeline_mode = #tpu.pipeline_mode<synchronous>, transform_indices = @transform_3, window_bounds = array<i64: 512, 64>}, {pipeline_mode = #tpu.pipeline_mode<synchronous>, transform_indices = @transform_4, window_bounds = array<i64: 1, 64>}, {pipeline_mode = #tpu.pipeline_mode<synchronous>, transform_indices = @transform_5, window_bounds = array<i64: 1, 64>}, {pipeline_mode = #tpu.pipeline_mode<synchronous>, transform_indices = @transform_6, window_bounds = array<i64: 1, 64>}, {transform_indices = @transform_7, window_bounds = array<i64: 1, 64, 192>}, {transform_indices = @transform_8, window_bounds = array<i64: 1, 1, 192>}, {transform_indices = @transform_9, window_bounds = array<i64: 1, 64, 64>}, {transform_indices = @transform_10, window_bounds = array<i64: 1, 1, 64>}, {transform_indices = @transform_11, window_bounds = array<i64: 1, 1, 64>}, {transform_indices = @transform_12, window_bounds = array<i64: 1, 1, 64>}, {transform_indices = @transform_13, window_bounds = array<i64: 1, 64, 128>}, {transform_indices = @transform_14, window_bounds = array<i64: 1, 1, 128>}, {transform_indices = @transform_15, window_bounds = array<i64: 1, 128, 64>}, {transform_indices = @transform_16, window_bounds = array<i64: 1, 1, 64>}, {transform_indices = @transform_17, window_bounds = array<i64: 1, 1, 64>}, {transform_indices = @transform_18, window_bounds = array<i64: 1, 1, 64>}, {pipeline_mode = #tpu.pipeline_mode<synchronous>, transform_indices = @transform_19, window_bounds = array<i64: 64, 128>}, {pipeline_mode = #tpu.pipeline_mode<synchronous>, transform_indices = @transform_20, window_bounds = array<i64: 1, 128>}, {pipeline_mode = #tpu.pipeline_mode<synchronous>, transform_indices = @transform_21, window_bounds = array<i64: 128, 64>}, {pipeline_mode = #tpu.pipeline_mode<synchronous>, transform_indices = @transform_22, window_bounds = array<i64: 1, 64>}, {transform_indices = @transform_23, window_bounds = array<i64: 1, 40, 64>}, {transform_indices = @transform_24, window_bounds = array<i64: 1, 40, 64>}]} {
    %c0_i32 = arith.constant 0 : i32
    %0 = arith.cmpi eq, %arg1, %c0_i32 : i32
    %1 = arith.extui %0 : i1 to i32
    %c0_i32_0 = arith.constant 0 : i32
    %2 = arith.cmpi ne, %1, %c0_i32_0 : i32
    scf.if %2 {
      %c0_85 = arith.constant 0 : index
      %c0_86 = arith.constant 0 : index
      %c0_87 = arith.constant 0 : index
      %216 = vector.load %arg2[%c0_85, %c0_86, %c0_87] : memref<1x40x512xf32, #tpu.memory_space<vmem>>, vector<1x40x512xf32>
      %217 = vector.shape_cast %216 : vector<1x40x512xf32> to vector<40x512xf32>
      %c0_88 = arith.constant 0 : index
      %c0_89 = arith.constant 0 : index
      %218 = vector.load %arg5[%c0_88, %c0_89] : memref<512x64xbf16, #tpu.memory_space<vmem>>, vector<512x64xbf16>
      %219 = arith.truncf %217 : vector<40x512xf32> to vector<40x512xbf16>
      %cst_90 = arith.constant dense<0.000000e+00> : vector<40x64xf32>
      %220 = tpu.matmul %219, %218, %cst_90 {dimension_numbers = #tpu.dot_dimension_numbers<[1], [0], [0], [1], [0, 0, 1, 1], [], []>} : vector<40x512xbf16>, vector<512x64xbf16>, vector<40x64xf32> -> vector<40x64xf32>
      %c0_91 = arith.constant 0 : index
      %c0_92 = arith.constant 0 : index
      %221 = vector.load %arg6[%c0_91, %c0_92] : memref<1x64xf32, #tpu.memory_space<vmem>>, vector<1x64xf32>
      %222 = vector.broadcast %221 : vector<1x64xf32> to vector<40x64xf32>
      %223 = arith.addf %220, %222 : vector<40x64xf32>
      %224 = arith.mulf %223, %223 : vector<40x64xf32>
      %225 = arith.mulf %223, %224 : vector<40x64xf32>
      %cst_93 = arith.constant 4.471500e-02 : f32
      %226 = vector.broadcast %cst_93 : f32 to vector<40x64xf32>
      %227 = arith.mulf %226, %225 : vector<40x64xf32>
      %228 = arith.addf %223, %227 : vector<40x64xf32>
      %cst_94 = arith.constant 0.797884583 : f32
      %229 = vector.broadcast %cst_94 : f32 to vector<40x64xf32>
      %230 = arith.mulf %229, %228 : vector<40x64xf32>
      %231 = math.tanh %230 : vector<40x64xf32>
      %cst_95 = arith.constant 1.000000e+00 : f32
      %232 = vector.broadcast %cst_95 : f32 to vector<40x64xf32>
      %233 = arith.addf %232, %231 : vector<40x64xf32>
      %cst_96 = arith.constant 5.000000e-01 : f32
      %234 = vector.broadcast %cst_96 : f32 to vector<40x64xf32>
      %235 = arith.mulf %234, %233 : vector<40x64xf32>
      %236 = arith.mulf %223, %235 : vector<40x64xf32>
      %c0_97 = arith.constant 0 : index
      %c0_98 = arith.constant 0 : index
      %c0_99 = arith.constant 0 : index
      %237 = vector.load %arg3[%c0_97, %c0_98, %c0_99] : memref<1x40x64xf32, #tpu.memory_space<vmem>>, vector<1x40x64xf32>
      %238 = vector.shape_cast %237 : vector<1x40x64xf32> to vector<40x64xf32>
      %239 = arith.addf %238, %236 : vector<40x64xf32>
      %c0_100 = arith.constant 0 : index
      %c0_101 = arith.constant 0 : index
      %240 = vector.load %arg7[%c0_100, %c0_101] : memref<1x64xf32, #tpu.memory_space<vmem>>, vector<1x64xf32>
      %c0_102 = arith.constant 0 : index
      %c0_103 = arith.constant 0 : index
      %241 = vector.load %arg8[%c0_102, %c0_103] : memref<1x64xf32, #tpu.memory_space<vmem>>, vector<1x64xf32>
      %cst_104 = arith.constant dense<0.000000e+00> : vector<40xf32>
      %242 = vector.multi_reduction <add>, %239, %cst_104 [1] : vector<40x64xf32> to vector<40xf32>
      %243 = vector.shape_cast %242 : vector<40xf32> to vector<40x1xf32>
      %cst_105 = arith.constant 6.400000e+01 : f32
      %244 = vector.broadcast %cst_105 : f32 to vector<40x1xf32>
      %245 = arith.divf %243, %244 : vector<40x1xf32>
      %246 = vector.broadcast %245 : vector<40x1xf32> to vector<40x64xf32>
      %247 = arith.subf %239, %246 : vector<40x64xf32>
      %248 = arith.mulf %247, %247 : vector<40x64xf32>
      %cst_106 = arith.constant dense<0.000000e+00> : vector<40xf32>
      %249 = vector.multi_reduction <add>, %248, %cst_106 [1] : vector<40x64xf32> to vector<40xf32>
      %250 = vector.shape_cast %249 : vector<40xf32> to vector<40x1xf32>
      %cst_107 = arith.constant 6.400000e+01 : f32
      %251 = vector.broadcast %cst_107 : f32 to vector<40x1xf32>
      %252 = arith.divf %250, %251 : vector<40x1xf32>
      %253 = vector.broadcast %245 : vector<40x1xf32> to vector<40x64xf32>
      %254 = arith.subf %239, %253 : vector<40x64xf32>
      %cst_108 = arith.constant 9.99999974E-6 : f32
      %255 = vector.broadcast %cst_108 : f32 to vector<40x1xf32>
      %256 = arith.addf %252, %255 : vector<40x1xf32>
      %257 = math.rsqrt %256 : vector<40x1xf32>
      %258 = vector.broadcast %257 : vector<40x1xf32> to vector<40x64xf32>
      %259 = arith.mulf %254, %258 : vector<40x64xf32>
      %260 = vector.broadcast %240 : vector<1x64xf32> to vector<40x64xf32>
      %261 = arith.mulf %259, %260 : vector<40x64xf32>
      %262 = vector.broadcast %241 : vector<1x64xf32> to vector<40x64xf32>
      %263 = arith.addf %261, %262 : vector<40x64xf32>
      %c0_109 = arith.constant 0 : index
      %c0_110 = arith.constant 0 : index
      %264 = vector.load %arg27[%c0_109, %c0_110] : memref<40x64xf32, #tpu.memory_space<vmem>>, vector<40x64xf32>
      tpu.vector_store %arg27[%c0_109, %c0_110], %263 {strides = array<i32>} : memref<40x64xf32, #tpu.memory_space<vmem>>, vector<40x64xf32>,
    } else {
    }
    %c0 = arith.constant 0 : index
    %c0_1 = arith.constant 0 : index
    %3 = vector.load %arg27[%c0, %c0_1] : memref<40x64xf32, #tpu.memory_space<vmem>>, vector<40x64xf32>
    %c0_2 = arith.constant 0 : index
    %c0_3 = arith.constant 0 : index
    %c0_4 = arith.constant 0 : index
    %4 = vector.load %arg9[%c0_2, %c0_3, %c0_4] : memref<1x64x192xbf16, #tpu.memory_space<vmem>>, vector<1x64x192xbf16>
    %5 = vector.shape_cast %4 : vector<1x64x192xbf16> to vector<64x192xbf16>
    %6 = arith.truncf %3 : vector<40x64xf32> to vector<40x64xbf16>
    %cst = arith.constant dense<0.000000e+00> : vector<40x192xf32>
    %7 = tpu.matmul %6, %5, %cst {dimension_numbers = #tpu.dot_dimension_numbers<[1], [0], [0], [1], [0, 0, 1, 1], [], []>} : vector<40x64xbf16>, vector<64x192xbf16>, vector<40x192xf32> -> vector<40x192xf32>
    %c0_5 = arith.constant 0 : index
    %c0_6 = arith.constant 0 : index
    %c0_7 = arith.constant 0 : index
    %8 = vector.load %arg10[%c0_5, %c0_6, %c0_7] : memref<1x1x192xf32, #tpu.memory_space<vmem>>, vector<1x1x192xf32>
    %9 = vector.shape_cast %8 : vector<1x1x192xf32> to vector<1x192xf32>
    %10 = vector.broadcast %9 : vector<1x192xf32> to vector<40x192xf32>
    %11 = arith.addf %7, %10 : vector<40x192xf32>
    %c0_8 = arith.constant 0 : index
    %c0_9 = arith.constant 0 : index
    %c0_10 = arith.constant 0 : index
    %12 = vector.load %arg11[%c0_8, %c0_9, %c0_10] : memref<1x64x64xbf16, #tpu.memory_space<vmem>>, vector<1x64x64xbf16>
    %13 = vector.shape_cast %12 : vector<1x64x64xbf16> to vector<64x64xbf16>
    %c0_11 = arith.constant 0 : index
    %c0_12 = arith.constant 0 : index
    %c0_13 = arith.constant 0 : index
    %14 = vector.load %arg4[%c0_11, %c0_12, %c0_13] : memref<1x1x40xf32, #tpu.memory_space<vmem>>, vector<1x1x40xf32>
    %15 = vector.shape_cast %14 : vector<1x1x40xf32> to vector<1x40xf32>
    %cst_14 = arith.constant 0.000000e+00 : f32
    %16 = vector.broadcast %cst_14 : f32 to vector<40x64xf32>
    %17 = vector.extract_strided_slice %11 {offsets = [0, 0], sizes = [40, 16], strides = [1, 1]} : vector<40x192xf32> to vector<40x16xf32>
    %18 = vector.extract_strided_slice %11 {offsets = [0, 64], sizes = [40, 16], strides = [1, 1]} : vector<40x192xf32> to vector<40x16xf32>
    %19 = vector.extract_strided_slice %11 {offsets = [0, 128], sizes = [40, 16], strides = [1, 1]} : vector<40x192xf32> to vector<40x16xf32>
    %20 = arith.truncf %17 : vector<40x16xf32> to vector<40x16xbf16>
    %21 = arith.truncf %18 : vector<40x16xf32> to vector<40x16xbf16>
    %cst_15 = arith.constant dense<0.000000e+00> : vector<40x40xf32>
    %22 = tpu.matmul %20, %21, %cst_15 {dimension_numbers = #tpu.dot_dimension_numbers<[1], [1], [0], [0], [0, 0, 1, 0], [], []>} : vector<40x16xbf16>, vector<40x16xbf16>, vector<40x40xf32> -> vector<40x40xf32>
    %cst_16 = arith.constant 2.500000e-01 : f32
    %23 = vector.broadcast %cst_16 : f32 to vector<40x40xf32>
    %24 = arith.mulf %22, %23 : vector<40x40xf32>
    %25 = vector.broadcast %15 : vector<1x40xf32> to vector<40x40xf32>
    %26 = arith.addf %24, %25 : vector<40x40xf32>
    %cst_17 = arith.constant dense<0xFF800000> : vector<40xf32>
    %27 = vector.multi_reduction <maximumf>, %26, %cst_17 [1] : vector<40x40xf32> to vector<40xf32>
    %28 = vector.shape_cast %27 : vector<40xf32> to vector<40x1xf32>
    %29 = vector.broadcast %28 : vector<40x1xf32> to vector<40x40xf32>
    %30 = arith.subf %26, %29 : vector<40x40xf32>
    %31 = math.exp %30 : vector<40x40xf32>
    %cst_18 = arith.constant dense<0.000000e+00> : vector<40xf32>
    %32 = vector.multi_reduction <add>, %31, %cst_18 [1] : vector<40x40xf32> to vector<40xf32>
    %33 = vector.shape_cast %32 : vector<40xf32> to vector<40x1xf32>
    %34 = tpu.reciprocal %33 {approx = true} : vector<40x1xf32> -> vector<40x1xf32>
    %35 = vector.broadcast %34 : vector<40x1xf32> to vector<40x40xf32>
    %36 = arith.mulf %31, %35 : vector<40x40xf32>
    %37 = arith.truncf %36 : vector<40x40xf32> to vector<40x40xbf16>
    %38 = arith.truncf %19 : vector<40x16xf32> to vector<40x16xbf16>
    %cst_19 = arith.constant dense<0.000000e+00> : vector<40x16xf32>
    %39 = tpu.matmul %37, %38, %cst_19 {dimension_numbers = #tpu.dot_dimension_numbers<[1], [0], [0], [1], [0, 0, 1, 1], [], []>} : vector<40x40xbf16>, vector<40x16xbf16>, vector<40x16xf32> -> vector<40x16xf32>
    %40 = vector.extract_strided_slice %13 {offsets = [0, 0], sizes = [16, 64], strides = [1, 1]} : vector<64x64xbf16> to vector<16x64xbf16>
    %41 = arith.truncf %39 : vector<40x16xf32> to vector<40x16xbf16>
    %cst_20 = arith.constant dense<0.000000e+00> : vector<40x64xf32>
    %42 = tpu.matmul %41, %40, %cst_20 {dimension_numbers = #tpu.dot_dimension_numbers<[1], [0], [0], [1], [0, 0, 1, 1], [], []>} : vector<40x16xbf16>, vector<16x64xbf16>, vector<40x64xf32> -> vector<40x64xf32>
    %43 = arith.addf %16, %42 : vector<40x64xf32>
    %44 = vector.extract_strided_slice %11 {offsets = [0, 16], sizes = [40, 16], strides = [1, 1]} : vector<40x192xf32> to vector<40x16xf32>
    %45 = vector.extract_strided_slice %11 {offsets = [0, 80], sizes = [40, 16], strides = [1, 1]} : vector<40x192xf32> to vector<40x16xf32>
    %46 = vector.extract_strided_slice %11 {offsets = [0, 144], sizes = [40, 16], strides = [1, 1]} : vector<40x192xf32> to vector<40x16xf32>
    %47 = arith.truncf %44 : vector<40x16xf32> to vector<40x16xbf16>
    %48 = arith.truncf %45 : vector<40x16xf32> to vector<40x16xbf16>
    %cst_21 = arith.constant dense<0.000000e+00> : vector<40x40xf32>
    %49 = tpu.matmul %47, %48, %cst_21 {dimension_numbers = #tpu.dot_dimension_numbers<[1], [1], [0], [0], [0, 0, 1, 0], [], []>} : vector<40x16xbf16>, vector<40x16xbf16>, vector<40x40xf32> -> vector<40x40xf32>
    %cst_22 = arith.constant 2.500000e-01 : f32
    %50 = vector.broadcast %cst_22 : f32 to vector<40x40xf32>
    %51 = arith.mulf %49, %50 : vector<40x40xf32>
    %52 = vector.broadcast %15 : vector<1x40xf32> to vector<40x40xf32>
    %53 = arith.addf %51, %52 : vector<40x40xf32>
    %cst_23 = arith.constant dense<0xFF800000> : vector<40xf32>
    %54 = vector.multi_reduction <maximumf>, %53, %cst_23 [1] : vector<40x40xf32> to vector<40xf32>
    %55 = vector.shape_cast %54 : vector<40xf32> to vector<40x1xf32>
    %56 = vector.broadcast %55 : vector<40x1xf32> to vector<40x40xf32>
    %57 = arith.subf %53, %56 : vector<40x40xf32>
    %58 = math.exp %57 : vector<40x40xf32>
    %cst_24 = arith.constant dense<0.000000e+00> : vector<40xf32>
    %59 = vector.multi_reduction <add>, %58, %cst_24 [1] : vector<40x40xf32> to vector<40xf32>
    %60 = vector.shape_cast %59 : vector<40xf32> to vector<40x1xf32>
    %61 = tpu.reciprocal %60 {approx = true} : vector<40x1xf32> -> vector<40x1xf32>
    %62 = vector.broadcast %61 : vector<40x1xf32> to vector<40x40xf32>
    %63 = arith.mulf %58, %62 : vector<40x40xf32>
    %64 = arith.truncf %63 : vector<40x40xf32> to vector<40x40xbf16>
    %65 = arith.truncf %46 : vector<40x16xf32> to vector<40x16xbf16>
    %cst_25 = arith.constant dense<0.000000e+00> : vector<40x16xf32>
    %66 = tpu.matmul %64, %65, %cst_25 {dimension_numbers = #tpu.dot_dimension_numbers<[1], [0], [0], [1], [0, 0, 1, 1], [], []>} : vector<40x40xbf16>, vector<40x16xbf16>, vector<40x16xf32> -> vector<40x16xf32>
    %67 = vector.extract_strided_slice %13 {offsets = [16, 0], sizes = [16, 64], strides = [1, 1]} : vector<64x64xbf16> to vector<16x64xbf16>
    %68 = arith.truncf %66 : vector<40x16xf32> to vector<40x16xbf16>
    %cst_26 = arith.constant dense<0.000000e+00> : vector<40x64xf32>
    %69 = tpu.matmul %68, %67, %cst_26 {dimension_numbers = #tpu.dot_dimension_numbers<[1], [0], [0], [1], [0, 0, 1, 1], [], []>} : vector<40x16xbf16>, vector<16x64xbf16>, vector<40x64xf32> -> vector<40x64xf32>
    %70 = arith.addf %43, %69 : vector<40x64xf32>
    %71 = vector.extract_strided_slice %11 {offsets = [0, 32], sizes = [40, 16], strides = [1, 1]} : vector<40x192xf32> to vector<40x16xf32>
    %72 = vector.extract_strided_slice %11 {offsets = [0, 96], sizes = [40, 16], strides = [1, 1]} : vector<40x192xf32> to vector<40x16xf32>
    %73 = vector.extract_strided_slice %11 {offsets = [0, 160], sizes = [40, 16], strides = [1, 1]} : vector<40x192xf32> to vector<40x16xf32>
    %74 = arith.truncf %71 : vector<40x16xf32> to vector<40x16xbf16>
    %75 = arith.truncf %72 : vector<40x16xf32> to vector<40x16xbf16>
    %cst_27 = arith.constant dense<0.000000e+00> : vector<40x40xf32>
    %76 = tpu.matmul %74, %75, %cst_27 {dimension_numbers = #tpu.dot_dimension_numbers<[1], [1], [0], [0], [0, 0, 1, 0], [], []>} : vector<40x16xbf16>, vector<40x16xbf16>, vector<40x40xf32> -> vector<40x40xf32>
    %cst_28 = arith.constant 2.500000e-01 : f32
    %77 = vector.broadcast %cst_28 : f32 to vector<40x40xf32>
    %78 = arith.mulf %76, %77 : vector<40x40xf32>
    %79 = vector.broadcast %15 : vector<1x40xf32> to vector<40x40xf32>
    %80 = arith.addf %78, %79 : vector<40x40xf32>
    %cst_29 = arith.constant dense<0xFF800000> : vector<40xf32>
    %81 = vector.multi_reduction <maximumf>, %80, %cst_29 [1] : vector<40x40xf32> to vector<40xf32>
    %82 = vector.shape_cast %81 : vector<40xf32> to vector<40x1xf32>
    %83 = vector.broadcast %82 : vector<40x1xf32> to vector<40x40xf32>
    %84 = arith.subf %80, %83 : vector<40x40xf32>
    %85 = math.exp %84 : vector<40x40xf32>
    %cst_30 = arith.constant dense<0.000000e+00> : vector<40xf32>
    %86 = vector.multi_reduction <add>, %85, %cst_30 [1] : vector<40x40xf32> to vector<40xf32>
    %87 = vector.shape_cast %86 : vector<40xf32> to vector<40x1xf32>
    %88 = tpu.reciprocal %87 {approx = true} : vector<40x1xf32> -> vector<40x1xf32>
    %89 = vector.broadcast %88 : vector<40x1xf32> to vector<40x40xf32>
    %90 = arith.mulf %85, %89 : vector<40x40xf32>
    %91 = arith.truncf %90 : vector<40x40xf32> to vector<40x40xbf16>
    %92 = arith.truncf %73 : vector<40x16xf32> to vector<40x16xbf16>
    %cst_31 = arith.constant dense<0.000000e+00> : vector<40x16xf32>
    %93 = tpu.matmul %91, %92, %cst_31 {dimension_numbers = #tpu.dot_dimension_numbers<[1], [0], [0], [1], [0, 0, 1, 1], [], []>} : vector<40x40xbf16>, vector<40x16xbf16>, vector<40x16xf32> -> vector<40x16xf32>
    %94 = vector.extract_strided_slice %13 {offsets = [32, 0], sizes = [16, 64], strides = [1, 1]} : vector<64x64xbf16> to vector<16x64xbf16>
    %95 = arith.truncf %93 : vector<40x16xf32> to vector<40x16xbf16>
    %cst_32 = arith.constant dense<0.000000e+00> : vector<40x64xf32>
    %96 = tpu.matmul %95, %94, %cst_32 {dimension_numbers = #tpu.dot_dimension_numbers<[1], [0], [0], [1], [0, 0, 1, 1], [], []>} : vector<40x16xbf16>, vector<16x64xbf16>, vector<40x64xf32> -> vector<40x64xf32>
    %97 = arith.addf %70, %96 : vector<40x64xf32>
    %98 = vector.extract_strided_slice %11 {offsets = [0, 48], sizes = [40, 16], strides = [1, 1]} : vector<40x192xf32> to vector<40x16xf32>
    %99 = vector.extract_strided_slice %11 {offsets = [0, 112], sizes = [40, 16], strides = [1, 1]} : vector<40x192xf32> to vector<40x16xf32>
    %100 = vector.extract_strided_slice %11 {offsets = [0, 176], sizes = [40, 16], strides = [1, 1]} : vector<40x192xf32> to vector<40x16xf32>
    %101 = arith.truncf %98 : vector<40x16xf32> to vector<40x16xbf16>
    %102 = arith.truncf %99 : vector<40x16xf32> to vector<40x16xbf16>
    %cst_33 = arith.constant dense<0.000000e+00> : vector<40x40xf32>
    %103 = tpu.matmul %101, %102, %cst_33 {dimension_numbers = #tpu.dot_dimension_numbers<[1], [1], [0], [0], [0, 0, 1, 0], [], []>} : vector<40x16xbf16>, vector<40x16xbf16>, vector<40x40xf32> -> vector<40x40xf32>
    %cst_34 = arith.constant 2.500000e-01 : f32
    %104 = vector.broadcast %cst_34 : f32 to vector<40x40xf32>
    %105 = arith.mulf %103, %104 : vector<40x40xf32>
    %106 = vector.broadcast %15 : vector<1x40xf32> to vector<40x40xf32>
    %107 = arith.addf %105, %106 : vector<40x40xf32>
    %cst_35 = arith.constant dense<0xFF800000> : vector<40xf32>
    %108 = vector.multi_reduction <maximumf>, %107, %cst_35 [1] : vector<40x40xf32> to vector<40xf32>
    %109 = vector.shape_cast %108 : vector<40xf32> to vector<40x1xf32>
    %110 = vector.broadcast %109 : vector<40x1xf32> to vector<40x40xf32>
    %111 = arith.subf %107, %110 : vector<40x40xf32>
    %112 = math.exp %111 : vector<40x40xf32>
    %cst_36 = arith.constant dense<0.000000e+00> : vector<40xf32>
    %113 = vector.multi_reduction <add>, %112, %cst_36 [1] : vector<40x40xf32> to vector<40xf32>
    %114 = vector.shape_cast %113 : vector<40xf32> to vector<40x1xf32>
    %115 = tpu.reciprocal %114 {approx = true} : vector<40x1xf32> -> vector<40x1xf32>
    %116 = vector.broadcast %115 : vector<40x1xf32> to vector<40x40xf32>
    %117 = arith.mulf %112, %116 : vector<40x40xf32>
    %118 = arith.truncf %117 : vector<40x40xf32> to vector<40x40xbf16>
    %119 = arith.truncf %100 : vector<40x16xf32> to vector<40x16xbf16>
    %cst_37 = arith.constant dense<0.000000e+00> : vector<40x16xf32>
    %120 = tpu.matmul %118, %119, %cst_37 {dimension_numbers = #tpu.dot_dimension_numbers<[1], [0], [0], [1], [0, 0, 1, 1], [], []>} : vector<40x40xbf16>, vector<40x16xbf16>, vector<40x16xf32> -> vector<40x16xf32>
    %121 = vector.extract_strided_slice %13 {offsets = [48, 0], sizes = [16, 64], strides = [1, 1]} : vector<64x64xbf16> to vector<16x64xbf16>
    %122 = arith.truncf %120 : vector<40x16xf32> to vector<40x16xbf16>
    %cst_38 = arith.constant dense<0.000000e+00> : vector<40x64xf32>
    %123 = tpu.matmul %122, %121, %cst_38 {dimension_numbers = #tpu.dot_dimension_numbers<[1], [0], [0], [1], [0, 0, 1, 1], [], []>} : vector<40x16xbf16>, vector<16x64xbf16>, vector<40x64xf32> -> vector<40x64xf32>
    %124 = arith.addf %97, %123 : vector<40x64xf32>
    %c0_39 = arith.constant 0 : index
    %c0_40 = arith.constant 0 : index
    %c0_41 = arith.constant 0 : index
    %125 = vector.load %arg12[%c0_39, %c0_40, %c0_41] : memref<1x1x64xf32, #tpu.memory_space<vmem>>, vector<1x1x64xf32>
    %126 = vector.shape_cast %125 : vector<1x1x64xf32> to vector<1x64xf32>
    %127 = vector.broadcast %126 : vector<1x64xf32> to vector<40x64xf32>
    %128 = arith.addf %124, %127 : vector<40x64xf32>
    %129 = arith.addf %3, %128 : vector<40x64xf32>
    %c0_42 = arith.constant 0 : index
    %c0_43 = arith.constant 0 : index
    %c0_44 = arith.constant 0 : index
    %130 = vector.load %arg13[%c0_42, %c0_43, %c0_44] : memref<1x1x64xf32, #tpu.memory_space<vmem>>, vector<1x1x64xf32>
    %131 = vector.shape_cast %130 : vector<1x1x64xf32> to vector<1x64xf32>
    %c0_45 = arith.constant 0 : index
    %c0_46 = arith.constant 0 : index
    %c0_47 = arith.constant 0 : index
    %132 = vector.load %arg14[%c0_45, %c0_46, %c0_47] : memref<1x1x64xf32, #tpu.memory_space<vmem>>, vector<1x1x64xf32>
    %133 = vector.shape_cast %132 : vector<1x1x64xf32> to vector<1x64xf32>
    %cst_48 = arith.constant dense<0.000000e+00> : vector<40xf32>
    %134 = vector.multi_reduction <add>, %129, %cst_48 [1] : vector<40x64xf32> to vector<40xf32>
    %135 = vector.shape_cast %134 : vector<40xf32> to vector<40x1xf32>
    %cst_49 = arith.constant 6.400000e+01 : f32
    %136 = vector.broadcast %cst_49 : f32 to vector<40x1xf32>
    %137 = arith.divf %135, %136 : vector<40x1xf32>
    %138 = vector.broadcast %137 : vector<40x1xf32> to vector<40x64xf32>
    %139 = arith.subf %129, %138 : vector<40x64xf32>
    %140 = arith.mulf %139, %139 : vector<40x64xf32>
    %cst_50 = arith.constant dense<0.000000e+00> : vector<40xf32>
    %141 = vector.multi_reduction <add>, %140, %cst_50 [1] : vector<40x64xf32> to vector<40xf32>
    %142 = vector.shape_cast %141 : vector<40xf32> to vector<40x1xf32>
    %cst_51 = arith.constant 6.400000e+01 : f32
    %143 = vector.broadcast %cst_51 : f32 to vector<40x1xf32>
    %144 = arith.divf %142, %143 : vector<40x1xf32>
    %145 = vector.broadcast %137 : vector<40x1xf32> to vector<40x64xf32>
    %146 = arith.subf %129, %145 : vector<40x64xf32>
    %cst_52 = arith.constant 9.99999974E-6 : f32
    %147 = vector.broadcast %cst_52 : f32 to vector<40x1xf32>
    %148 = arith.addf %144, %147 : vector<40x1xf32>
    %149 = math.rsqrt %148 : vector<40x1xf32>
    %150 = vector.broadcast %149 : vector<40x1xf32> to vector<40x64xf32>
    %151 = arith.mulf %146, %150 : vector<40x64xf32>
    %152 = vector.broadcast %131 : vector<1x64xf32> to vector<40x64xf32>
    %153 = arith.mulf %151, %152 : vector<40x64xf32>
    %154 = vector.broadcast %133 : vector<1x64xf32> to vector<40x64xf32>
    %155 = arith.addf %153, %154 : vector<40x64xf32>
    %c0_53 = arith.constant 0 : index
    %c0_54 = arith.constant 0 : index
    %c0_55 = arith.constant 0 : index
    %156 = vector.load %arg15[%c0_53, %c0_54, %c0_55] : memref<1x64x128xbf16, #tpu.memory_space<vmem>>, vector<1x64x128xbf16>
    %157 = vector.shape_cast %156 : vector<1x64x128xbf16> to vector<64x128xbf16>
    %158 = arith.truncf %155 : vector<40x64xf32> to vector<40x64xbf16>
    %cst_56 = arith.constant dense<0.000000e+00> : vector<40x128xf32>
    %159 = tpu.matmul %158, %157, %cst_56 {dimension_numbers = #tpu.dot_dimension_numbers<[1], [0], [0], [1], [0, 0, 1, 1], [], []>} : vector<40x64xbf16>, vector<64x128xbf16>, vector<40x128xf32> -> vector<40x128xf32>
    %c0_57 = arith.constant 0 : index
    %c0_58 = arith.constant 0 : index
    %c0_59 = arith.constant 0 : index
    %160 = vector.load %arg16[%c0_57, %c0_58, %c0_59] : memref<1x1x128xf32, #tpu.memory_space<vmem>>, vector<1x1x128xf32>
    %161 = vector.shape_cast %160 : vector<1x1x128xf32> to vector<1x128xf32>
    %162 = vector.broadcast %161 : vector<1x128xf32> to vector<40x128xf32>
    %163 = arith.addf %159, %162 : vector<40x128xf32>
    %164 = arith.mulf %163, %163 : vector<40x128xf32>
    %165 = arith.mulf %163, %164 : vector<40x128xf32>
    %cst_60 = arith.constant 4.471500e-02 : f32
    %166 = vector.broadcast %cst_60 : f32 to vector<40x128xf32>
    %167 = arith.mulf %166, %165 : vector<40x128xf32>
    %168 = arith.addf %163, %167 : vector<40x128xf32>
    %cst_61 = arith.constant 0.797884583 : f32
    %169 = vector.broadcast %cst_61 : f32 to vector<40x128xf32>
    %170 = arith.mulf %169, %168 : vector<40x128xf32>
    %171 = math.tanh %170 : vector<40x128xf32>
    %cst_62 = arith.constant 1.000000e+00 : f32
    %172 = vector.broadcast %cst_62 : f32 to vector<40x128xf32>
    %173 = arith.addf %172, %171 : vector<40x128xf32>
    %cst_63 = arith.constant 5.000000e-01 : f32
    %174 = vector.broadcast %cst_63 : f32 to vector<40x128xf32>
    %175 = arith.mulf %174, %173 : vector<40x128xf32>
    %176 = arith.mulf %163, %175 : vector<40x128xf32>
    %c0_64 = arith.constant 0 : index
    %c0_65 = arith.constant 0 : index
    %c0_66 = arith.constant 0 : index
    %177 = vector.load %arg17[%c0_64, %c0_65, %c0_66] : memref<1x128x64xbf16, #tpu.memory_space<vmem>>, vector<1x128x64xbf16>
    %178 = vector.shape_cast %177 : vector<1x128x64xbf16> to vector<128x64xbf16>
    %179 = arith.truncf %176 : vector<40x128xf32> to vector<40x128xbf16>
    %cst_67 = arith.constant dense<0.000000e+00> : vector<40x64xf32>
    %180 = tpu.matmul %179, %178, %cst_67 {dimension_numbers = #tpu.dot_dimension_numbers<[1], [0], [0], [1], [0, 0, 1, 1], [], []>} : vector<40x128xbf16>, vector<128x64xbf16>, vector<40x64xf32> -> vector<40x64xf32>
    %c0_68 = arith.constant 0 : index
    %c0_69 = arith.constant 0 : index
    %c0_70 = arith.constant 0 : index
    %181 = vector.load %arg18[%c0_68, %c0_69, %c0_70] : memref<1x1x64xf32, #tpu.memory_space<vmem>>, vector<1x1x64xf32>
    %182 = vector.shape_cast %181 : vector<1x1x64xf32> to vector<1x64xf32>
    %183 = vector.broadcast %182 : vector<1x64xf32> to vector<40x64xf32>
    %184 = arith.addf %180, %183 : vector<40x64xf32>
    %185 = arith.addf %155, %184 : vector<40x64xf32>
    %c0_71 = arith.constant 0 : index
    %c0_72 = arith.constant 0 : index
    %c0_73 = arith.constant 0 : index
    %186 = vector.load %arg19[%c0_71, %c0_72, %c0_73] : memref<1x1x64xf32, #tpu.memory_space<vmem>>, vector<1x1x64xf32>
    %187 = vector.shape_cast %186 : vector<1x1x64xf32> to vector<1x64xf32>
    %c0_74 = arith.constant 0 : index
    %c0_75 = arith.constant 0 : index
    %c0_76 = arith.constant 0 : index
    %188 = vector.load %arg20[%c0_74, %c0_75, %c0_76] : memref<1x1x64xf32, #tpu.memory_space<vmem>>, vector<1x1x64xf32>
    %189 = vector.shape_cast %188 : vector<1x1x64xf32> to vector<1x64xf32>
    %cst_77 = arith.constant dense<0.000000e+00> : vector<40xf32>
    %190 = vector.multi_reduction <add>, %185, %cst_77 [1] : vector<40x64xf32> to vector<40xf32>
    %191 = vector.shape_cast %190 : vector<40xf32> to vector<40x1xf32>
    %cst_78 = arith.constant 6.400000e+01 : f32
    %192 = vector.broadcast %cst_78 : f32 to vector<40x1xf32>
    %193 = arith.divf %191, %192 : vector<40x1xf32>
    %194 = vector.broadcast %193 : vector<40x1xf32> to vector<40x64xf32>
    %195 = arith.subf %185, %194 : vector<40x64xf32>
    %196 = arith.mulf %195, %195 : vector<40x64xf32>
    %cst_79 = arith.constant dense<0.000000e+00> : vector<40xf32>
    %197 = vector.multi_reduction <add>, %196, %cst_79 [1] : vector<40x64xf32> to vector<40xf32>
    %198 = vector.shape_cast %197 : vector<40xf32> to vector<40x1xf32>
    %cst_80 = arith.constant 6.400000e+01 : f32
    %199 = vector.broadcast %cst_80 : f32 to vector<40x1xf32>
    %200 = arith.divf %198, %199 : vector<40x1xf32>
    %201 = vector.broadcast %193 : vector<40x1xf32> to vector<40x64xf32>
    %202 = arith.subf %185, %201 : vector<40x64xf32>
    %cst_81 = arith.constant 9.99999974E-6 : f32
    %203 = vector.broadcast %cst_81 : f32 to vector<40x1xf32>
    %204 = arith.addf %200, %203 : vector<40x1xf32>
    %205 = math.rsqrt %204 : vector<40x1xf32>
    %206 = vector.broadcast %205 : vector<40x1xf32> to vector<40x64xf32>
    %207 = arith.mulf %202, %206 : vector<40x64xf32>
    %208 = vector.broadcast %187 : vector<1x64xf32> to vector<40x64xf32>
    %209 = arith.mulf %207, %208 : vector<40x64xf32>
    %210 = vector.broadcast %189 : vector<1x64xf32> to vector<40x64xf32>
    %211 = arith.addf %209, %210 : vector<40x64xf32>
    %c0_82 = arith.constant 0 : index
    %c0_83 = arith.constant 0 : index
    %212 = vector.load %arg27[%c0_82, %c0_83] : memref<40x64xf32, #tpu.memory_space<vmem>>, vector<40x64xf32>
    tpu.vector_store %arg27[%c0_82, %c0_83], %211 {strides = array<i32>} : memref<40x64xf32, #tpu.memory_space<vmem>>, vector<40x64xf32>,
    %c1_i32 = arith.constant 1 : i32
    %213 = arith.cmpi eq, %arg1, %c1_i32 : i32
    %214 = arith.extui %213 : i1 to i32
    %c0_i32_84 = arith.constant 0 : i32
    %215 = arith.cmpi ne, %214, %c0_i32_84 : i32
    scf.if %215 {
      %c0_85 = arith.constant 0 : index
      %c0_86 = arith.constant 0 : index
      %c0_87 = arith.constant 0 : index
      %216 = vector.load %arg25[%c0_85, %c0_86, %c0_87] : memref<1x40x64xf32, #tpu.memory_space<vmem>>, vector<1x40x64xf32>
      %217 = vector.shape_cast %216 : vector<1x40x64xf32> to vector<40x64xf32>
      %218 = vector.shape_cast %211 : vector<40x64xf32> to vector<1x40x64xf32>
      tpu.vector_store %arg25[%c0_85, %c0_86, %c0_87], %218 {strides = array<i32>} : memref<1x40x64xf32, #tpu.memory_space<vmem>>, vector<1x40x64xf32>,
      %c0_88 = arith.constant 0 : index
      %c0_89 = arith.constant 0 : index
      %219 = vector.load %arg21[%c0_88, %c0_89] : memref<64x128xbf16, #tpu.memory_space<vmem>>, vector<64x128xbf16>
      %220 = arith.truncf %211 : vector<40x64xf32> to vector<40x64xbf16>
      %cst_90 = arith.constant dense<0.000000e+00> : vector<40x128xf32>
      %221 = tpu.matmul %220, %219, %cst_90 {dimension_numbers = #tpu.dot_dimension_numbers<[1], [0], [0], [1], [0, 0, 1, 1], [], []>} : vector<40x64xbf16>, vector<64x128xbf16>, vector<40x128xf32> -> vector<40x128xf32>
      %c0_91 = arith.constant 0 : index
      %c0_92 = arith.constant 0 : index
      %222 = vector.load %arg22[%c0_91, %c0_92] : memref<1x128xf32, #tpu.memory_space<vmem>>, vector<1x128xf32>
      %223 = vector.broadcast %222 : vector<1x128xf32> to vector<40x128xf32>
      %224 = arith.addf %221, %223 : vector<40x128xf32>
      %225 = arith.mulf %224, %224 : vector<40x128xf32>
      %226 = arith.mulf %224, %225 : vector<40x128xf32>
      %cst_93 = arith.constant 4.471500e-02 : f32
      %227 = vector.broadcast %cst_93 : f32 to vector<40x128xf32>
      %228 = arith.mulf %227, %226 : vector<40x128xf32>
      %229 = arith.addf %224, %228 : vector<40x128xf32>
      %cst_94 = arith.constant 0.797884583 : f32
      %230 = vector.broadcast %cst_94 : f32 to vector<40x128xf32>
      %231 = arith.mulf %230, %229 : vector<40x128xf32>
      %232 = math.tanh %231 : vector<40x128xf32>
      %cst_95 = arith.constant 1.000000e+00 : f32
      %233 = vector.broadcast %cst_95 : f32 to vector<40x128xf32>
      %234 = arith.addf %233, %232 : vector<40x128xf32>
      %cst_96 = arith.constant 5.000000e-01 : f32
      %235 = vector.broadcast %cst_96 : f32 to vector<40x128xf32>
      %236 = arith.mulf %235, %234 : vector<40x128xf32>
      %237 = arith.mulf %224, %236 : vector<40x128xf32>
      %c0_97 = arith.constant 0 : index
      %c0_98 = arith.constant 0 : index
      %238 = vector.load %arg23[%c0_97, %c0_98] : memref<128x64xbf16, #tpu.memory_space<vmem>>, vector<128x64xbf16>
      %239 = arith.truncf %237 : vector<40x128xf32> to vector<40x128xbf16>
      %cst_99 = arith.constant dense<0.000000e+00> : vector<40x64xf32>
      %240 = tpu.matmul %239, %238, %cst_99 {dimension_numbers = #tpu.dot_dimension_numbers<[1], [0], [0], [1], [0, 0, 1, 1], [], []>} : vector<40x128xbf16>, vector<128x64xbf16>, vector<40x64xf32> -> vector<40x64xf32>
      %c0_100 = arith.constant 0 : index
      %c0_101 = arith.constant 0 : index
      %241 = vector.load %arg24[%c0_100, %c0_101] : memref<1x64xf32, #tpu.memory_space<vmem>>, vector<1x64xf32>
      %242 = vector.broadcast %241 : vector<1x64xf32> to vector<40x64xf32>
      %243 = arith.addf %240, %242 : vector<40x64xf32>
      %c0_102 = arith.constant 0 : index
      %c0_103 = arith.constant 0 : index
      %c0_104 = arith.constant 0 : index
      %244 = vector.load %arg26[%c0_102, %c0_103, %c0_104] : memref<1x40x64xf32, #tpu.memory_space<vmem>>, vector<1x40x64xf32>
      %245 = vector.shape_cast %244 : vector<1x40x64xf32> to vector<40x64xf32>
      %246 = vector.shape_cast %243 : vector<40x64xf32> to vector<1x40x64xf32>
      tpu.vector_store %arg26[%c0_102, %c0_103, %c0_104], %246 {strides = array<i32>} : memref<1x40x64xf32, #tpu.memory_space<vmem>>, vector<1x40x64xf32>,
    } else {
    }
    return
  }
  func.func @transform_0(%arg0: i32, %arg1: i32) -> (i32, i32, i32) {
    %c0_i32 = arith.constant 0 : i32
    %c0_i32_0 = arith.constant 0 : i32
    %c0_i32_1 = arith.constant 0 : i32
    return %arg0, %c0_i32, %c0_i32_0 : i32, i32, i32
  }
  func.func @transform_1(%arg0: i32, %arg1: i32) -> (i32, i32, i32) {
    %c0_i32 = arith.constant 0 : i32
    %c0_i32_0 = arith.constant 0 : i32
    %c0_i32_1 = arith.constant 0 : i32
    return %arg0, %c0_i32, %c0_i32_0 : i32, i32, i32
  }
  func.func @transform_2(%arg0: i32, %arg1: i32) -> (i32, i32, i32) {
    %c0_i32 = arith.constant 0 : i32
    %c0_i32_0 = arith.constant 0 : i32
    %c0_i32_1 = arith.constant 0 : i32
    return %arg0, %c0_i32, %c0_i32_0 : i32, i32, i32
  }
  func.func @transform_3(%arg0: i32, %arg1: i32) -> (i32, i32) {
    %c0_i32 = arith.constant 0 : i32
    %c0_i32_0 = arith.constant 0 : i32
    %c0_i32_1 = arith.constant 0 : i32
    return %c0_i32, %c0_i32_0 : i32, i32
  }
  func.func @transform_4(%arg0: i32, %arg1: i32) -> (i32, i32) {
    %c0_i32 = arith.constant 0 : i32
    %c0_i32_0 = arith.constant 0 : i32
    %c0_i32_1 = arith.constant 0 : i32
    return %c0_i32, %c0_i32_0 : i32, i32
  }
  func.func @transform_5(%arg0: i32, %arg1: i32) -> (i32, i32) {
    %c0_i32 = arith.constant 0 : i32
    %c0_i32_0 = arith.constant 0 : i32
    %c0_i32_1 = arith.constant 0 : i32
    return %c0_i32, %c0_i32_0 : i32, i32
  }
  func.func @transform_6(%arg0: i32, %arg1: i32) -> (i32, i32) {
    %c0_i32 = arith.constant 0 : i32
    %c0_i32_0 = arith.constant 0 : i32
    %c0_i32_1 = arith.constant 0 : i32
    return %c0_i32, %c0_i32_0 : i32, i32
  }
  func.func @transform_7(%arg0: i32, %arg1: i32) -> (i32, i32, i32) {
    %c0_i32 = arith.constant 0 : i32
    %c0_i32_0 = arith.constant 0 : i32
    %c0_i32_1 = arith.constant 0 : i32
    return %arg1, %c0_i32, %c0_i32_0 : i32, i32, i32
  }
  func.func @transform_8(%arg0: i32, %arg1: i32) -> (i32, i32, i32) {
    %c0_i32 = arith.constant 0 : i32
    %c0_i32_0 = arith.constant 0 : i32
    %c0_i32_1 = arith.constant 0 : i32
    return %arg1, %c0_i32, %c0_i32_0 : i32, i32, i32
  }
  func.func @transform_9(%arg0: i32, %arg1: i32) -> (i32, i32, i32) {
    %c0_i32 = arith.constant 0 : i32
    %c0_i32_0 = arith.constant 0 : i32
    %c0_i32_1 = arith.constant 0 : i32
    return %arg1, %c0_i32, %c0_i32_0 : i32, i32, i32
  }
  func.func @transform_10(%arg0: i32, %arg1: i32) -> (i32, i32, i32) {
    %c0_i32 = arith.constant 0 : i32
    %c0_i32_0 = arith.constant 0 : i32
    %c0_i32_1 = arith.constant 0 : i32
    return %arg1, %c0_i32, %c0_i32_0 : i32, i32, i32
  }
  func.func @transform_11(%arg0: i32, %arg1: i32) -> (i32, i32, i32) {
    %c0_i32 = arith.constant 0 : i32
    %c0_i32_0 = arith.constant 0 : i32
    %c0_i32_1 = arith.constant 0 : i32
    return %arg1, %c0_i32, %c0_i32_0 : i32, i32, i32
  }
  func.func @transform_12(%arg0: i32, %arg1: i32) -> (i32, i32, i32) {
    %c0_i32 = arith.constant 0 : i32
    %c0_i32_0 = arith.constant 0 : i32
    %c0_i32_1 = arith.constant 0 : i32
    return %arg1, %c0_i32, %c0_i32_0 : i32, i32, i32
  }
  func.func @transform_13(%arg0: i32, %arg1: i32) -> (i32, i32, i32) {
    %c0_i32 = arith.constant 0 : i32
    %c0_i32_0 = arith.constant 0 : i32
    %c0_i32_1 = arith.constant 0 : i32
    return %arg1, %c0_i32, %c0_i32_0 : i32, i32, i32
  }
  func.func @transform_14(%arg0: i32, %arg1: i32) -> (i32, i32, i32) {
    %c0_i32 = arith.constant 0 : i32
    %c0_i32_0 = arith.constant 0 : i32
    %c0_i32_1 = arith.constant 0 : i32
    return %arg1, %c0_i32, %c0_i32_0 : i32, i32, i32
  }
  func.func @transform_15(%arg0: i32, %arg1: i32) -> (i32, i32, i32) {
    %c0_i32 = arith.constant 0 : i32
    %c0_i32_0 = arith.constant 0 : i32
    %c0_i32_1 = arith.constant 0 : i32
    return %arg1, %c0_i32, %c0_i32_0 : i32, i32, i32
  }
  func.func @transform_16(%arg0: i32, %arg1: i32) -> (i32, i32, i32) {
    %c0_i32 = arith.constant 0 : i32
    %c0_i32_0 = arith.constant 0 : i32
    %c0_i32_1 = arith.constant 0 : i32
    return %arg1, %c0_i32, %c0_i32_0 : i32, i32, i32
  }
  func.func @transform_17(%arg0: i32, %arg1: i32) -> (i32, i32, i32) {
    %c0_i32 = arith.constant 0 : i32
    %c0_i32_0 = arith.constant 0 : i32
    %c0_i32_1 = arith.constant 0 : i32
    return %arg1, %c0_i32, %c0_i32_0 : i32, i32, i32
  }
  func.func @transform_18(%arg0: i32, %arg1: i32) -> (i32, i32, i32) {
    %c0_i32 = arith.constant 0 : i32
    %c0_i32_0 = arith.constant 0 : i32
    %c0_i32_1 = arith.constant 0 : i32
    return %arg1, %c0_i32, %c0_i32_0 : i32, i32, i32
  }
  func.func @transform_19(%arg0: i32, %arg1: i32) -> (i32, i32) {
    %c0_i32 = arith.constant 0 : i32
    %c0_i32_0 = arith.constant 0 : i32
    %c0_i32_1 = arith.constant 0 : i32
    return %c0_i32, %c0_i32_0 : i32, i32
  }
  func.func @transform_20(%arg0: i32, %arg1: i32) -> (i32, i32) {
    %c0_i32 = arith.constant 0 : i32
    %c0_i32_0 = arith.constant 0 : i32
    %c0_i32_1 = arith.constant 0 : i32
    return %c0_i32, %c0_i32_0 : i32, i32
  }
  func.func @transform_21(%arg0: i32, %arg1: i32) -> (i32, i32) {
    %c0_i32 = arith.constant 0 : i32
    %c0_i32_0 = arith.constant 0 : i32
    %c0_i32_1 = arith.constant 0 : i32
    return %c0_i32, %c0_i32_0 : i32, i32
  }
  func.func @transform_22(%arg0: i32, %arg1: i32) -> (i32, i32) {
    %c0_i32 = arith.constant 0 : i32
    %c0_i32_0 = arith.constant 0 : i32
    %c0_i32_1 = arith.constant 0 : i32
    return %c0_i32, %c0_i32_0 : i32, i32
  }
  func.func @transform_23(%arg0: i32, %arg1: i32) -> (i32, i32, i32) {
    %c0_i32 = arith.constant 0 : i32
    %c0_i32_0 = arith.constant 0 : i32
    %c0_i32_1 = arith.constant 0 : i32
    return %arg0, %c0_i32, %c0_i32_0 : i32, i32, i32
  }
  func.func @transform_24(%arg0: i32, %arg1: i32) -> (i32, i32, i32) {
    %c0_i32 = arith.constant 0 : i32
    %c0_i32_0 = arith.constant 0 : i32
    %c0_i32_1 = arith.constant 0 : i32
    return %arg0, %c0_i32, %c0_i32_0 : i32, i32, i32
  }
}

</mosaic_0001>

<bundles_post_ra>
// kernel: distiller_model_forward.5
= control target key start
LH: loop header
LB: loop body
LE: loop exit
PB: predicated region body
PF: predicated region fallthrough
CT: control target
= control target key end

     0   :  { %s631_s12 = smov 0   ;;  %s801_s0 = inlined_call_operand.vmem [shape: f32[2,79,96], index: 0, kind: input, shape index: {}]   ;;  %s802_s1 = inlined_call_operand.vmem [shape: bf16[96,32], index: 1, kind: input, shape index: {}]   ;;  %s803_s2 = inlined_call_operand.vmem [shape: f32[1,32], index: 2, kind: input, shape index: {}]   ;;  %s804_s3 = inlined_call_operand.vmem [shape: f32[2,79,32], index: 3, kind: output, shape index: {}]  }
   0x1 LB: > { %s488_s13 = sadd.s32 4294967295, %s607_s12   ;;  %p492_p0 = scmp.ge.s32.totalorder %s607_s12, 1  ;;  %s607_s12 = sphi %s631_s12, %s13_s12  }
   0x2   : > { %p137_p1 = scmp.lt.s32.totalorder %s607_s12, 3 }
   0x4   : > { %p138_p2 = pnand %p492_p0, %p137_p1 }
   0x5   : > { %v575_v0 = vld [vmem:[%s802_s1] sm:$0xff] (!%p138_p2)   ;;  %v609_v1 = vmov (!%p138_p2), 0.0   ;;  %v576_v2 = vld [vmem:[%s802_s1 + $0x8] sm:$0xff] (!%p138_p2)   ;;  %p161_p3 = scmp.lt.s32.totalorder (!%p138_p2), %s488_s13, 1  ;;  %vm610_vm0 = vmmov (!%p138_p2), 0   ;;  %v577_v3 = vld [vmem:[%s802_s1 + $0x10] sm:$0xff] (!%p138_p2)  }
   0x6   : > { %141 = sbr.rel (%p138_p2) target bundleno = 290 (0x122), region = 32  ;;  %520 = vmatprep.subr.bf16.mxu0 (!%p138_p2), %v609_v1  ;;  %552 = vmatprep.subr.bf16.mxu1 (!%p138_p2), %v609_v1  ;;  %v578_v4 = vld [vmem:[%s802_s1 + $0x18] sm:$0xff] (!%p138_p2)   ;;  %v579_v5 = vld [vmem:[%s802_s1 + $0x20] sm:$0xff] (!%p138_p2)   ;;  %v580_v6 = vld [vmem:[%s802_s1 + $0x28] sm:$0xff] (!%p138_p2)   ;;  %vm242_vm1 = vcmask (!%p138_p2), 785408   ;;  %vm421_vm2 = vcmask (!%p138_p2), 261120  }
   0x7   : > { %521 = vmatpush3.bf16.msra.mxu0 (!%p138_p2), %v575_v0  ;;  %558 = vmatpush3.bf16.msra.mxu1 (!%p138_p2), %v575_v0  ;;  %v690_v22 = vld [vmem:[%s803_s2] ss:$0 sm:$0xff] (!%p138_p2)  ;;  %vm431_vm3 = vcmask (!%p138_p2), 260096  }
   0x8   : > { %522 = vmatprep.subr.bf16.mxu0 (!%p138_p2), %v609_v1  ;;  %553 = vmatprep.subr.bf16.mxu1 (!%p138_p2), %v609_v1 }
   0x9   : > { %532 = vmatprep.mubr.msk.bf16.mxu0 (!%p138_p2), %vm610_vm0, %v609_v1  ;;  %544 = vmatprep.mubr.msk.bf16.mxu1 (!%p138_p2), %vm610_vm0, %v609_v1 }
   0xb   : > { %523 = vmatpush3.bf16.msra.mxu0 (!%p138_p2), %v576_v2  ;;  %559 = vmatpush3.bf16.msra.mxu1 (!%p138_p2), %v576_v2 }
   0xc   : > { %524 = vmatprep.subr.bf16.mxu0 (!%p138_p2), %v609_v1  ;;  %554 = vmatprep.subr.bf16.mxu1 (!%p138_p2), %v609_v1 }
   0xd   : > { %s806_s13 = smov (!%p161_p3, %s488_s13), 1 }
   0xe   : > { %s564_s22 = smul.u32 80, %s806_s13 }
   0xf   : > { %525 = vmatpush3.bf16.msra.mxu0 %v577_v3  ;;  %560 = vmatpush3.bf16.msra.mxu1 %v577_v3 }
  0x10   : > { %526 = vmatprep.subr.bf16.mxu0 %v609_v1  ;;  %555 = vmatprep.subr.bf16.mxu1 %v609_v1  ;;  %s664_s27 = scalar_lea.vmem %s801_s0, %s564_s22  ;;  %s766_s7 = scalar_lea.vmem %s804_s3, %s564_s22 }
  0x11   : > { %v172_v7 = vld [vmem:[%s664_s27] sm:$0xff]  ;;  %v173_v8 = vld [vmem:[%s664_s27 + $0x8] sm:$0xff]  ;;  %v178_v9 = vld [vmem:[%s664_s27 + $0x30] sm:$0xff] }
  0x12   : > { %v179_v10 = vld [vmem:[%s664_s27 + $0x38] sm:$0xff]  ;;  %v194_v11 = vpack.c.bf16 %v173_v8, %v172_v7  ;;  %v174_v13 = vld [vmem:[%s664_s27 + $0x10] sm:$0xff]  ;;  %v180_v15 = vld [vmem:[%s664_s27 + $0x40] sm:$0xff] }
  0x13   : > { %527 = vmatpush3.bf16.msra.mxu0 %v578_v4  ;;  %561 = vmatpush3.bf16.msra.mxu1 %v578_v4  ;;  %v197_v12 = vpack.c.bf16 %v179_v10, %v178_v9  ;;  %v175_v14 = vld [vmem:[%s664_s27 + $0x18] sm:$0xff]  ;;  %v181_v16 = vld [vmem:[%s664_s27 + $0x48] sm:$0x7f]  ;;  %v176_v19 = vld [vmem:[%s664_s27 + $0x20] sm:$0xff] }
  0x14   : > { %528 = vmatprep.subr.bf16.mxu0 %v609_v1  ;;  %556 = vmatprep.subr.bf16.mxu1 %v609_v1  ;;  %v195_v17 = vpack.c.bf16 %v175_v14, %v174_v13  ;;  %v198_v18 = vpack.c.bf16 %v181_v16, %v180_v15  ;;  %v177_v20 = vld [vmem:[%s664_s27 + $0x28] sm:$0xff] }
  0x15   : > { %v196_v21 = vpack.c.bf16 %v177_v20, %v176_v19 }
  0x17   : > { %529 = vmatpush3.bf16.msra.mxu0 %v579_v5  ;;  %562 = vmatpush3.bf16.msra.mxu1 %v579_v5 }
  0x18   : > { %530 = vmatprep.subr.bf16.mxu0 %v609_v1  ;;  %557 = vmatprep.subr.bf16.mxu1 %v609_v1 }
  0x1b   : > { %531 = vmatpush3.bf16.msra.mxu0 %v580_v6  ;;  %563 = vmatpush3.bf16.msra.mxu1 %v580_v6 }
  0x1e   : > { %533 = vmatmul.mubr.msk.bf16.vlgmr.msra.gmra.mrb[0].mxu0 %vm242_vm1, %v194_v11  ;;  %545 = vmatmul.mubr.msk.bf16.vlgmr.msra.gmra.mrb[0].mxu1 %vm242_vm1, %v197_v12 }
  0x1f   : > { %536 = vmatprep.mubr.msk.bf16.mxu0 %vm610_vm0, %v609_v1  ;;  %548 = vmatprep.mubr.msk.bf16.mxu1 %vm610_vm0, %v609_v1 }
  0x26   : > { %537 = vmatmul.mubr.msk.bf16.gmra.mrb[4].mxu0 %vm242_vm1, %v195_v17  ;;  %549 = vmatmul.mubr.msk.bf16.gmra.mrb[4].mxu1 %vm242_vm1, %v198_v18 }
  0x27   : > { %540 = vmatprep.mubr.msk.bf16.mxu0 %vm610_vm0, %v609_v1 }
  0x2e   : > { %541 = vmatmul.mubr.msk.bf16.gmra.mrb[8].mxu0 %vm242_vm1, %v196_v21 }
  0xf1   : > { %v292_v23 = vpop.f32.mrb[0].mxu0  ;;  %v316_v24 = vpop.f32.mrb[0].mxu1 }
  0xf2   : > { %v693_v25 = vadd.f32 %v690_v22, %v292_v23  ;;  %v696_v26 = vadd.f32 %v690_v22, %v316_v24  ;;  %v534_v27 = vpop.f32.mrb[1].mxu0  ;;  %v546_v28 = vpop.f32.mrb[1].mxu1 }
  0xf3   : > { %v295_v29 = vpop.f32.mrb[2].mxu0  ;;  %v319_v30 = vpop.f32.mrb[2].mxu1 }
  0xf4   : > { %v331_v31 = vmul.f32 %v693_v25, %v693_v25  ;;  %v337_v32 = vmul.f32 %v696_v26, %v696_v26  ;;  %v703_v33 = vadd.f32 %v690_v22, %v295_v29  ;;  %v706_v34 = vadd.f32 %v690_v22, %v319_v30  ;;  %v535_v35 = vpop.f32.mrb[3].mxu0  ;;  %v547_v36 = vpop.f32.mrb[3].mxu1 }
  0xf6   : > { %v341_v37 = vmul.f32 %v331_v31, %v693_v25  ;;  %v347_v38 = vmul.f32 %v337_v32, %v696_v26  ;;  %v332_v39 = vmul.f32 %v703_v33, %v703_v33  ;;  %v338_v40 = vmul.f32 %v706_v34, %v706_v34 }
  0xf8   : > { %v351_v41 = vmul.f32 0.044715, %v341_v37  ;;  %v357_v42 = vmul.f32 0.044715, %v347_v38  ;;  %v342_v43 = vmul.f32 %v332_v39, %v703_v33  ;;  %v348_v44 = vmul.f32 %v338_v40, %v706_v34 }
  0xf9   : > { %v300_v45 = vpop.f32.mrb[4].mxu0  ;;  %v324_v46 = vpop.f32.mrb[4].mxu1 }
  0xfa   : > { %v361_v47 = vadd.f32 %v351_v41, %v693_v25  ;;  %v367_v48 = vadd.f32 %v357_v42, %v696_v26  ;;  %v352_v49 = vmul.f32 0.044715, %v342_v43  ;;  %v358_v50 = vmul.f32 0.044715, %v348_v44  ;;  %v538_v51 = vpop.f32.mrb[5].mxu0  ;;  %v550_v52 = vpop.f32.mrb[5].mxu1 }
  0xfb   : > { %v719_v53 = vadd.f32 %v690_v22, %v300_v45  ;;  %v722_v54 = vadd.f32 %v690_v22, %v324_v46  ;;  %v303_v55 = vpop.f32.mrb[6].mxu0  ;;  %v327_v56 = vpop.f32.mrb[6].mxu1 }
  0xfc   : > { %v371_v57 = vmul.f32 0.7978846, %v361_v47  ;;  %v377_v58 = vmul.f32 0.7978846, %v367_v48  ;;  %v362_v59 = vadd.f32 %v352_v49, %v703_v33  ;;  %v368_v60 = vadd.f32 %v358_v50, %v706_v34  ;;  %v539_v61 = vpop.f32.mrb[7].mxu0  ;;  %v551_v62 = vpop.f32.mrb[7].mxu1 }
  0xfd   : > { %v333_v63 = vmul.f32 %v719_v53, %v719_v53  ;;  %v339_v0 = vmul.f32 %v722_v54, %v722_v54  ;;  %v731_v1 = vadd.f32 %v690_v22, %v303_v55  ;;  %v734_v2 = vadd.f32 %v690_v22, %v327_v56 }
  0xfe   : > { %581 = vtanh.f32 %v371_v57  ;;  %v372_v3 = vmul.f32 0.7978846, %v362_v59  ;;  %v378_v4 = vmul.f32 0.7978846, %v368_v60 }
  0xff   : > { %583 = vtanh.f32 %v377_v58  ;;  %v343_v5 = vmul.f32 %v333_v63, %v719_v53  ;;  %v349_v6 = vmul.f32 %v339_v0, %v722_v54  ;;  %v334_v7 = vmul.f32 %v731_v1, %v731_v1 }
 0x100   : > { %585 = vtanh.f32 %v372_v3  ;;  %v340_v8 = vmul.f32 %v734_v2, %v734_v2 }
 0x101   : > { %587 = vtanh.f32 %v378_v4  ;;  %v353_v9 = vmul.f32 0.044715, %v343_v5  ;;  %v359_v10 = vmul.f32 0.044715, %v349_v6  ;;  %v344_v11 = vmul.f32 %v334_v7, %v731_v1  ;;  %v308_v12 = vpop.f32.mrb[8].mxu0 }
 0x102   : > { %v350_v13 = vmul.f32 %v340_v8, %v734_v2  ;;  %v745_v14 = vadd.f32 %v690_v22, %v308_v12  ;;  %v542_v15 = vpop.f32.mrb[9].mxu0 }
 0x103   : > { %v363_v16 = vadd.f32 %v353_v9, %v719_v53  ;;  %v369_v17 = vadd.f32 %v359_v10, %v722_v54  ;;  %v354_v18 = vmul.f32 0.044715, %v344_v11  ;;  %v311_v19 = vpop.f32.mrb[10].mxu0 }
 0x104   : > { %v360_v20 = vmul.f32 0.044715, %v350_v13  ;;  %v335_v21 = vmul.f32 %v745_v14, %v745_v14  ;;  %v752_v23 = vadd.f32 %v690_v22, %v311_v19  ;;  %v543_v24 = vpop.f32.mrb[11].mxu0 }
 0x105   : > { %v373_v27 = vmul.f32 0.7978846, %v363_v16  ;;  %v379_v28 = vmul.f32 0.7978846, %v369_v17  ;;  %v364_v29 = vadd.f32 %v354_v18, %v731_v1 }
 0x106   : > { %v370_v30 = vadd.f32 %v360_v20, %v734_v2  ;;  %v345_v31 = vmul.f32 %v335_v21, %v745_v14  ;;  %v336_v32 = vmul.f32 %v752_v23, %v752_v23 }
 0x107   : > { %589 = vtanh.f32 %v373_v27  ;;  %v374_v35 = vmul.f32 0.7978846, %v364_v29 }
 0x108   : > { %v582_v36 = vpop.eup %581  ;;  %591 = vtanh.f32 %v379_v28  ;;  %v380_v37 = vmul.f32 0.7978846, %v370_v30  ;;  %v355_v22 = vmul.f32 0.044715, %v345_v31  ;;  %v346_v38 = vmul.f32 %v336_v32, %v752_v23 }
 0x109   : > { %v584_v39 = vpop.eup %583  ;;  %v391_v40 = vadd.f32 1.0, %v582_v36  ;;  %593 = vtanh.f32 %v374_v35 }
 0x10a   : > { %v586_v41 = vpop.eup %585  ;;  %v397_v42 = vadd.f32 1.0, %v584_v39  ;;  %595 = vtanh.f32 %v380_v37  ;;  %v365_v43 = vadd.f32 %v355_v22, %v745_v14  ;;  %v356_v44 = vmul.f32 0.044715, %v346_v38 }
 0x10b   : > { %v588_v45 = vpop.eup %587  ;;  %v401_v46 = vmul.f32 0.5, %v391_v40  ;;  %v392_v47 = vadd.f32 1.0, %v586_v41 }
 0x10c   : > { %v407_v48 = vmul.f32 0.5, %v397_v42  ;;  %v398_v49 = vadd.f32 1.0, %v588_v45  ;;  %v375_v50 = vmul.f32 0.7978846, %v365_v43  ;;  %v366_v51 = vadd.f32 %v356_v44, %v752_v23 }
 0x10d   : > { %v411_v52 = vmul.f32 %v401_v46, %v693_v25  ;;  %v402_v55 = vmul.f32 0.5, %v392_v47 }
 0x10e   : > { %v417_v56 = vmul.f32 %v407_v48, %v696_v26  ;;  %v408_v57 = vmul.f32 0.5, %v398_v49  ;;  %597 = vtanh.f32 %v375_v50  ;;  %v376_v58 = vmul.f32 0.7978846, %v366_v51 }
 0x10f   : > { %422 = vst.msk [vmem:[%s766_s7] sm:$0xff] %vm421_vm2, %v411_v52  ;;  %v412_v59 = vmul.f32 %v402_v55, %v703_v33 }
 0x110   : > { %428 = vst.msk [vmem:[%s766_s7 + $0x30] sm:$0xff] %vm421_vm2, %v417_v56  ;;  %v418_v60 = vmul.f32 %v408_v57, %v706_v34  ;;  %599 = vtanh.f32 %v376_v58 }
 0x111   : > { %v590_v61 = vpop.eup %589  ;;  %423 = vst.msk [vmem:[%s766_s7 + $0x8] sm:$0xff] %vm421_vm2, %v412_v59 }
 0x112   : > { %v592_v25 = vpop.eup %591  ;;  %429 = vst.msk [vmem:[%s766_s7 + $0x38] sm:$0xff] %vm421_vm2, %v418_v60  ;;  %v393_v26 = vadd.f32 1.0, %v590_v61 }
 0x113   : > { %v594_v62 = vpop.eup %593  ;;  %v399_v63 = vadd.f32 1.0, %v592_v25 }
 0x114   : > { %v596_v0 = vpop.eup %595  ;;  %v403_v3 = vmul.f32 0.5, %v393_v26  ;;  %v394_v33 = vadd.f32 1.0, %v594_v62 }
 0x115   : > { %v409_v4 = vmul.f32 0.5, %v399_v63  ;;  %v400_v5 = vadd.f32 1.0, %v596_v0 }
 0x116   : > { %v413_v34 = vmul.f32 %v403_v3, %v719_v53  ;;  %v404_v6 = vmul.f32 0.5, %v394_v33 }
 0x117   : > { %v419_v7 = vmul.f32 %v409_v4, %v722_v54  ;;  %v410_v8 = vmul.f32 0.5, %v400_v5 }
 0x118   : > { %v598_v9 = vpop.eup %597  ;;  %424 = vst.msk [vmem:[%s766_s7 + $0x10] sm:$0xff] %vm421_vm2, %v413_v34  ;;  %v414_v10 = vmul.f32 %v404_v6, %v731_v1 }
 0x119   : > { %430 = vst.msk [vmem:[%s766_s7 + $0x40] sm:$0xff] %vm421_vm2, %v419_v7  ;;  %v420_v11 = vmul.f32 %v410_v8, %v734_v2  ;;  %v395_v12 = vadd.f32 1.0, %v598_v9 }
 0x11a   : > { %v600_v13 = vpop.eup %599  ;;  %425 = vst.msk [vmem:[%s766_s7 + $0x18] sm:$0xff] %vm421_vm2, %v414_v10 }
 0x11b   : > { %432 = vst.msk [vmem:[%s766_s7 + $0x48] sm:$0x7f] %vm431_vm3, %v420_v11  ;;  %v405_v53 = vmul.f32 0.5, %v395_v12  ;;  %v396_v54 = vadd.f32 1.0, %v600_v13 }
 0x11d   : > { %v415_v15 = vmul.f32 %v405_v53, %v745_v14  ;;  %v406_v16 = vmul.f32 0.5, %v396_v54 }
 0x11f   : > { %426 = vst.msk [vmem:[%s766_s7 + $0x20] sm:$0xff] %vm421_vm2, %v415_v15  ;;  %v416_v17 = vmul.f32 %v406_v16, %v752_v23 }
 0x121   : > { %427 = vst.msk [vmem:[%s766_s7 + $0x28] sm:$0xff] %vm421_vm2, %v416_v17 }
 0x122 PF: > { %s13_s12 = sadd.s32 1, %s607_s12  }
 0x123   : > { %p10_p4 = scmp.ge.s32.totalorder %s13_s12, 4  }
 0x125   :  { %12 = sbr.rel (!%p10_p4) target bundleno = 1 (0x1), region = 62 }

// kernel: distiller_model_forward.4
= control target key start
LH: loop header
LB: loop body
LE: loop exit
PB: predicated region body
PF: predicated region fallthrough
CT: control target
= control target key end

     0   :  { %s1034_s18 = smov 0   ;;  %s1478_s0 = inlined_call_operand.vmem [shape: f32[2,159,10], index: 0, kind: input, shape index: {}]   ;;  %s1479_s1 = inlined_call_operand.vmem [shape: bf16[10,32], index: 1, kind: input, shape index: {}]   ;;  %s1480_s2 = inlined_call_operand.vmem [shape: f32[1,32], index: 2, kind: input, shape index: {}]   ;;  %s1481_s3 = inlined_call_operand.vmem [shape: f32[1,32], index: 3, kind: input, shape index: {}]   ;;  %s1482_s4 = inlined_call_operand.vmem [shape: f32[1,32], index: 4, kind: input, shape index: {}]   ;;  %s1483_s5 = inlined_call_operand.vmem [shape: f32[2,159,32], index: 5, kind: output, shape index: {}]  }
   0x1 LB: > { %s884_s19 = sadd.s32 4294967295, %s1002_s18   ;;  %p888_p0 = scmp.ge.s32.totalorder %s1002_s18, 1  ;;  %s1002_s18 = sphi %s1034_s18, %s15_s18  }
   0x2   : > { %p187_p1 = scmp.lt.s32.totalorder %s1002_s18, 3 }
   0x4   : > { %p188_p2 = pnand %p888_p0, %p187_p1 }
   0x5   : > { %v953_v0 = vld [vmem:[%s1479_s1] sm:$0x1f] (!%p188_p2)   ;;  %vm301_vm0 = vcmask (!%p188_p2), 1044480   ;;  %p215_p3 = scmp.lt.s32.totalorder (!%p188_p2), %s884_s19, 1  ;;  %vm270_vm1 = vcmask (!%p188_p2), 80896   ;;  %vm418_vm2 = vcmask (!%p188_p2), 261120  }
   0x6   : > { %191 = sbr.rel (%p188_p2) target bundleno = 433 (0x1b1), region = 40  ;;  %942 = vmatprep.subr.msk.bf16.mxu0 (!%p188_p2), %vm301_vm0, %v953_v0  ;;  %v303_v1 = vsel (!%p188_p2), %vm301_vm0, %v953_v0, 0  ;;  %943 = vmatprep.subr.msk.bf16.mxu1 (!%p188_p2), %vm301_vm0, %v953_v0  ;;  %v1088_v32 = vld [vmem:[%s1480_s2] ss:$0 sm:$0xff] (!%p188_p2)  ;;  %vm456_vm3 = vcmask (!%p188_p2), 260096  }
   0x7   : > { %919 = vmatpush3.bf16.msra.mxu0 (!%p188_p2), %v303_v1  ;;  %941 = vmatpush3.bf16.msra.mxu1 (!%p188_p2), %v303_v1 }
   0xd   : > { %s1485_s19 = smov (!%p215_p3, %s884_s19), 1 }
   0xe   : > { %s944_s22 = smul.u32 160, %s1485_s19 }
  0x10   : > { %s1053_s25 = scalar_lea.vmem %s1478_s0, %s944_s22  ;;  %s1413_s9 = scalar_lea.vmem %s1483_s5, %s944_s22 }
  0x11   : > { %v226_v2 = vld [vmem:[%s1053_s25] sm:$0xff]  ;;  %v227_v3 = vld [vmem:[%s1053_s25 + $0x8] sm:$0xff]  ;;  %v228_v4 = vld [vmem:[%s1053_s25 + $0x10] sm:$0xff] }
  0x12   : > { %v248_v5 = vpack.c.bf16 %v227_v3, %v226_v2  ;;  %v229_v6 = vld [vmem:[%s1053_s25 + $0x18] sm:$0xff]  ;;  %v230_v7 = vld [vmem:[%s1053_s25 + $0x20] sm:$0xff]  ;;  %v231_v8 = vld [vmem:[%s1053_s25 + $0x28] sm:$0xff] }
  0x13   : > { %v249_v9 = vpack.c.bf16 %v229_v6, %v228_v4  ;;  %v250_v10 = vpack.c.bf16 %v231_v8, %v230_v7  ;;  %v232_v11 = vld [vmem:[%s1053_s25 + $0x30] sm:$0xff]  ;;  %v233_v12 = vld [vmem:[%s1053_s25 + $0x38] sm:$0xff]  ;;  %v238_v13 = vld [vmem:[%s1053_s25 + $0x60] sm:$0xff] }
  0x14   : > { %920 = vmatprep.mubr.msk.bf16.mxu0 %vm270_vm1, %v248_v5  ;;  %v239_v14 = vld [vmem:[%s1053_s25 + $0x68] sm:$0xff]  ;;  %v240_v15 = vld [vmem:[%s1053_s25 + $0x70] sm:$0xff]  ;;  %v241_v17 = vld [vmem:[%s1053_s25 + $0x78] sm:$0xff]  ;;  %v251_v24 = vpack.c.bf16 %v233_v12, %v232_v11 }
  0x15   : > { %921 = vmatmul.mubr.msk.bf16.vlgmr.msra.gmra.mrb[0].mxu0 %vm270_vm1, %v249_v9  ;;  %v254_v16 = vpack.c.bf16 %v239_v14, %v238_v13  ;;  %v242_v18 = vld [vmem:[%s1053_s25 + $0x80] sm:$0xff]  ;;  %v243_v19 = vld [vmem:[%s1053_s25 + $0x88] sm:$0xff]  ;;  %v255_v22 = vpack.c.bf16 %v241_v17, %v240_v15  ;;  %v244_v26 = vld [vmem:[%s1053_s25 + $0x90] sm:$0xff] }
  0x16   : > { %924 = vmatprep.mubr.msk.bf16.mxu0 %vm270_vm1, %v250_v10  ;;  %v234_v20 = vld [vmem:[%s1053_s25 + $0x40] sm:$0xff]  ;;  %v235_v21 = vld [vmem:[%s1053_s25 + $0x48] sm:$0xff]  ;;  %v256_v23 = vpack.c.bf16 %v243_v19, %v242_v18  ;;  %v245_v27 = vld [vmem:[%s1053_s25 + $0x98] sm:$0x7f] }
  0x17   : > { %932 = vmatprep.mubr.msk.bf16.mxu1 %vm270_vm1, %v254_v16  ;;  %v252_v25 = vpack.c.bf16 %v235_v21, %v234_v20  ;;  %v257_v28 = vpack.c.bf16 %v245_v27, %v244_v26  ;;  %v236_v29 = vld [vmem:[%s1053_s25 + $0x50] sm:$0xff]  ;;  %v237_v30 = vld [vmem:[%s1053_s25 + $0x58] sm:$0xff] }
  0x18   : > { %933 = vmatmul.mubr.msk.bf16.vlgmr.msra.gmra.mrb[0].mxu1 %vm270_vm1, %v255_v22  ;;  %v253_v31 = vpack.c.bf16 %v237_v30, %v236_v29 }
  0x19   : > { %936 = vmatprep.mubr.msk.bf16.mxu1 %vm270_vm1, %v256_v23 }
  0x1d   : > { %925 = vmatmul.mubr.msk.bf16.gmra.mrb[4].mxu0 %vm270_vm1, %v251_v24 }
  0x1e   : > { %928 = vmatprep.mubr.msk.bf16.mxu0 %vm270_vm1, %v252_v25 }
  0x20   : > { %937 = vmatmul.mubr.msk.bf16.gmra.mrb[4].mxu1 %vm270_vm1, %v257_v28 }
  0x25   : > { %929 = vmatmul.mubr.msk.bf16.gmra.mrb[8].mxu0 %vm270_vm1, %v253_v31 }
  0xe8   : > { %v922_v33 = vpop.f32.mrb[0].mxu0 }
  0xe9   : > { %v339_v34 = vpop.f32.mrb[1].mxu0  ;;  %v1094_v38 = vadd.f32 %v922_v33, %v1088_v32 }
  0xea   : > { %v1091_v35 = vadd.f32 %v1088_v32, %v339_v34  ;;  %v923_v36 = vpop.f32.mrb[2].mxu0 }
  0xeb   : > { %v342_v37 = vpop.f32.mrb[3].mxu0  ;;  %v934_v40 = vpop.f32.mrb[0].mxu1  ;;  %v1102_v43 = vadd.f32 %v923_v36, %v1088_v32  ;;  %v422_v48 = vsel %vm418_vm2, %v1094_v38, 0.0 }
  0xec   : > { %v1097_v39 = vadd.f32 %v1088_v32, %v342_v37  ;;  %v387_v41 = vpop.f32.mrb[1].mxu1  ;;  %v419_v42 = vsel %vm418_vm2, %v1091_v35, 0.0  ;;  %v396_v27 = vadd.f32 %v934_v40, %v1088_v32 }
  0xed   : > { %v935_v45 = vpop.f32.mrb[2].mxu1  ;;  %v424_v52 = vsel %vm418_vm2, %v1102_v43, 0.0  ;;  %v388_v19 = vadd.f32 %v1088_v32, %v387_v41 }
  0xee   : > { %v420_v44 = vsel %vm418_vm2, %v1097_v39, 0.0  ;;  %v390_v47 = vpop.f32.mrb[3].mxu1  ;;  %v399_v29 = vadd.f32 %v935_v45, %v1088_v32  ;;  %v446_v34 = vsel %vm418_vm2, %v396_v27, 0.0 }
  0xef   : > { %v421_v46 = vadd.f32 %v420_v44, %v419_v42  ;;  %v442_v24 = vsel %vm418_vm2, %v388_v19, 0.0  ;;  %v391_v25 = vadd.f32 %v1088_v32, %v390_v47 }
  0xf0   : > { %v926_v49 = vpop.f32.mrb[4].mxu0  ;;  %v448_v37 = vsel %vm418_vm2, %v399_v29, 0.0 }
  0xf1   : > { %v423_v50 = vadd.f32 %v422_v48, %v421_v46  ;;  %v355_v51 = vpop.f32.mrb[5].mxu0  ;;  %v1114_v57 = vadd.f32 %v926_v49, %v1088_v32  ;;  %v444_v30 = vsel %vm418_vm2, %v391_v25, 0.0 }
  0xf2   : > { %v1111_v53 = vadd.f32 %v1088_v32, %v355_v51  ;;  %v927_v54 = vpop.f32.mrb[6].mxu0 }
  0xf3   : > { %v425_v55 = vadd.f32 %v424_v52, %v423_v50  ;;  %v358_v56 = vpop.f32.mrb[7].mxu0  ;;  %v938_v60 = vpop.f32.mrb[4].mxu1  ;;  %v1122_v63 = vadd.f32 %v927_v54, %v1088_v32  ;;  %v430_v4 = vsel %vm418_vm2, %v1114_v57, 0.0 }
  0xf4   : > { %v426_v58 = vsel %vm418_vm2, %v1111_v53, 0.0  ;;  %v1119_v59 = vadd.f32 %v1088_v32, %v358_v56  ;;  %v403_v62 = vpop.f32.mrb[5].mxu1  ;;  %v412_v40 = vadd.f32 %v938_v60, %v1088_v32 }
  0xf5   : > { %v427_v61 = vadd.f32 %v426_v58, %v425_v55  ;;  %v939_v1 = vpop.f32.mrb[6].mxu1  ;;  %v432_v8 = vsel %vm418_vm2, %v1122_v63, 0.0  ;;  %v404_v31 = vadd.f32 %v1088_v32, %v403_v62 }
  0xf6   : > { %v428_v0 = vsel %vm418_vm2, %v1119_v59, 0.0  ;;  %v406_v3 = vpop.f32.mrb[7].mxu1  ;;  %v415_v45 = vadd.f32 %v939_v1, %v1088_v32  ;;  %v454_v49 = vsel %vm418_vm2, %v412_v40, 0.0 }
  0xf7   : > { %v429_v2 = vadd.f32 %v428_v0, %v427_v61  ;;  %v450_v41 = vsel %vm418_vm2, %v404_v31, 0.0  ;;  %v407_v42 = vadd.f32 %v1088_v32, %v406_v3 }
  0xf8   : > { %v930_v5 = vpop.f32.mrb[8].mxu0  ;;  %v457_v51 = vsel %vm456_vm3, %v415_v45, 0.0 }
  0xf9   : > { %v431_v6 = vadd.f32 %v430_v4, %v429_v2  ;;  %v371_v7 = vpop.f32.mrb[9].mxu0  ;;  %v380_v13 = vadd.f32 %v930_v5, %v1088_v32  ;;  %v452_v47 = vsel %vm418_vm2, %v407_v42, 0.0 }
  0xfa   : > { %v372_v9 = vadd.f32 %v1088_v32, %v371_v7  ;;  %v931_v10 = vpop.f32.mrb[10].mxu0 }
  0xfb   : > { %v433_v11 = vadd.f32 %v432_v8, %v431_v6  ;;  %v374_v12 = vpop.f32.mrb[11].mxu0  ;;  %v383_v17 = vadd.f32 %v931_v10, %v1088_v32  ;;  %v438_v21 = vsel %vm418_vm2, %v380_v13, 0.0 }
  0xfc   : > { %v434_v14 = vsel %vm418_vm2, %v372_v9, 0.0  ;;  %v375_v15 = vadd.f32 %v1088_v32, %v374_v12 }
  0xfd   : > { %v435_v16 = vadd.f32 %v434_v14, %v433_v11  ;;  %v440_v23 = vsel %vm418_vm2, %v383_v17, 0.0 }
  0xfe   : > { %v436_v18 = vsel %vm418_vm2, %v375_v15, 0.0 }
  0xff   : > { %v437_v20 = vadd.f32 %v436_v18, %v435_v16 }
 0x101   : > { %v439_v22 = vadd.f32 %v438_v21, %v437_v20 }
 0x103   : > { %v441_v26 = vadd.f32 %v440_v23, %v439_v22 }
 0x105   : > { %v443_v28 = vadd.f32 %v442_v24, %v441_v26 }
 0x107   : > { %v445_v33 = vadd.f32 %v444_v30, %v443_v28 }
 0x109   : > { %v447_v36 = vadd.f32 %v446_v34, %v445_v33 }
 0x10b   : > { %v449_v44 = vadd.f32 %v448_v37, %v447_v36 }
 0x10d   : > { %v451_v46 = vadd.f32 %v450_v41, %v449_v44 }
 0x10f   : > { %v453_v48 = vadd.f32 %v452_v47, %v451_v46 }
 0x111   : > { %v455_v50 = vadd.f32 %v454_v49, %v453_v48 }
 0x113   : > { %v458_v52 = vadd.f32 %v457_v51, %v455_v50 }
 0x115   : > { %v459_v54 = vrot.slane %v458_v52, 4 }
 0x117   : > { %v460_v55 = vadd.f32 %v459_v54, %v458_v52 }
 0x119   : > { %v461_v56 = vrot.slane %v460_v55, 2 }
 0x11b   : > { %v462_v58 = vadd.f32 %v461_v56, %v460_v55 }
 0x11d   : > { %v463_v61 = vrot.slane %v462_v58, 1 }
 0x11f   : > { %v464_v62 = vadd.f32 %v463_v61, %v462_v58 }
 0x121   : > { %v466_v60 = vmul.f32 0.006289308, %v464_v62 }
 0x123   : > { %v1155_v0 = vsub.f32 %v1091_v35, %v466_v60  ;;  %v1158_v32 = vsub.f32 %v1097_v39, %v466_v60  ;;  %v1161_v1 = vsub.f32 %v1094_v38, %v466_v60  ;;  %v1164_v2 = vsub.f32 %v1102_v43, %v466_v60 }
 0x124   : > { %v1167_v3 = vsub.f32 %v1111_v53, %v466_v60  ;;  %v1170_v4 = vsub.f32 %v1119_v59, %v466_v60  ;;  %v1173_v5 = vsub.f32 %v1114_v57, %v466_v60  ;;  %v1176_v35 = vsub.f32 %v1122_v63, %v466_v60 }
 0x125   : > { %v1178_v39 = vsub.f32 %v372_v9, %v466_v60  ;;  %v1180_v6 = vsub.f32 %v375_v15, %v466_v60  ;;  %v1182_v38 = vsub.f32 %v380_v13, %v466_v60  ;;  %v1184_v43 = vsub.f32 %v383_v17, %v466_v60 }
 0x126   : > { %v1186_v7 = vsub.f32 %v388_v19, %v466_v60  ;;  %v1188_v53 = vsub.f32 %v391_v25, %v466_v60  ;;  %v1190_v59 = vsub.f32 %v396_v27, %v466_v60  ;;  %v1192_v8 = vsub.f32 %v399_v29, %v466_v60 }
 0x127   : > { %v1194_v57 = vsub.f32 %v404_v31, %v466_v60  ;;  %v1196_v63 = vsub.f32 %v407_v42, %v466_v60  ;;  %v1198_v9 = vsub.f32 %v412_v40, %v466_v60  ;;  %v1200_v10 = vsub.f32 %v415_v45, %v466_v60 }
 0x128   : > { %v487_v11 = vmul.f32 %v1155_v0, %v1155_v0  ;;  %v488_v12 = vmul.f32 %v1158_v32, %v1158_v32  ;;  %v489_v13 = vmul.f32 %v1161_v1, %v1161_v1  ;;  %v490_v14 = vmul.f32 %v1164_v2, %v1164_v2 }
 0x129   : > { %v491_v18 = vmul.f32 %v1167_v3, %v1167_v3  ;;  %v492_v21 = vmul.f32 %v1170_v4, %v1170_v4  ;;  %v493_v24 = vmul.f32 %v1173_v5, %v1173_v5  ;;  %v494_v27 = vmul.f32 %v1176_v35, %v1176_v35 }
 0x12a   : > { %v507_v15 = vsel %vm418_vm2, %v487_v11, 0.0  ;;  %v508_v16 = vsel %vm418_vm2, %v488_v12, 0.0  ;;  %v510_v19 = vsel %vm418_vm2, %v489_v13, 0.0  ;;  %v512_v22 = vsel %vm418_vm2, %v490_v14, 0.0 }
 0x12b   : > { %v509_v17 = vadd.f32 %v508_v16, %v507_v15  ;;  %v514_v25 = vsel %vm418_vm2, %v491_v18, 0.0  ;;  %v516_v28 = vsel %vm418_vm2, %v492_v21, 0.0  ;;  %v495_v30 = vmul.f32 %v1178_v39, %v1178_v39 }
 0x12c   : > { %v518_v31 = vsel %vm418_vm2, %v493_v24, 0.0  ;;  %v496_v34 = vmul.f32 %v1180_v6, %v1180_v6  ;;  %v520_v36 = vsel %vm418_vm2, %v494_v27, 0.0  ;;  %v497_v41 = vmul.f32 %v1182_v38, %v1182_v38 }
 0x12d   : > { %v511_v20 = vadd.f32 %v510_v19, %v509_v17  ;;  %v522_v42 = vsel %vm418_vm2, %v495_v30, 0.0  ;;  %v498_v40 = vmul.f32 %v1184_v43, %v1184_v43  ;;  %v499_v47 = vmul.f32 %v1186_v7, %v1186_v7 }
 0x12e   : > { %v524_v46 = vsel %vm418_vm2, %v496_v34, 0.0  ;;  %v526_v48 = vsel %vm418_vm2, %v497_v41, 0.0  ;;  %v500_v50 = vmul.f32 %v1188_v53, %v1188_v53  ;;  %v501_v54 = vmul.f32 %v1190_v59, %v1190_v59 }
 0x12f   : > { %v513_v23 = vadd.f32 %v512_v22, %v511_v20  ;;  %v528_v51 = vsel %vm418_vm2, %v498_v40, 0.0  ;;  %v530_v55 = vsel %vm418_vm2, %v499_v47, 0.0  ;;  %v502_v58 = vmul.f32 %v1192_v8, %v1192_v8 }
 0x130   : > { %v532_v61 = vsel %vm418_vm2, %v500_v50, 0.0  ;;  %v503_v60 = vmul.f32 %v1194_v57, %v1194_v57  ;;  %v534_v11 = vsel %vm418_vm2, %v501_v54, 0.0  ;;  %v504_v13 = vmul.f32 %v1196_v63, %v1196_v63 }
 0x131   : > { %v515_v26 = vadd.f32 %v514_v25, %v513_v23  ;;  %v536_v14 = vsel %vm418_vm2, %v502_v58, 0.0  ;;  %v505_v16 = vmul.f32 %v1198_v9, %v1198_v9  ;;  %v506_v19 = vmul.f32 %v1200_v10, %v1200_v10 }
 0x132   : > { %v538_v17 = vsel %vm418_vm2, %v503_v60, 0.0  ;;  %v540_v20 = vsel %vm418_vm2, %v504_v13, 0.0 }
 0x133   : > { %v517_v29 = vadd.f32 %v516_v28, %v515_v26  ;;  %v542_v22 = vsel %vm418_vm2, %v505_v16, 0.0  ;;  %v544_v24 = vsel %vm456_vm3, %v506_v19, 0.0 }
 0x135   : > { %v519_v33 = vadd.f32 %v518_v31, %v517_v29 }
 0x137   : > { %v521_v37 = vadd.f32 %v520_v36, %v519_v33 }
 0x139   : > { %v523_v44 = vadd.f32 %v522_v42, %v521_v37 }
 0x13b   : > { %v525_v45 = vadd.f32 %v524_v46, %v523_v44 }
 0x13d   : > { %v527_v49 = vadd.f32 %v526_v48, %v525_v45 }
 0x13f   : > { %v529_v52 = vadd.f32 %v528_v51, %v527_v49 }
 0x141   : > { %v531_v56 = vadd.f32 %v530_v55, %v529_v52 }
 0x143   : > { %v533_v62 = vadd.f32 %v532_v61, %v531_v56 }
 0x145   : > { %v535_v12 = vadd.f32 %v534_v11, %v533_v62 }
 0x147   : > { %v537_v15 = vadd.f32 %v536_v14, %v535_v12 }
 0x149   : > { %v539_v18 = vadd.f32 %v538_v17, %v537_v15 }
 0x14b   : > { %v541_v21 = vadd.f32 %v540_v20, %v539_v18 }
 0x14d   : > { %v543_v23 = vadd.f32 %v542_v22, %v541_v21 }
 0x14f   : > { %v545_v25 = vadd.f32 %v544_v24, %v543_v23 }
 0x151   : > { %v546_v26 = vrot.slane %v545_v25, 4 }
 0x153   : > { %v547_v27 = vadd.f32 %v546_v26, %v545_v25 }
 0x155   : > { %v548_v28 = vrot.slane %v547_v27, 2 }
 0x157   : > { %v549_v29 = vadd.f32 %v548_v28, %v547_v27 }
 0x159   : > { %v550_v30 = vrot.slane %v549_v29, 1 }
 0x15b   : > { %v551_v31 = vadd.f32 %v550_v30, %v549_v29 }
 0x15d   : > { %v552_v33 = vmul.f32 0.006289308, %v551_v31 }
 0x15f   : > { %v553_v34 = vadd.f32 1e-05, %v552_v33 }
 0x161   : > { %954 = vrsqrt.f32 %v553_v34 }
 0x16b   : > { %v955_v36 = vpop.eup %954 }
 0x16c   : > { %v561_v37 = vmul.f32 %v955_v36, %v1173_v5  ;;  %v562_v41 = vmul.f32 %v955_v36, %v1176_v35  ;;  %v563_v42 = vmul.f32 %v955_v36, %v1178_v39  ;;  %v564_v44 = vmul.f32 %v955_v36, %v1180_v6 }
 0x16d   : > { %v565_v40 = vmul.f32 %v955_v36, %v1182_v38  ;;  %v566_v46 = vmul.f32 %v955_v36, %v1184_v43  ;;  %v567_v45 = vmul.f32 %v955_v36, %v1186_v7  ;;  %v568_v47 = vmul.f32 %v955_v36, %v1188_v53 }
 0x16e   : > { %v569_v48 = vmul.f32 %v955_v36, %v1190_v59  ;;  %v570_v49 = vmul.f32 %v955_v36, %v1192_v8  ;;  %v571_v5 = vmul.f32 %v955_v36, %v1194_v57  ;;  %v572_v35 = vmul.f32 %v955_v36, %v1196_v63  ;;  %v903_v8 = vld [vmem:[%s1481_s3] ss:$0 sm:$0xff] }
 0x16f   : > { %v573_v39 = vmul.f32 %v955_v36, %v1198_v9  ;;  %v574_v6 = vmul.f32 %v955_v36, %v1200_v10  ;;  %v555_v38 = vmul.f32 %v955_v36, %v1155_v0  ;;  %v556_v43 = vmul.f32 %v955_v36, %v1158_v32 }
 0x170   : > { %v557_v7 = vmul.f32 %v955_v36, %v1161_v1  ;;  %v558_v53 = vmul.f32 %v955_v36, %v1164_v2  ;;  %v559_v59 = vmul.f32 %v955_v36, %v1167_v3  ;;  %v560_v57 = vmul.f32 %v955_v36, %v1170_v4  ;;  %v904_v1 = vld [vmem:[%s1482_s4] ss:$0 sm:$0xff] }
 0x171   : > { %v582_v63 = vmul.f32 %v903_v8, %v555_v38  ;;  %v583_v9 = vmul.f32 %v903_v8, %v556_v43  ;;  %v588_v52 = vmul.f32 %v903_v8, %v561_v37  ;;  %v589_v32 = vmul.f32 %v903_v8, %v562_v41 }
 0x172   : > { %v584_v50 = vmul.f32 %v903_v8, %v557_v7  ;;  %v585_v10 = vmul.f32 %v903_v8, %v558_v53  ;;  %v586_v51 = vmul.f32 %v903_v8, %v559_v59  ;;  %v587_v0 = vmul.f32 %v903_v8, %v560_v57 }
 0x173   : > { %v590_v54 = vmul.f32 %v903_v8, %v563_v42  ;;  %v591_v2 = vmul.f32 %v903_v8, %v564_v44  ;;  %v592_v3 = vmul.f32 %v903_v8, %v565_v40  ;;  %v593_v55 = vmul.f32 %v903_v8, %v566_v46 }
 0x174   : > { %v594_v56 = vmul.f32 %v903_v8, %v567_v45  ;;  %v595_v58 = vmul.f32 %v903_v8, %v568_v47  ;;  %v596_v61 = vmul.f32 %v903_v8, %v569_v48  ;;  %v597_v4 = vmul.f32 %v903_v8, %v570_v49 }
 0x175   : > { %v598_v62 = vmul.f32 %v903_v8, %v571_v5  ;;  %v599_v60 = vmul.f32 %v903_v8, %v572_v35  ;;  %v600_v11 = vmul.f32 %v903_v8, %v573_v39  ;;  %v1288_v12 = vadd.f32 %v904_v1, %v582_v63 }
 0x176   : > { %v1290_v13 = vadd.f32 %v904_v1, %v583_v9  ;;  %v601_v14 = vmul.f32 %v903_v8, %v574_v6  ;;  %v1292_v15 = vadd.f32 %v904_v1, %v584_v50  ;;  %v1294_v16 = vadd.f32 %v904_v1, %v585_v10 }
 0x177   : > { %v1296_v17 = vadd.f32 %v904_v1, %v586_v51  ;;  %v1298_v18 = vadd.f32 %v904_v1, %v587_v0  ;;  %v1300_v19 = vadd.f32 %v904_v1, %v588_v52  ;;  %v1302_v20 = vadd.f32 %v904_v1, %v589_v32 }
 0x178   : > { %v1304_v21 = vadd.f32 %v904_v1, %v590_v54  ;;  %v1306_v22 = vadd.f32 %v904_v1, %v591_v2  ;;  %v1308_v23 = vadd.f32 %v904_v1, %v592_v3  ;;  %v1310_v24 = vadd.f32 %v904_v1, %v593_v55 }
 0x179   : > { %v1312_v25 = vadd.f32 %v904_v1, %v594_v56  ;;  %v1314_v26 = vadd.f32 %v904_v1, %v595_v58  ;;  %v1316_v27 = vadd.f32 %v904_v1, %v596_v61  ;;  %v629_v28 = vmul.f32 %v1288_v12, %v1288_v12 }
 0x17a   : > { %v630_v29 = vmul.f32 %v1290_v13, %v1290_v13  ;;  %v1322_v30 = vadd.f32 %v904_v1, %v597_v4  ;;  %v1324_v31 = vadd.f32 %v904_v1, %v598_v62  ;;  %v631_v33 = vmul.f32 %v1292_v15, %v1292_v15 }
 0x17b   : > { %v632_v34 = vmul.f32 %v1294_v16, %v1294_v16  ;;  %v1330_v36 = vadd.f32 %v904_v1, %v599_v60  ;;  %v1332_v37 = vadd.f32 %v904_v1, %v600_v11  ;;  %v1334_v41 = vadd.f32 %v904_v1, %v601_v14 }
 0x17c   : > { %v633_v42 = vmul.f32 %v1296_v17, %v1296_v17  ;;  %v634_v44 = vmul.f32 %v1298_v18, %v1298_v18  ;;  %v635_v40 = vmul.f32 %v1300_v19, %v1300_v19  ;;  %v636_v46 = vmul.f32 %v1302_v20, %v1302_v20 }
 0x17d   : > { %v637_v45 = vmul.f32 %v1304_v21, %v1304_v21  ;;  %v638_v47 = vmul.f32 %v1306_v22, %v1306_v22  ;;  %v639_v48 = vmul.f32 %v1308_v23, %v1308_v23  ;;  %v649_v49 = vmul.f32 %v629_v28, %v1288_v12 }
 0x17e   : > { %v650_v5 = vmul.f32 %v630_v29, %v1290_v13  ;;  %v640_v35 = vmul.f32 %v1310_v24, %v1310_v24  ;;  %v641_v39 = vmul.f32 %v1312_v25, %v1312_v25  ;;  %v651_v6 = vmul.f32 %v631_v33, %v1292_v15 }
 0x17f   : > { %v652_v38 = vmul.f32 %v632_v34, %v1294_v16  ;;  %v642_v43 = vmul.f32 %v1314_v26, %v1314_v26  ;;  %v643_v7 = vmul.f32 %v1316_v27, %v1316_v27  ;;  %v644_v53 = vmul.f32 %v1322_v30, %v1322_v30 }
 0x180   : > { %v653_v59 = vmul.f32 %v633_v42, %v1296_v17  ;;  %v645_v8 = vmul.f32 %v1324_v31, %v1324_v31  ;;  %v646_v57 = vmul.f32 %v1330_v36, %v1330_v36  ;;  %v647_v63 = vmul.f32 %v1332_v37, %v1332_v37 }
 0x181   : > { %v654_v9 = vmul.f32 %v634_v44, %v1298_v18  ;;  %v648_v50 = vmul.f32 %v1334_v41, %v1334_v41  ;;  %v655_v10 = vmul.f32 %v635_v40, %v1300_v19  ;;  %v669_v51 = vmul.f32 0.044715, %v649_v49 }
 0x182   : > { %v670_v0 = vmul.f32 0.044715, %v650_v5  ;;  %v656_v52 = vmul.f32 %v636_v46, %v1302_v20  ;;  %v657_v32 = vmul.f32 %v637_v45, %v1304_v21  ;;  %v671_v54 = vmul.f32 0.044715, %v651_v6 }
 0x183   : > { %v672_v1 = vmul.f32 0.044715, %v652_v38  ;;  %v658_v2 = vmul.f32 %v638_v47, %v1306_v22  ;;  %v659_v3 = vmul.f32 %v639_v48, %v1308_v23  ;;  %v660_v55 = vmul.f32 %v640_v35, %v1310_v24 }
 0x184   : > { %v673_v56 = vmul.f32 0.044715, %v653_v59  ;;  %v661_v58 = vmul.f32 %v641_v39, %v1312_v25  ;;  %v662_v61 = vmul.f32 %v642_v43, %v1314_v26  ;;  %v663_v4 = vmul.f32 %v643_v7, %v1316_v27 }
 0x185   : > { %v674_v62 = vmul.f32 0.044715, %v654_v9  ;;  %v664_v60 = vmul.f32 %v644_v53, %v1322_v30  ;;  %v675_v11 = vmul.f32 0.044715, %v655_v10  ;;  %v689_v14 = vadd.f32 %v669_v51, %v1288_v12 }
 0x186   : > { %v690_v28 = vadd.f32 %v670_v0, %v1290_v13  ;;  %v665_v29 = vmul.f32 %v645_v8, %v1324_v31  ;;  %v676_v33 = vmul.f32 0.044715, %v656_v52  ;;  %v691_v34 = vadd.f32 %v671_v54, %v1292_v15 }
 0x187   : > { %v692_v42 = vadd.f32 %v672_v1, %v1294_v16  ;;  %v666_v44 = vmul.f32 %v646_v57, %v1330_v36  ;;  %v667_v40 = vmul.f32 %v647_v63, %v1332_v37  ;;  %v677_v46 = vmul.f32 0.044715, %v657_v32 }
 0x188   : > { %v693_v45 = vadd.f32 %v673_v56, %v1296_v17  ;;  %v668_v47 = vmul.f32 %v648_v50, %v1334_v41  ;;  %v678_v48 = vmul.f32 0.044715, %v658_v2  ;;  %v679_v49 = vmul.f32 0.044715, %v659_v3 }
 0x189   : > { %v694_v5 = vadd.f32 %v674_v62, %v1298_v18  ;;  %v680_v35 = vmul.f32 0.044715, %v660_v55  ;;  %v695_v39 = vadd.f32 %v675_v11, %v1300_v19  ;;  %v709_v6 = vmul.f32 0.7978846, %v689_v14 }
 0x18a   : > { %v710_v38 = vmul.f32 0.7978846, %v690_v28  ;;  %v681_v43 = vmul.f32 0.044715, %v661_v58  ;;  %v696_v7 = vadd.f32 %v676_v33, %v1302_v20  ;;  %v711_v53 = vmul.f32 0.7978846, %v691_v34 }
 0x18b   : > { %v712_v59 = vmul.f32 0.7978846, %v692_v42  ;;  %v682_v8 = vmul.f32 0.044715, %v662_v61  ;;  %v697_v57 = vadd.f32 %v677_v46, %v1304_v21  ;;  %v713_v63 = vmul.f32 0.7978846, %v693_v45 }
 0x18c   : > { %956 = vtanh.f32 %v709_v6  ;;  %v683_v9 = vmul.f32 0.044715, %v663_v4  ;;  %v698_v50 = vadd.f32 %v678_v48, %v1306_v22  ;;  %v714_v10 = vmul.f32 0.7978846, %v694_v5 }
 0x18d   : > { %958 = vtanh.f32 %v710_v38  ;;  %v684_v51 = vmul.f32 0.044715, %v664_v60  ;;  %v699_v0 = vadd.f32 %v679_v49, %v1308_v23  ;;  %v715_v52 = vmul.f32 0.7978846, %v695_v39 }
 0x18e   : > { %960 = vtanh.f32 %v711_v53  ;;  %v685_v32 = vmul.f32 0.044715, %v665_v29  ;;  %v700_v54 = vadd.f32 %v680_v35, %v1310_v24  ;;  %v716_v1 = vmul.f32 0.7978846, %v696_v7 }
 0x18f   : > { %962 = vtanh.f32 %v712_v59  ;;  %v686_v2 = vmul.f32 0.044715, %v666_v44  ;;  %v701_v3 = vadd.f32 %v681_v43, %v1312_v25  ;;  %v717_v55 = vmul.f32 0.7978846, %v697_v57 }
 0x190   : > { %964 = vtanh.f32 %v713_v63  ;;  %v687_v56 = vmul.f32 0.044715, %v667_v40  ;;  %v702_v58 = vadd.f32 %v682_v8, %v1314_v26  ;;  %v718_v61 = vmul.f32 0.7978846, %v698_v50 }
 0x191   : > { %966 = vtanh.f32 %v714_v10  ;;  %v688_v4 = vmul.f32 0.044715, %v668_v47  ;;  %v703_v62 = vadd.f32 %v683_v9, %v1316_v27  ;;  %v719_v60 = vmul.f32 0.7978846, %v699_v0 }
 0x192   : > { %968 = vtanh.f32 %v715_v52  ;;  %v704_v11 = vadd.f32 %v684_v51, %v1322_v30  ;;  %v720_v14 = vmul.f32 0.7978846, %v700_v54  ;;  %v705_v28 = vadd.f32 %v685_v32, %v1324_v31 }
 0x193   : > { %970 = vtanh.f32 %v716_v1  ;;  %v706_v29 = vadd.f32 %v686_v2, %v1330_v36  ;;  %v721_v33 = vmul.f32 0.7978846, %v701_v3  ;;  %v707_v34 = vadd.f32 %v687_v56, %v1332_v37 }
 0x194   : > { %972 = vtanh.f32 %v717_v55  ;;  %v722_v42 = vmul.f32 0.7978846, %v702_v58  ;;  %v708_v40 = vadd.f32 %v688_v4, %v1334_v41  ;;  %v723_v46 = vmul.f32 0.7978846, %v703_v62 }
 0x195   : > { %974 = vtanh.f32 %v718_v61  ;;  %v724_v47 = vmul.f32 0.7978846, %v704_v11  ;;  %v725_v5 = vmul.f32 0.7978846, %v705_v28  ;;  %v726_v35 = vmul.f32 0.7978846, %v706_v29 }
 0x196   : > { %v957_v44 = vpop.eup %956  ;;  %976 = vtanh.f32 %v719_v60  ;;  %v727_v38 = vmul.f32 0.7978846, %v707_v34  ;;  %v728_v59 = vmul.f32 0.7978846, %v708_v40 }
 0x197   : > { %v959_v45 = vpop.eup %958  ;;  %978 = vtanh.f32 %v720_v14  ;;  %v749_v48 = vadd.f32 1.0, %v957_v44 }
 0x198   : > { %v961_v49 = vpop.eup %960  ;;  %980 = vtanh.f32 %v721_v33  ;;  %v750_v39 = vadd.f32 1.0, %v959_v45 }
 0x199   : > { %v963_v6 = vpop.eup %962  ;;  %982 = vtanh.f32 %v722_v42  ;;  %v751_v43 = vadd.f32 1.0, %v961_v49  ;;  %v769_v7 = vmul.f32 0.5, %v749_v48 }
 0x19a   : > { %v965_v53 = vpop.eup %964  ;;  %984 = vtanh.f32 %v723_v46  ;;  %v752_v8 = vadd.f32 1.0, %v963_v6  ;;  %v770_v57 = vmul.f32 0.5, %v750_v39 }
 0x19b   : > { %v967_v63 = vpop.eup %966  ;;  %986 = vtanh.f32 %v724_v47  ;;  %v753_v9 = vadd.f32 1.0, %v965_v53  ;;  %v771_v50 = vmul.f32 0.5, %v751_v43  ;;  %v789_v10 = vmul.f32 %v769_v7, %v1288_v12 }
 0x19c   : > { %v969_v51 = vpop.eup %968  ;;  %988 = vtanh.f32 %v725_v5  ;;  %v754_v0 = vadd.f32 1.0, %v967_v63  ;;  %v772_v52 = vmul.f32 0.5, %v752_v8  ;;  %v790_v32 = vmul.f32 %v770_v57, %v1290_v13 }
 0x19d   : > { %v971_v54 = vpop.eup %970  ;;  %990 = vtanh.f32 %v726_v35  ;;  %v755_v1 = vadd.f32 1.0, %v969_v51  ;;  %v773_v2 = vmul.f32 0.5, %v753_v9  ;;  %v791_v3 = vmul.f32 %v771_v50, %v1292_v15  ;;  %809 = vst.msk [vmem:[%s1413_s9] sm:$0xff] %vm418_vm2, %v789_v10 }
 0x19e   : > { %v973_v55 = vpop.eup %972  ;;  %992 = vtanh.f32 %v727_v38  ;;  %v756_v12 = vadd.f32 1.0, %v971_v54  ;;  %v774_v56 = vmul.f32 0.5, %v754_v0  ;;  %v792_v58 = vmul.f32 %v772_v52, %v1294_v16  ;;  %810 = vst.msk [vmem:[%s1413_s9 + $0x8] sm:$0xff] %vm418_vm2, %v790_v32 }
 0x19f   : > { %v975_v13 = vpop.eup %974  ;;  %994 = vtanh.f32 %v728_v59  ;;  %v757_v61 = vadd.f32 1.0, %v973_v55  ;;  %v775_v4 = vmul.f32 0.5, %v755_v1  ;;  %v793_v62 = vmul.f32 %v773_v2, %v1296_v17  ;;  %811 = vst.msk [vmem:[%s1413_s9 + $0x10] sm:$0xff] %vm418_vm2, %v791_v3 }
 0x1a0   : > { %v977_v15 = vpop.eup %976  ;;  %v758_v60 = vadd.f32 1.0, %v975_v13  ;;  %v776_v11 = vmul.f32 0.5, %v756_v12  ;;  %v794_v14 = vmul.f32 %v774_v56, %v1298_v18  ;;  %812 = vst.msk [vmem:[%s1413_s9 + $0x18] sm:$0xff] %vm418_vm2, %v792_v58 }
 0x1a1   : > { %v979_v16 = vpop.eup %978  ;;  %v759_v28 = vadd.f32 1.0, %v977_v15  ;;  %v777_v29 = vmul.f32 0.5, %v757_v61  ;;  %v795_v33 = vmul.f32 %v775_v4, %v1300_v19  ;;  %813 = vst.msk [vmem:[%s1413_s9 + $0x20] sm:$0xff] %vm418_vm2, %v793_v62 }
 0x1a2   : > { %v981_v17 = vpop.eup %980  ;;  %v760_v34 = vadd.f32 1.0, %v979_v16  ;;  %v778_v42 = vmul.f32 0.5, %v758_v60  ;;  %v796_v44 = vmul.f32 %v776_v11, %v1302_v20  ;;  %814 = vst.msk [vmem:[%s1413_s9 + $0x28] sm:$0xff] %vm418_vm2, %v794_v14 }
 0x1a3   : > { %v983_v18 = vpop.eup %982  ;;  %v761_v40 = vadd.f32 1.0, %v981_v17  ;;  %v779_v46 = vmul.f32 0.5, %v759_v28  ;;  %v797_v45 = vmul.f32 %v777_v29, %v1304_v21  ;;  %815 = vst.msk [vmem:[%s1413_s9 + $0x30] sm:$0xff] %vm418_vm2, %v795_v33 }
 0x1a4   : > { %v985_v19 = vpop.eup %984  ;;  %v762_v47 = vadd.f32 1.0, %v983_v18  ;;  %v780_v48 = vmul.f32 0.5, %v760_v34  ;;  %v798_v49 = vmul.f32 %v778_v42, %v1306_v22  ;;  %816 = vst.msk [vmem:[%s1413_s9 + $0x38] sm:$0xff] %vm418_vm2, %v796_v44 }
 0x1a5   : > { %v987_v20 = vpop.eup %986  ;;  %v763_v5 = vadd.f32 1.0, %v985_v19  ;;  %v781_v35 = vmul.f32 0.5, %v761_v40  ;;  %v799_v39 = vmul.f32 %v779_v46, %v1308_v23  ;;  %817 = vst.msk [vmem:[%s1413_s9 + $0x40] sm:$0xff] %vm418_vm2, %v797_v45 }
 0x1a6   : > { %v989_v21 = vpop.eup %988  ;;  %v764_v6 = vadd.f32 1.0, %v987_v20  ;;  %v782_v38 = vmul.f32 0.5, %v762_v47  ;;  %v800_v43 = vmul.f32 %v780_v48, %v1310_v24  ;;  %818 = vst.msk [vmem:[%s1413_s9 + $0x48] sm:$0xff] %vm418_vm2, %v798_v49 }
 0x1a7   : > { %v991_v22 = vpop.eup %990  ;;  %v765_v7 = vadd.f32 1.0, %v989_v21  ;;  %v783_v53 = vmul.f32 0.5, %v763_v5  ;;  %v801_v59 = vmul.f32 %v781_v35, %v1312_v25  ;;  %819 = vst.msk [vmem:[%s1413_s9 + $0x50] sm:$0xff] %vm418_vm2, %v799_v39 }
 0x1a8   : > { %v993_v23 = vpop.eup %992  ;;  %v766_v8 = vadd.f32 1.0, %v991_v22  ;;  %v784_v57 = vmul.f32 0.5, %v764_v6  ;;  %v802_v63 = vmul.f32 %v782_v38, %v1314_v26  ;;  %820 = vst.msk [vmem:[%s1413_s9 + $0x58] sm:$0xff] %vm418_vm2, %v800_v43 }
 0x1a9   : > { %v995_v24 = vpop.eup %994  ;;  %v767_v9 = vadd.f32 1.0, %v993_v23  ;;  %v785_v50 = vmul.f32 0.5, %v765_v7  ;;  %v803_v10 = vmul.f32 %v783_v53, %v1316_v27  ;;  %821 = vst.msk [vmem:[%s1413_s9 + $0x60] sm:$0xff] %vm418_vm2, %v801_v59 }
 0x1aa   : > { %v768_v25 = vadd.f32 1.0, %v995_v24  ;;  %v786_v51 = vmul.f32 0.5, %v766_v8  ;;  %v804_v0 = vmul.f32 %v784_v57, %v1322_v30  ;;  %822 = vst.msk [vmem:[%s1413_s9 + $0x68] sm:$0xff] %vm418_vm2, %v802_v63 }
 0x1ab   : > { %v787_v26 = vmul.f32 0.5, %v767_v9  ;;  %v805_v52 = vmul.f32 %v785_v50, %v1324_v31  ;;  %823 = vst.msk [vmem:[%s1413_s9 + $0x70] sm:$0xff] %vm418_vm2, %v803_v10 }
 0x1ac   : > { %v788_v32 = vmul.f32 0.5, %v768_v25  ;;  %v806_v54 = vmul.f32 %v786_v51, %v1330_v36  ;;  %824 = vst.msk [vmem:[%s1413_s9 + $0x78] sm:$0xff] %vm418_vm2, %v804_v0 }
 0x1ad   : > { %v807_v27 = vmul.f32 %v787_v26, %v1332_v37  ;;  %825 = vst.msk [vmem:[%s1413_s9 + $0x80] sm:$0xff] %vm418_vm2, %v805_v52 }
 0x1ae   : > { %v808_v1 = vmul.f32 %v788_v32, %v1334_v41  ;;  %826 = vst.msk [vmem:[%s1413_s9 + $0x88] sm:$0xff] %vm418_vm2, %v806_v54 }
 0x1af   : > { %827 = vst.msk [vmem:[%s1413_s9 + $0x90] sm:$0xff] %vm418_vm2, %v807_v27 }
 0x1b0   : > { %828 = vst.msk [vmem:[%s1413_s9 + $0x98] sm:$0x7f] %vm456_vm3, %v808_v1 }
 0x1b1 PF: > { %s15_s18 = sadd.s32 1, %s1002_s18  }
 0x1b2   : > { %p12_p4 = scmp.ge.s32.totalorder %s15_s18, 4  }
 0x1b4   :  { %14 = sbr.rel (!%p12_p4) target bundleno = 1 (0x1), region = 70 }

// kernel: distiller_model_forward.6
= control target key start
LH: loop header
LB: loop body
LE: loop exit
PB: predicated region body
PF: predicated region fallthrough
CT: control target
= control target key end

     0   :  { %s760_s21 = smov 0   ;;  %s841_s0 = inlined_call_operand.vmem [shape: f32[2,39,64], index: 0, kind: input, shape index: {}]   ;;  %s842_s1 = inlined_call_operand.vmem [shape: bf16[64,32], index: 1, kind: input, shape index: {}]   ;;  %s843_s2 = inlined_call_operand.vmem [shape: f32[1,32], index: 2, kind: input, shape index: {}]   ;;  %s844_s3 = inlined_call_operand.vmem [shape: bf16[32,64], index: 3, kind: input, shape index: {}]   ;;  %s845_s4 = inlined_call_operand.vmem [shape: f32[1,64], index: 4, kind: input, shape index: {}]   ;;  %s846_s5 = inlined_call_operand.vmem [shape: f32[2,39,32], index: 5, kind: output, shape index: {0}]   ;;  %s847_s6 = inlined_call_operand.vmem [shape: f32[2,39,64], index: 6, kind: output, shape index: {1}]  }
   0x1 LB: > { %s616_s22 = sadd.s32 4294967295, %s721_s21   ;;  %p620_p0 = scmp.ge.s32.totalorder %s721_s21, 1  ;;  %s721_s21 = sphi %s760_s21, %s17_s21  }
   0x2   : > { %p215_p1 = scmp.lt.s32.totalorder %s721_s21, 3 }
   0x4   : > { %p216_p2 = pnand %p620_p0, %p215_p1 }
   0x5   : > { %v699_v0 = vld [vmem:[%s842_s1] sm:$0xff] (!%p216_p2)   ;;  %v723_v1 = vmov (!%p216_p2), 0.0   ;;  %v700_v2 = vld [vmem:[%s842_s1 + $0x8] sm:$0xff] (!%p216_p2)   ;;  %vm724_vm0 = vmmov (!%p216_p2), 0   ;;  %p250_p3 = scmp.lt.s32.totalorder (!%p216_p2), %s616_s22, 1  ;;  %v701_v3 = vld [vmem:[%s842_s1 + $0x10] sm:$0xff] (!%p216_p2)  }
   0x6   : > { %219 = sbr.rel (%p216_p2) target bundleno = 498 (0x1f2), region = 40  ;;  %652 = vmatprep.subr.bf16.mxu0 (!%p216_p2), %v723_v1  ;;  %672 = vmatprep.subr.bf16.mxu1 (!%p216_p2), %v723_v1  ;;  %v702_v4 = vld [vmem:[%s842_s1 + $0x18] sm:$0xff] (!%p216_p2)   ;;  %vm313_vm1 = vcmask (!%p216_p2), 523264   ;;  %v703_v13 = vld [vmem:[%s844_s3] sm:$0xff] (!%p216_p2)   ;;  %v704_v14 = vld [vmem:[%s844_s3 + $0x8] sm:$0xff] (!%p216_p2)   ;;  %vm424_vm2 = vcmask (!%p216_p2), 261120  }
   0x7   : > { %653 = vmatpush3.bf16.msra.mxu0 (!%p216_p2), %v699_v0  ;;  %660 = vmatprep.mubr.msk.bf16.mxu0 (!%p216_p2), %vm724_vm0, %v723_v1  ;;  %v624_v15 = vld [vmem:[%s843_s2] ss:$0 sm:$0xff] (!%p216_p2)  ;;  %vm429_vm3 = vcmask (!%p216_p2), 260096   ;;  %vm526_vm4 = vcmask (!%p216_p2), 522240  }
   0x8   : > { %654 = vmatprep.subr.bf16.mxu0 (!%p216_p2), %v723_v1  ;;  %676 = vmatprep.mubr.msk.bf16.mxu1 (!%p216_p2), %vm724_vm0, %v723_v1 }
   0x9   : > { %673 = vmatpush3.bf16.msra.mxu1 (!%p216_p2), %v703_v13 }
   0xa   : > { %674 = vmatprep.subr.bf16.mxu1 (!%p216_p2), %v723_v1 }
   0xb   : > { %655 = vmatpush3.bf16.msra.mxu0 (!%p216_p2), %v700_v2 }
   0xc   : > { %656 = vmatprep.subr.bf16.mxu0 (!%p216_p2), %v723_v1 }
   0xd   : > { %s849_s22 = smov (!%p250_p3, %s616_s22), 1  ;;  %675 = vmatpush3.bf16.msra.mxu1 %v704_v14 }
   0xe   : > { %s784_s29 = smul.u32 40, %s849_s22 }
   0xf   : > { %657 = vmatpush3.bf16.msra.mxu0 %v701_v3 }
  0x10   : > { %s254_s8 = scalar_lea.vmem %s841_s0, %s784_s29  ;;  %658 = vmatprep.subr.bf16.mxu0 %v723_v1  ;;  %s259_s19 = scalar_lea.vmem %s846_s5, %s784_s29 }
  0x11   : > { %v266_v5 = vld [vmem:[%s254_s8] sm:$0xff]  ;;  %v267_v6 = vld [vmem:[%s254_s8 + $0x8] sm:$0xff]  ;;  %v268_v8 = vld [vmem:[%s254_s8 + $0x10] sm:$0xff]  ;;  %s264_s25 = scalar_lea.vmem %s847_s6, %s784_s29 }
  0x12   : > { %v279_v7 = vpack.c.bf16 %v267_v6, %v266_v5  ;;  %v269_v9 = vld [vmem:[%s254_s8 + $0x18] sm:$0xff]  ;;  %v270_v11 = vld [vmem:[%s254_s8 + $0x20] sm:$0x7f] }
  0x13   : > { %659 = vmatpush3.bf16.msra.mxu0 %v702_v4  ;;  %v280_v10 = vpack.c.bf16 %v269_v9, %v268_v8  ;;  %v281_v12 = vpack.c.bf16 %v270_v11, %v270_v11 }
  0x16   : > { %661 = vmatmul.mubr.msk.bf16.vlgmr.msra.gmra.mrb[0].mxu0 %vm313_vm1, %v279_v7 }
  0x17   : > { %664 = vmatprep.mubr.msk.bf16.mxu0 %vm724_vm0, %v723_v1 }
  0x1e   : > { %665 = vmatmul.mubr.msk.bf16.gmra.mrb[4].mxu0 %vm313_vm1, %v280_v10 }
  0x1f   : > { %668 = vmatprep.mubr.msk.bf16.mxu0 %vm724_vm0, %v723_v1 }
  0x26   : > { %669 = vmatmul.mubr.msk.bf16.gmra.mrb[8].mxu0 %vm313_vm1, %v281_v12 }
  0xe9   : > { %v357_v16 = vpop.f32.mrb[0].mxu0 }
  0xea   : > { %v358_v17 = vadd.f32 %v624_v15, %v357_v16  ;;  %v662_v18 = vpop.f32.mrb[1].mxu0 }
  0xeb   : > { %v360_v19 = vpop.f32.mrb[2].mxu0  ;;  %v632_v18 = vld [vmem:[%s845_s4] ss:$0 sm:$0xff] }
  0xec   : > { %v379_v20 = vmul.f32 %v358_v17, %v358_v17  ;;  %v361_v21 = vadd.f32 %v624_v15, %v360_v19  ;;  %v663_v22 = vpop.f32.mrb[3].mxu0 }
  0xee   : > { %v384_v23 = vmul.f32 %v379_v20, %v358_v17  ;;  %v380_v24 = vmul.f32 %v361_v21, %v361_v21 }
  0xf0   : > { %v389_v25 = vmul.f32 0.044715, %v384_v23  ;;  %v385_v26 = vmul.f32 %v380_v24, %v361_v21 }
  0xf1   : > { %v365_v27 = vpop.f32.mrb[4].mxu0 }
  0xf2   : > { %v394_v28 = vadd.f32 %v389_v25, %v358_v17  ;;  %v390_v29 = vmul.f32 0.044715, %v385_v26  ;;  %v366_v30 = vadd.f32 %v624_v15, %v365_v27  ;;  %v666_v31 = vpop.f32.mrb[5].mxu0 }
  0xf3   : > { %v368_v32 = vpop.f32.mrb[6].mxu0 }
  0xf4   : > { %v399_v33 = vmul.f32 0.7978846, %v394_v28  ;;  %v395_v34 = vadd.f32 %v390_v29, %v361_v21  ;;  %v381_v35 = vmul.f32 %v366_v30, %v366_v30  ;;  %v369_v36 = vadd.f32 %v624_v15, %v368_v32  ;;  %v667_v37 = vpop.f32.mrb[7].mxu0 }
  0xf6   : > { %705 = vtanh.f32 %v399_v33  ;;  %v400_v38 = vmul.f32 0.7978846, %v395_v34  ;;  %v386_v39 = vmul.f32 %v381_v35, %v366_v30  ;;  %v382_v40 = vmul.f32 %v369_v36, %v369_v36 }
  0xf8   : > { %707 = vtanh.f32 %v400_v38  ;;  %v391_v41 = vmul.f32 0.044715, %v386_v39  ;;  %v387_v42 = vmul.f32 %v382_v40, %v369_v36 }
  0xf9   : > { %v373_v43 = vpop.f32.mrb[8].mxu0 }
  0xfa   : > { %v396_v44 = vadd.f32 %v391_v41, %v366_v30  ;;  %v392_v45 = vmul.f32 0.044715, %v387_v42  ;;  %v374_v46 = vadd.f32 %v624_v15, %v373_v43  ;;  %v670_v47 = vpop.f32.mrb[9].mxu0 }
  0xfb   : > { %v376_v48 = vpop.f32.mrb[10].mxu0 }
  0xfc   : > { %v401_v49 = vmul.f32 0.7978846, %v396_v44  ;;  %v397_v50 = vadd.f32 %v392_v45, %v369_v36  ;;  %v383_v51 = vmul.f32 %v374_v46, %v374_v46  ;;  %v671_v52 = vpop.f32.mrb[11].mxu0 }
  0xfe   : > { %709 = vtanh.f32 %v401_v49  ;;  %v402_v53 = vmul.f32 0.7978846, %v397_v50  ;;  %v388_v54 = vmul.f32 %v383_v51, %v374_v46 }
 0x100   : > { %v706_v55 = vpop.eup %705  ;;  %711 = vtanh.f32 %v402_v53  ;;  %v393_v56 = vmul.f32 0.044715, %v388_v54 }
 0x101   : > { %v409_v57 = vadd.f32 1.0, %v706_v55 }
 0x102   : > { %v708_v58 = vpop.eup %707  ;;  %v398_v59 = vadd.f32 %v393_v56, %v374_v46 }
 0x103   : > { %v414_v60 = vmul.f32 0.5, %v409_v57  ;;  %v410_v61 = vadd.f32 1.0, %v708_v58 }
 0x104   : > { %v403_v62 = vmul.f32 0.7978846, %v398_v59 }
 0x105   : > { %v419_v63 = vmul.f32 %v414_v60, %v358_v17  ;;  %v415_v0 = vmul.f32 0.5, %v410_v61 }
 0x106   : > { %713 = vtanh.f32 %v403_v62 }
 0x107   : > { %v420_v2 = vmul.f32 %v415_v0, %v361_v21  ;;  %425 = vst.msk [vmem:[%s259_s19] sm:$0xff] %vm424_vm2, %v419_v63 }
 0x108   : > { %v710_v3 = vpop.eup %709 }
 0x109   : > { %v411_v4 = vadd.f32 1.0, %v710_v3  ;;  %426 = vst.msk [vmem:[%s259_s19 + $0x8] sm:$0xff] %vm424_vm2, %v420_v2  ;;  %v435_v5 = vpack.c.bf16 %v420_v2, %v419_v63 }
 0x10a   : > { %v712_v6 = vpop.eup %711 }
 0x10b   : > { %v416_v7 = vmul.f32 0.5, %v411_v4  ;;  %v412_v8 = vadd.f32 1.0, %v712_v6  ;;  %677 = vmatmul.mubr.msk.bf16.vlgmr.msra.gmra.mrb[0].mxu1 %vm424_vm2, %v435_v5 }
 0x10c   : > { %680 = vmatprep.mubr.msk.bf16.mxu1 %vm724_vm0, %v723_v1 }
 0x10d   : > { %v421_v9 = vmul.f32 %v416_v7, %v366_v30  ;;  %v417_v10 = vmul.f32 0.5, %v412_v8 }
 0x10f   : > { %v422_v11 = vmul.f32 %v417_v10, %v369_v36  ;;  %427 = vst.msk [vmem:[%s259_s19 + $0x10] sm:$0xff] %vm424_vm2, %v421_v9 }
 0x110   : > { %v714_v12 = vpop.eup %713 }
 0x111   : > { %v413_v13 = vadd.f32 1.0, %v714_v12  ;;  %428 = vst.msk [vmem:[%s259_s19 + $0x18] sm:$0xff] %vm424_vm2, %v422_v11  ;;  %v436_v14 = vpack.c.bf16 %v422_v11, %v421_v9 }
 0x113   : > { %v418_v15 = vmul.f32 0.5, %v413_v13  ;;  %681 = vmatmul.mubr.msk.bf16.gmra.mrb[4].mxu1 %vm424_vm2, %v436_v14 }
 0x114   : > { %684 = vmatprep.mubr.msk.bf16.mxu1 %vm724_vm0, %v723_v1 }
 0x115   : > { %v423_v16 = vmul.f32 %v418_v15, %v374_v46 }
 0x117   : > { %430 = vst.msk [vmem:[%s259_s19 + $0x20] sm:$0x7f] %vm429_vm3, %v423_v16  ;;  %v437_v17 = vpack.c.bf16 %v423_v16, %v423_v16 }
 0x11b   : > { %685 = vmatmul.mubr.msk.bf16.gmra.mrb[8].mxu1 %vm424_vm2, %v437_v17 }
 0x1de   : > { %v500_v19 = vpop.f32.mrb[0].mxu1 }
 0x1df   : > { %v501_v20 = vadd.f32 %v632_v18, %v500_v19  ;;  %v678_v21 = vpop.f32.mrb[1].mxu1 }
 0x1e0   : > { %v503_v22 = vpop.f32.mrb[2].mxu1 }
 0x1e1   : > { %522 = vst.msk [vmem:[%s264_s25] sm:$0xff] %vm313_vm1, %v501_v20  ;;  %v504_v1 = vadd.f32 %v632_v18, %v503_v22  ;;  %v679_v23 = vpop.f32.mrb[3].mxu1 }
 0x1e3   : > { %523 = vst.msk [vmem:[%s264_s25 + $0x8] sm:$0xff] %vm313_vm1, %v504_v1 }
 0x1e6   : > { %v508_v24 = vpop.f32.mrb[4].mxu1 }
 0x1e7   : > { %v509_v25 = vadd.f32 %v632_v18, %v508_v24  ;;  %v682_v26 = vpop.f32.mrb[5].mxu1 }
 0x1e8   : > { %v511_v27 = vpop.f32.mrb[6].mxu1 }
 0x1e9   : > { %524 = vst.msk [vmem:[%s264_s25 + $0x10] sm:$0xff] %vm313_vm1, %v509_v25  ;;  %v512_v28 = vadd.f32 %v632_v18, %v511_v27  ;;  %v683_v29 = vpop.f32.mrb[7].mxu1 }
 0x1eb   : > { %525 = vst.msk [vmem:[%s264_s25 + $0x18] sm:$0xff] %vm313_vm1, %v512_v28 }
 0x1ee   : > { %v516_v30 = vpop.f32.mrb[8].mxu1 }
 0x1ef   : > { %v517_v31 = vadd.f32 %v632_v18, %v516_v30  ;;  %v686_v32 = vpop.f32.mrb[9].mxu1 }
 0x1f0   : > { %v519_v33 = vpop.f32.mrb[10].mxu1 }
 0x1f1   : > { %527 = vst.msk [vmem:[%s264_s25 + $0x20] sm:$0x7f] %vm526_vm4, %v517_v31  ;;  %v687_v34 = vpop.f32.mrb[11].mxu1 }
 0x1f2 PF: > { %s17_s21 = sadd.s32 1, %s721_s21  }
 0x1f3   : > { %p14_p4 = scmp.ge.s32.totalorder %s17_s21, 4  }
 0x1f5   :  { %16 = sbr.rel (!%p14_p4) target bundleno = 1 (0x1), region = 82 }

// kernel: distiller_model_forward.7
= control target key start
LH: loop header
LB: loop body
LE: loop exit
PB: predicated region body
PF: predicated region fallthrough
CT: control target
= control target key end

     0   :  { %s6119_s0 = inlined_call_operand.vmem [shape: f32[2,40,512], index: 0, kind: input, shape index: {}]   ;;  %s6120_s1 = inlined_call_operand.vmem [shape: f32[2,40,64], index: 1, kind: input, shape index: {}]   ;;  %s6121_s2 = inlined_call_operand.vmem [shape: f32[2,1,40], index: 2, kind: input, shape index: {}]   ;;  %s6122_s3 = inlined_call_operand.vmem [shape: bf16[512,64], index: 3, kind: input, shape index: {}]   ;;  %s6123_s4 = inlined_call_operand.vmem [shape: f32[1,64], index: 4, kind: input, shape index: {}]   ;;  %s6124_s5 = inlined_call_operand.vmem [shape: f32[1,64], index: 5, kind: input, shape index: {}]   ;;  %s6125_s6 = inlined_call_operand.vmem [shape: f32[1,64], index: 6, kind: input, shape index: {}]   ;;  %s6126_s7 = inlined_call_operand.vmem [shape: bf16[2,64,192], index: 7, kind: input, shape index: {}]   ;;  %s6127_s8 = inlined_call_operand.vmem [shape: f32[2,1,192], index: 8, kind: input, shape index: {}]   ;;  %s6128_s9 = inlined_call_operand.vmem [shape: bf16[2,64,64], index: 9, kind: input, shape index: {}]   ;;  %s6129_s10 = inlined_call_operand.vmem [shape: f32[2,1,64], index: 10, kind: input, shape index: {}]   ;;  %s6130_s11 = inlined_call_operand.vmem [shape: f32[2,1,64], index: 11, kind: input, shape index: {}]   ;;  %s6131_s12 = inlined_call_operand.vmem [shape: f32[2,1,64], index: 12, kind: input, shape index: {}]   ;;  %s6132_s13 = inlined_call_operand.vmem [shape: bf16[2,64,128], index: 13, kind: input, shape index: {}]   ;;  %s6133_s14 = inlined_call_operand.vmem [shape: f32[2,1,128], index: 14, kind: input, shape index: {}]   ;;  %s6134_s15 = inlined_call_operand.vmem [shape: bf16[2,128,64], index: 15, kind: input, shape index: {}]   ;;  %s6135_s16 = inlined_call_operand.vmem [shape: f32[2,1,64], index: 16, kind: input, shape index: {}]   ;;  %s6136_s17 = inlined_call_operand.vmem [shape: f32[2,1,64], index: 17, kind: input, shape index: {}]   ;;  %s6137_s18 = inlined_call_operand.vmem [shape: f32[2,1,64], index: 18, kind: input, shape index: {}]   ;;  %s6138_s19 = inlined_call_operand.vmem [shape: bf16[64,128], index: 19, kind: input, shape index: {}]   ;;  %s6139_s20 = inlined_call_operand.vmem [shape: f32[1,128], index: 20, kind: input, shape index: {}]   ;;  %s6140_s21 = inlined_call_operand.vmem [shape: bf16[128,64], index: 21, kind: input, shape index: {}]   ;;  %s6141_s22 = inlined_call_operand.vmem [shape: f32[1,64], index: 22, kind: input, shape index: {}]   ;;  %s6142_s23 = inlined_call_operand.hbm [shape: f32[2,40,64], index: 23, kind: output, shape index: {0}]   ;;  %s6143_s24 = inlined_call_operand.vmem [shape: f32[2,40,64], index: 24, kind: output, shape index: {1}]  }
   0x1   :  { %6165 = sst [smem:[#allocation22_spill]] %s6119_s0 }
   0x2   :  { %6166 = sst [smem:[#allocation23_spill]] %s6120_s1 }
   0x3   :  { %6167 = sst [smem:[#allocation24_spill]] %s6121_s2 }
   0x4   :  { %6168 = sst [smem:[#allocation25_spill]] %s6122_s3 }
   0x5   :  { %6169 = sst [smem:[#allocation26_spill]] %s6123_s4 }
   0x6   :  { %6170 = sst [smem:[#allocation27_spill]] %s6124_s5 }
   0x7   :  { %6171 = sst [smem:[#allocation28_spill]] %s6125_s6 }
   0x8   :  { %6172 = sst [smem:[#allocation29_spill]] %s6126_s7 }
   0x9   :  { %6173 = sst [smem:[#allocation30_spill]] %s6127_s8 }
   0xa   :  { %6174 = sst [smem:[#allocation31_spill]] %s6128_s9 }
   0xb   :  { %6175 = sst [smem:[#allocation32_spill]] %s6131_s12 }
   0xc   :  { %6176 = sst [smem:[#allocation33_spill]] %s6132_s13 }
   0xd   :  { %6177 = sst [smem:[#allocation34_spill]] %s6137_s18 }
   0xe   :  { %6178 = sst [smem:[#allocation35_spill]] %s6138_s19 }
   0xf   :  { %6179 = sst [smem:[#allocation36_spill]] %s6139_s20 }
  0x10   :  { %6180 = sst [smem:[#allocation37_spill]] %s6140_s21 }
  0x11   :  { %6181 = sst [smem:[#allocation38_spill]] %s6141_s22 }
  0x12   :  { %6182 = sst [smem:[#allocation39_spill]] %s6142_s23 }
  0x13   :  { %6183 = sst [smem:[#allocation40_spill]] %s6143_s24 }
  0x14   :  { %30 = vsyncpa [#allocation4], 0 }
  0x15   :  { %32 = vsyncpa [#allocation4 + $0x1], 0  ;;  %s5146_s5 = smov 0   ;;  %s5148_s26 = smov 0  }
  0x16   :  { %s5150_s27 = smov 0   ;;  %s5152_s28 = smov 0  }
  0x17   :  { %s5154_s6 = smov 0   ;;  %s5156_s2 = smov 0  }
  0x18   :  { %s5158_s29 = smov 0   ;;  %s5160_s0 = smov 0  }
  0x19 LB: > { %6184 = sst [smem:[#allocation6_spill]] %s4976_s5  ;;  %s3982_s7 = sadd.s32 4294967295, %s5004_s0   ;;  %s5004_s0 = sphi %s5160_s0, %s38_s0   ;;  %s5000_s29 = sphi %s5158_s29, %s6245_s29   ;;  %s4996_s2 = sphi %s5156_s2, %s6244_s2   ;;  %s4992_s6 = sphi %s5154_s6, %s6243_s6   ;;  %s4988_s28 = sphi %s5152_s28, %s6242_s28   ;;  %s4984_s27 = sphi %s5150_s27, %s6241_s27   ;;  %s4980_s26 = sphi %s5148_s26, %s6240_s26   ;;  %s4976_s5 = sphi %s5146_s5, %s6239_s5  }
  0x1a   : > { %6185 = sst [smem:[#allocation7_spill]] %s4980_s26  ;;  %s3983_s30 = sadd.s32 4294967294, %s5004_s0  }
  0x1b   : > { %6186 = sst [smem:[#allocation8_spill]] %s4984_s27  ;;  %s47_s3 = sadd.s32 1, %s4996_s2 }
  0x1c   : > { %6187 = sst [smem:[#allocation9_spill]] %s4992_s6  ;;  %p48_p0 = scmp.ge.s32.totalorder %s47_s3, 2 }
  0x1d   : > { %6188 = sst [smem:[#allocation10_spill]] %s4996_s2  ;;  %s50_s25 = sadd.s32 1, %s5000_s29 }
  0x1e   : > { %6189 = sst [smem:[#allocation11_spill]] %s5000_s29  ;;  %p625_p1 = scmp.ne.s32.totalorder %s4984_s27, %s4980_s26 }
  0x1f   : > { %6190 = sst [smem:[#allocation12_spill]] %s5004_s0  ;;  %p626_p2 = scmp.eq.s32.totalorder %s3982_s7, 3 }
  0x20   : > { %s6247_s3 = smov (%p48_p0, %s47_s3), 0  ;;  %s6249_s25 = smov (!%p48_p0, %s50_s25), %s5000_s29 }
  0x21   : > { %6191 = sst [smem:[#allocation13_spill]] %s6247_s3  ;;  %p5195_p3 = por %p626_p2, %p625_p1 }
  0x22   : > { %p631_p4 = scmp.ne.s32.totalorder %s4980_s26, %s4976_s5  ;;  %p52_p5 = scmp.ge.s32.totalorder %s6249_s25, 2 }
  0x23   : > { %s6192_s8 = scalar_select %p5195_p3, 1, 0 }
  0x24   : > { %p632_p6 = scmp.eq.s32.totalorder %s3983_s30, 3  ;;  %p3986_p7 = scmp.ge.s32.totalorder %s5004_s0, 1 }
  0x25   : > { %6193 = sst [smem:[#allocation14_spill]] %s6192_s8  ;;  %p803_p8 = scmp.lt.s32.totalorder %s5004_s0, 5 }
  0x26   : > { %s6251_s25 = smov (%p52_p5, %s6249_s25), 0  ;;  %p5205_p9 = por %p632_p6, %p631_p4 }
  0x27   : > { %6194 = sst [smem:[#allocation15_spill]] %s6251_s25  ;;  %p804_p10 = pnand %p3986_p7, %p803_p8 }
  0x28   : > { %s6195_s4 = scalar_select %p5205_p9, 1, 0 }
  0x29   : > { %s612_s1 = ssub.s32 %s5000_s29, %s6251_s25  ;;  %s615_s7 = sadd.s32 1, %s4984_s27 }
  0x2a   : > { %6196 = sst [smem:[#allocation16_spill]] %s6195_s4  ;;  %p613_p11 = scmp.eq.s32.totalorder %s612_s1, 0 }
  0x2b   : > { %807 = sbr.rel (%p804_p10) target bundleno = 5090 (0x13e2), region = 112 }
  0x2c   : > { %s5213_s3 = scalar_select %p613_p11, %s4984_s27, %s615_s7  }
  0x2e   : > { %6197 = sst [smem:[#allocation17_spill]] %s5213_s3 }
  0x32   : > { %s6157_s30 = sand.u32 1, %s4980_s26   ;;  %p927_p12 = scmp.lt.s32.totalorder %s4992_s6, 1 }
  0x33   : > { %s4604_s2 = smul.u32 40, %s6157_s30  ;;  %p940_p13 = scmp.lt.s32.totalorder %s4988_s28, 1 }
  0x34   : > { %s5220_s5 = scalar_select %p927_p12, %s4992_s6, 1 }
  0x35   : > { %s6200_s23 = sld [smem:[#allocation22_spill]]  ;;  %s6202_s30 = sld [smem:[#allocation23_spill]] }
  0x36   : > { %6198 = sst [smem:[#allocation18_spill]] %s5220_s5  ;;  %s4605_s1 = smul.u32 160, %s5220_s5 }
  0x37   : > { %s4606_s27 = smul.u32 40, %s5220_s5  ;;  %s6204_s24 = sld [smem:[#allocation40_spill]] }
  0x38   : > { %s5245_s18 = scalar_select %p940_p13, %s4988_s28, 1 }
  0x39   : > { %s6206_s0 = sld [smem:[#allocation29_spill]]  ;;  %s6207_s25 = sld [smem:[#allocation30_spill]] }
  0x3a   : > { %s4130_s22 = sshll.u32 %s5245_s18, 6  ;;  %s6208_s9 = sld [smem:[#allocation31_spill]] }
  0x3b   : > { %s5232_s8 = scalar_lea.vmem %s6200_s23, %s4605_s1  ;;  %s5237_s6 = scalar_lea.vmem %s6202_s30, %s4606_s27 }
  0x3c   : > { %6201 = sst [smem:[#allocation19_spill]] %s5232_s8  ;;  %s3991_s23 = sshll.u32 %s5245_s18, 1 }
  0x3d   : > { %6203 = sst [smem:[#allocation20_spill]] %s5237_s6  ;;  %s5242_s19 = scalar_lea.vmem %s6204_s24, %s4606_s27 }
  0x3e   : > { %6205 = sst [smem:[#allocation21_spill]] %s5242_s19  ;;  %s4131_s30 = sshll.u32 %s5245_s18, 5 }
  0x3f   : > { %s5252_s20 = scalar_lea.vmem %s6206_s0, %s4130_s22  ;;  %s5257_s4 = scalar_lea.vmem %s6207_s25, %s3991_s23 }
  0x40   : > { %s5267_s5 = scalar_lea.vmem %s6208_s9, %s4131_s30  ;;  %s6210_s13 = sld [smem:[#allocation33_spill]] }
  0x41   : > { %s970_s3 = scalar_lea.vmem %s6133_s14, %s5245_s18  ;;  %s5289_s9 = scalar_lea.vmem %s6134_s15, %s4130_s22 }
  0x42   : > { %s978_s26 = scalar_lea.vmem %s6135_s16, %s5245_s18  ;;  %s981_s21 = scalar_lea.vmem %s6136_s17, %s5245_s18 }
  0x43   : > { %s6211_s27 = sld [smem:[#allocation34_spill]]  ;;  %s5303_s12 = scalar_lea.vmem [#allocation3], %s4604_s2 }
  0x44   : > { %p3999_p0 = scmp.ne.s32.totalorder %s4988_s28, 0 }
  0x45   : > { %s6212_s7 = sld [smem:[#allocation25_spill]] (!%p3999_p0)  ;;  %s6213_s19 = sld [smem:[#allocation19_spill]] (!%p3999_p0)  ;;  %vm1459_vm0 = vcmask (!%p3999_p0), 523264  }
  0x46   : > { %s5280_s25 = scalar_lea.vmem %s6210_s13, %s4131_s30  ;;  %994 = sbr.rel (%p3999_p0) target bundleno = 687 (0x2af), region = 116 }
  0x47   : > { %s6214_s0 = sld [smem:[#allocation26_spill]] (!%p3999_p0)  ;;  %s6217_s24 = sld [smem:[#allocation28_spill]] (!%p3999_p0) }
  0x49   : > { %s984_s13 = scalar_lea.vmem %s6211_s27, %s5245_s18  ;;  %s6216_s27 = sld [smem:[#allocation27_spill]] (!%p3999_p0) }
  0x4b   : > { %v4693_v0 = vld [vmem:[%s6212_s7 + $0x40] sm:$0xff] (!%p3999_p0)   ;;  %v4697_v4 = vld [vmem:[%s6212_s7 + $0x48] sm:$0xff] (!%p3999_p0)   ;;  %v4701_v8 = vld [vmem:[%s6212_s7 + $0x50] sm:$0xff] (!%p3999_p0)  }
  0x4c   : > { %v4694_v1 = vld [vmem:[%s6212_s7 + $0xc0] sm:$0xff] (!%p3999_p0)   ;;  %4134 = vmatprep.subr.bf16.mxu0 (!%p3999_p0), %v4693_v0  ;;  %v4698_v5 = vld [vmem:[%s6212_s7 + $0xc8] sm:$0xff] (!%p3999_p0)   ;;  %v4702_v9 = vld [vmem:[%s6212_s7 + $0xd0] sm:$0xff] (!%p3999_p0)  }
  0x4d   : > { %v4695_v2 = vld [vmem:[%s6212_s7] sm:$0xff]   ;;  %4168 = vmatprep.subr.bf16.mxu1 %v4694_v1  ;;  %v4699_v6 = vld [vmem:[%s6212_s7 + $0x8] sm:$0xff]   ;;  %v4703_v10 = vld [vmem:[%s6212_s7 + $0x10] sm:$0xff]  }
  0x4e   : > { %v4696_v3 = vld [vmem:[%s6212_s7 + $0x80] sm:$0xff]   ;;  %4135 = vmatpush3.bf16.msra.mxu0 %v4695_v2  ;;  %v4700_v7 = vld [vmem:[%s6212_s7 + $0x88] sm:$0xff]   ;;  %v4704_v11 = vld [vmem:[%s6212_s7 + $0x90] sm:$0xff]  }
  0x4f   : > { %4169 = vmatpush3.bf16.msra.mxu1 %v4696_v3  ;;  %4136 = vmatprep.subr.bf16.mxu0 %v4697_v4  ;;  %v4705_v12 = vld [vmem:[%s6212_s7 + $0x58] sm:$0xff]   ;;  %v4709_v16 = vld [vmem:[%s6212_s7 + $0x60] sm:$0xff]   ;;  %v4713_v20 = vld [vmem:[%s6212_s7 + $0x68] sm:$0xff]  }
  0x50   : > { %4170 = vmatprep.subr.bf16.mxu1 %v4698_v5  ;;  %v4706_v13 = vld [vmem:[%s6212_s7 + $0xd8] sm:$0xff]   ;;  %v4710_v17 = vld [vmem:[%s6212_s7 + $0xe0] sm:$0xff]   ;;  %v4714_v21 = vld [vmem:[%s6212_s7 + $0xe8] sm:$0xff]  }
  0x51   : > { %v4707_v14 = vld [vmem:[%s6212_s7 + $0x18] sm:$0xff]   ;;  %v4711_v18 = vld [vmem:[%s6212_s7 + $0x20] sm:$0xff]   ;;  %v4715_v22 = vld [vmem:[%s6212_s7 + $0x28] sm:$0xff]  }
  0x52   : > { %4137 = vmatpush3.bf16.msra.mxu0 %v4699_v6  ;;  %v4708_v15 = vld [vmem:[%s6212_s7 + $0x98] sm:$0xff]   ;;  %v4712_v19 = vld [vmem:[%s6212_s7 + $0xa0] sm:$0xff]   ;;  %v4716_v23 = vld [vmem:[%s6212_s7 + $0xa8] sm:$0xff]  }
  0x53   : > { %4171 = vmatpush3.bf16.msra.mxu1 %v4700_v7  ;;  %4138 = vmatprep.subr.bf16.mxu0 %v4701_v8  ;;  %v4717_v24 = vld [vmem:[%s6212_s7 + $0x70] sm:$0xff]   ;;  %v4721_v28 = vld [vmem:[%s6212_s7 + $0x78] sm:$0xff]   ;;  %v996_v32 = vld [vmem:[%s6213_s19 + $0x8] sm:$0xff] }
  0x54   : > { %4172 = vmatprep.subr.bf16.mxu1 %v4702_v9  ;;  %v4718_v25 = vld [vmem:[%s6212_s7 + $0xf0] sm:$0xff]   ;;  %v4722_v29 = vld [vmem:[%s6212_s7 + $0xf8] sm:$0xff]   ;;  %v1000_v33 = vld [vmem:[%s6213_s19 + $0x28] sm:$0xff] }
  0x55   : > { %v4719_v26 = vld [vmem:[%s6212_s7 + $0x30] sm:$0xff]   ;;  %v4723_v30 = vld [vmem:[%s6212_s7 + $0x38] sm:$0xff]   ;;  %v1080_v35 = vpack.c.bf16 %v1000_v33, %v996_v32  ;;  %v995_v37 = vld [vmem:[%s6213_s19] sm:$0xff] }
  0x56   : > { %4139 = vmatpush3.bf16.msra.mxu0 %v4703_v10  ;;  %v4720_v27 = vld [vmem:[%s6212_s7 + $0xb0] sm:$0xff]   ;;  %v4724_v31 = vld [vmem:[%s6212_s7 + $0xb8] sm:$0xff]   ;;  %v999_v38 = vld [vmem:[%s6213_s19 + $0x20] sm:$0xff] }
  0x57   : > { %4173 = vmatpush3.bf16.msra.mxu1 %v4704_v11  ;;  %4140 = vmatprep.subr.bf16.mxu0 %v4705_v12  ;;  %v998_v34 = vld [vmem:[%s6213_s19 + $0x18] sm:$0xff]  ;;  %v1079_v40 = vpack.c.bf16 %v999_v38, %v995_v37  ;;  %v997_v41 = vld [vmem:[%s6213_s19 + $0x10] sm:$0xff]  ;;  %v1004_v43 = vld [vmem:[%s6213_s19 + $0x48] sm:$0xff] }
  0x58   : > { %4174 = vmatprep.subr.bf16.mxu1 %v4706_v13  ;;  %v1002_v36 = vld [vmem:[%s6213_s19 + $0x38] sm:$0xff]  ;;  %v1001_v42 = vld [vmem:[%s6213_s19 + $0x30] sm:$0xff]  ;;  %1322 = vmatprep.mubr.bf16.mxu0 %v1080_v35  ;;  %v1008_v45 = vld [vmem:[%s6213_s19 + $0x68] sm:$0xff] }
  0x59   : > { %v1082_v39 = vpack.c.bf16 %v1002_v36, %v998_v34  ;;  %v1081_v44 = vpack.c.bf16 %v1001_v42, %v997_v41  ;;  %v1006_v46 = vld [vmem:[%s6213_s19 + $0x58] sm:$0xff]  ;;  %v1084_v48 = vpack.c.bf16 %v1008_v45, %v1004_v43  ;;  %v1003_v50 = vld [vmem:[%s6213_s19 + $0x40] sm:$0xff]  ;;  %v1005_v52 = vld [vmem:[%s6213_s19 + $0x50] sm:$0xff] }
  0x5a   : > { %4141 = vmatpush3.bf16.msra.mxu0 %v4707_v14  ;;  %v1010_v47 = vld [vmem:[%s6213_s19 + $0x78] sm:$0xff]  ;;  %v1007_v51 = vld [vmem:[%s6213_s19 + $0x60] sm:$0xff]  ;;  %v1009_v53 = vld [vmem:[%s6213_s19 + $0x70] sm:$0xff] }
  0x5b   : > { %4175 = vmatpush3.bf16.msra.mxu1 %v4708_v15  ;;  %4142 = vmatprep.subr.bf16.mxu0 %v4709_v16  ;;  %v1086_v49 = vpack.c.bf16 %v1010_v47, %v1006_v46  ;;  %v1012_v54 = vld [vmem:[%s6213_s19 + $0x88] sm:$0xff]  ;;  %v1014_v55 = vld [vmem:[%s6213_s19 + $0x98] sm:$0xff]  ;;  %v1083_v56 = vpack.c.bf16 %v1007_v51, %v1003_v50  ;;  %v1085_v57 = vpack.c.bf16 %v1009_v53, %v1005_v52  ;;  %v1011_v60 = vld [vmem:[%s6213_s19 + $0x80] sm:$0xff] }
  0x5c   : > { %4176 = vmatprep.subr.bf16.mxu1 %v4710_v17  ;;  %1378 = vmatprep.mubr.bf16.mxu1 %v1082_v39  ;;  %v1088_v58 = vpack.c.bf16 %v1012_v54, %v1012_v54  ;;  %v1090_v59 = vpack.c.bf16 %v1014_v55, %v1014_v55  ;;  %v1013_v61 = vld [vmem:[%s6213_s19 + $0x90] sm:$0xff]  ;;  %v1087_v62 = vpack.c.bf16 %v1011_v60, %v1011_v60  ;;  %v4000_v2 = vld [vmem:[%s6214_s0] ss:$0 sm:$0xff]  ;;  %s6215_s19 = sld [smem:[#allocation20_spill]] }
  0x5d   : > { %v1089_v63 = vpack.c.bf16 %v1013_v61, %v1013_v61 }
  0x5e   : > { %4143 = vmatpush3.bf16.msra.mxu0 %v4711_v18 }
  0x5f   : > { %4177 = vmatpush3.bf16.msra.mxu1 %v4712_v19  ;;  %4144 = vmatprep.subr.bf16.mxu0 %v4713_v20 }
  0x60   : > { %4178 = vmatprep.subr.bf16.mxu1 %v4714_v21 }
  0x62   : > { %4145 = vmatpush3.bf16.msra.mxu0 %v4715_v22 }
  0x63   : > { %4179 = vmatpush3.bf16.msra.mxu1 %v4716_v23  ;;  %4146 = vmatprep.subr.bf16.mxu0 %v4717_v24 }
  0x64   : > { %4180 = vmatprep.subr.bf16.mxu1 %v4718_v25 }
  0x66   : > { %4147 = vmatpush3.bf16.msra.mxu0 %v4719_v26 }
  0x67   : > { %4181 = vmatpush3.bf16.msra.mxu1 %v4720_v27  ;;  %4148 = vmatprep.subr.bf16.mxu0 %v4721_v28 }
  0x68   : > { %4182 = vmatprep.subr.bf16.mxu1 %v4722_v29 }
  0x6a   : > { %4149 = vmatpush3.bf16.msra.mxu0 %v4723_v30 }
  0x6b   : > { %4183 = vmatpush3.bf16.msra.mxu1 %v4724_v31 }
  0x6d   : > { %1323 = vmatmul.mubr.bf16.vlgmr.msra.gmra.mrb[0].mxu0 %v1079_v40 }
  0x6e   : > { %1379 = vmatmul.mubr.bf16.vlgmr.msra.gmra.mrb[0].mxu1 %v1081_v44  ;;  %1330 = vmatprep.mubr.bf16.mxu0 %v1084_v48 }
  0x6f   : > { %1386 = vmatprep.mubr.bf16.mxu1 %v1086_v49 }
  0x75   : > { %1331 = vmatmul.mubr.bf16.gmra.mrb[4].mxu0 %v1083_v56 }
  0x76   : > { %1387 = vmatmul.mubr.bf16.gmra.mrb[4].mxu1 %v1085_v57  ;;  %1338 = vmatprep.mubr.bf16.mxu0 %v1088_v58 }
  0x77   : > { %1394 = vmatprep.mubr.bf16.mxu1 %v1090_v59 }
  0x7d   : > { %1339 = vmatmul.mubr.bf16.gmra.mrb[8].mxu0 %v1087_v62 }
  0x7e   : > { %1395 = vmatmul.mubr.bf16.gmra.mrb[8].mxu1 %v1089_v63 }
 0x140   : > { %v4150_v0 = vpop.f32.mrb[0].mxu0 }
 0x141   : > { %v4184_v1 = vpop.f32.mrb[0].mxu1  ;;  %v4151_v3 = vpop.f32.mrb[1].mxu0 }
 0x142   : > { %v4152_v4 = vadd.f32 %v4151_v3, %v4150_v0  ;;  %v4185_v5 = vpop.f32.mrb[1].mxu1  ;;  %v4153_v6 = vpop.f32.mrb[2].mxu0 }
 0x143   : > { %v4186_v7 = vadd.f32 %v4185_v5, %v4184_v1  ;;  %v4187_v8 = vpop.f32.mrb[2].mxu1  ;;  %v4154_v9 = vpop.f32.mrb[3].mxu0 }
 0x144   : > { %v1325_v10 = vadd.f32 %v4152_v4, %v4000_v2  ;;  %v4155_v11 = vadd.f32 %v4154_v9, %v4153_v6  ;;  %v4188_v12 = vpop.f32.mrb[3].mxu1  ;;  %v1447_v9 = vld [vmem:[%s6215_s19] sm:$0xff] }
 0x145   : > { %v4189_v13 = vadd.f32 %v4188_v12, %v4187_v8 }
 0x146   : > { %v5425_v14 = vadd.f32 %v4186_v7, %v1325_v10  ;;  %v1328_v15 = vadd.f32 %v4155_v11, %v4000_v2 }
 0x148   : > { %v1402_v16 = vmul.f32 %v5425_v14, %v5425_v14  ;;  %v5429_v17 = vadd.f32 %v4189_v13, %v1328_v15  ;;  %v4156_v18 = vpop.f32.mrb[4].mxu0 }
 0x149   : > { %v4190_v19 = vpop.f32.mrb[4].mxu1  ;;  %v4157_v20 = vpop.f32.mrb[5].mxu0 }
 0x14a   : > { %v1407_v21 = vmul.f32 %v1402_v16, %v5425_v14  ;;  %v1403_v22 = vmul.f32 %v5429_v17, %v5429_v17  ;;  %v4158_v23 = vadd.f32 %v4157_v20, %v4156_v18  ;;  %v4191_v24 = vpop.f32.mrb[5].mxu1  ;;  %v4159_v25 = vpop.f32.mrb[6].mxu0  ;;  %v1448_v16 = vld [vmem:[%s6215_s19 + $0x8] sm:$0xff] }
 0x14b   : > { %v4192_v26 = vadd.f32 %v4191_v24, %v4190_v19  ;;  %v4193_v27 = vpop.f32.mrb[6].mxu1  ;;  %v4160_v28 = vpop.f32.mrb[7].mxu0 }
 0x14c   : > { %v1412_v29 = vmul.f32 0.044715, %v1407_v21  ;;  %v1408_v30 = vmul.f32 %v1403_v22, %v5429_v17  ;;  %v1333_v31 = vadd.f32 %v4158_v23, %v4000_v2  ;;  %v4161_v32 = vadd.f32 %v4160_v28, %v4159_v25  ;;  %v4194_v33 = vpop.f32.mrb[7].mxu1 }
 0x14d   : > { %v4195_v34 = vadd.f32 %v4194_v33, %v4193_v27 }
 0x14e   : > { %v1413_v35 = vmul.f32 0.044715, %v1408_v30  ;;  %v1389_v36 = vadd.f32 %v4192_v26, %v1333_v31  ;;  %v1336_v37 = vadd.f32 %v4161_v32, %v4000_v2  ;;  %v1417_v38 = vadd.f32 %v1412_v29, %v5425_v14  ;;  %v1449_v26 = vld [vmem:[%s6215_s19 + $0x10] sm:$0xff]  ;;  %v1450_v29 = vld [vmem:[%s6215_s19 + $0x18] sm:$0xff] }
 0x150   : > { %v1418_v39 = vadd.f32 %v1413_v35, %v5429_v17  ;;  %v1404_v40 = vmul.f32 %v1389_v36, %v1389_v36  ;;  %v1392_v41 = vadd.f32 %v4195_v34, %v1336_v37  ;;  %v4162_v42 = vpop.f32.mrb[8].mxu0  ;;  %v1422_v43 = vmul.f32 0.7978846, %v1417_v38  ;;  %v1451_v37 = vld [vmem:[%s6215_s19 + $0x20] sm:$0xff] }
 0x151   : > { %v4196_v44 = vpop.f32.mrb[8].mxu1  ;;  %v4163_v45 = vpop.f32.mrb[9].mxu0 }
 0x152   : > { %v1409_v46 = vmul.f32 %v1404_v40, %v1389_v36  ;;  %v1405_v47 = vmul.f32 %v1392_v41, %v1392_v41  ;;  %v4164_v48 = vadd.f32 %v4163_v45, %v4162_v42  ;;  %v4197_v49 = vpop.f32.mrb[9].mxu1  ;;  %v4165_v50 = vpop.f32.mrb[10].mxu0  ;;  %4725 = vtanh.f32 %v1422_v43 }
 0x153   : > { %v4198_v51 = vadd.f32 %v4197_v49, %v4196_v44  ;;  %v4199_v52 = vpop.f32.mrb[10].mxu1  ;;  %v4166_v53 = vpop.f32.mrb[11].mxu0  ;;  %v1423_v54 = vmul.f32 0.7978846, %v1418_v39 }
 0x154   : > { %v1414_v55 = vmul.f32 0.044715, %v1409_v46  ;;  %v1410_v56 = vmul.f32 %v1405_v47, %v1392_v41  ;;  %v1341_v57 = vadd.f32 %v4164_v48, %v4000_v2  ;;  %v4200_v58 = vpop.f32.mrb[11].mxu1 }
 0x155   : > { %4727 = vtanh.f32 %v1423_v54 }
 0x156   : > { %v1415_v59 = vmul.f32 0.044715, %v1410_v56  ;;  %v1397_v60 = vadd.f32 %v4198_v51, %v1341_v57  ;;  %v1419_v61 = vadd.f32 %v1414_v55, %v1389_v36 }
 0x158   : > { %v1420_v62 = vadd.f32 %v1415_v59, %v1392_v41  ;;  %v1406_v63 = vmul.f32 %v1397_v60, %v1397_v60  ;;  %v1424_v0 = vmul.f32 0.7978846, %v1419_v61 }
 0x15a   : > { %v1411_v1 = vmul.f32 %v1406_v63, %v1397_v60  ;;  %4729 = vtanh.f32 %v1424_v0  ;;  %v1425_v3 = vmul.f32 0.7978846, %v1420_v62 }
 0x15c   : > { %v4726_v4 = vpop.eup %4725  ;;  %v1416_v5 = vmul.f32 0.044715, %v1411_v1  ;;  %4731 = vtanh.f32 %v1425_v3 }
 0x15d   : > { %v1432_v6 = vadd.f32 1.0, %v4726_v4 }
 0x15e   : > { %v1421_v7 = vadd.f32 %v1416_v5, %v1397_v60 }
 0x15f   : > { %v4728_v8 = vpop.eup %4727  ;;  %v1437_v2 = vmul.f32 0.5, %v1432_v6 }
 0x160   : > { %v1433_v10 = vadd.f32 1.0, %v4728_v8  ;;  %v1426_v11 = vmul.f32 0.7978846, %v1421_v7 }
 0x161   : > { %v1442_v12 = vmul.f32 %v1437_v2, %v5425_v14 }
 0x162   : > { %v1438_v13 = vmul.f32 0.5, %v1433_v10  ;;  %4733 = vtanh.f32 %v1426_v11 }
 0x163   : > { %v1452_v15 = vadd.f32 %v1447_v9, %v1442_v12 }
 0x164   : > { %v4730_v18 = vpop.eup %4729  ;;  %v1443_v19 = vmul.f32 %v1438_v13, %v5429_v17 }
 0x165   : > { %v1460_v20 = vsel %vm1459_vm0, %v1452_v15, 0.0  ;;  %v1434_v21 = vadd.f32 1.0, %v4730_v18 }
 0x166   : > { %v4732_v22 = vpop.eup %4731  ;;  %1461 = vadd.xlane.f32.xlu0 %v1460_v20  ;;  %v1453_v23 = vadd.f32 %v1448_v16, %v1443_v19  ;;  %v4034_v20 = vld [vmem:[%s6217_s24] ss:$0 sm:$0xff] }
 0x167   : > { %v1439_v24 = vmul.f32 0.5, %v1434_v21  ;;  %v1435_v25 = vadd.f32 1.0, %v4732_v22 }
 0x168   : > { %v1463_v14 = vsel %vm1459_vm0, %v1453_v23, 0.0 }
 0x169   : > { %v1444_v27 = vmul.f32 %v1439_v24, %v1389_v36  ;;  %v1440_v28 = vmul.f32 0.5, %v1435_v25 }
 0x16a   : > { %1464 = vadd.xlane.f32.xlu0 %v1463_v14 }
 0x16b   : > { %v1454_v30 = vadd.f32 %v1449_v26, %v1444_v27  ;;  %v1445_v31 = vmul.f32 %v1440_v28, %v1392_v41 }
 0x16c   : > { %v4734_v32 = vpop.eup %4733 }
 0x16d   : > { %v1466_v17 = vsel %vm1459_vm0, %v1454_v30, 0.0  ;;  %v1455_v33 = vadd.f32 %v1450_v29, %v1445_v31  ;;  %v1436_v34 = vadd.f32 1.0, %v4734_v32 }
 0x16e   : > { %1467 = vadd.xlane.f32.xlu1 %v1466_v17 }
 0x16f   : > { %v1441_v35 = vmul.f32 0.5, %v1436_v34  ;;  %v1469_v38 = vsel %vm1459_vm0, %v1455_v33, 0.0 }
 0x171   : > { %v1446_v39 = vmul.f32 %v1441_v35, %v1397_v60 }
 0x172   : > { %1470 = vadd.xlane.f32.xlu1 %v1469_v38 }
 0x173   : > { %v1456_v40 = vadd.f32 %v1451_v37, %v1446_v39 }
 0x175   : > { %v1472_v36 = vsel %vm1459_vm0, %v1456_v40, 0.0 }
 0x176   : > { %1473 = vadd.xlane.f32.xlu0 %v1472_v36 }
 0x1f3   : > { %v1462_v42 = vpop.xlane.xlu0 %1461 }
 0x1f4   : > { %v1476_v43 = vmul.f32 0.015625, %v1462_v42 }
 0x1f6   : > { %v1481_v44 = vsub.f32 %v1452_v15, %v1476_v43  ;;  %v4033_v15 = vld [vmem:[%s6216_s27] ss:$0 sm:$0xff] }
 0x1f7   : > { %v1465_v41 = vpop.xlane.xlu0 %1464 }
 0x1f8   : > { %v1477_v45 = vmul.f32 0.015625, %v1465_v41  ;;  %v1486_v46 = vmul.f32 %v1481_v44, %v1481_v44 }
 0x1fa   : > { %v1482_v47 = vsub.f32 %v1453_v23, %v1477_v45  ;;  %v1491_v48 = vsel %vm1459_vm0, %v1486_v46, 0.0 }
 0x1fb   : > { %v1468_v49 = vpop.xlane.xlu1 %1467  ;;  %1492 = vadd.xlane.f32.xlu1 %v1491_v48 }
 0x1fc   : > { %v1478_v50 = vmul.f32 0.015625, %v1468_v49  ;;  %v1487_v51 = vmul.f32 %v1482_v47, %v1482_v47 }
 0x1fe   : > { %v1483_v52 = vsub.f32 %v1454_v30, %v1478_v50  ;;  %v1494_v53 = vsel %vm1459_vm0, %v1487_v51, 0.0 }
 0x1ff   : > { %v1471_v54 = vpop.xlane.xlu1 %1470  ;;  %1495 = vadd.xlane.f32.xlu0 %v1494_v53 }
 0x200   : > { %v1479_v55 = vmul.f32 0.015625, %v1471_v54  ;;  %v1488_v56 = vmul.f32 %v1483_v52, %v1483_v52 }
 0x202   : > { %v1484_v57 = vsub.f32 %v1455_v33, %v1479_v55  ;;  %v1497_v58 = vsel %vm1459_vm0, %v1488_v56, 0.0 }
 0x203   : > { %1498 = vadd.xlane.f32.xlu1 %v1497_v58  ;;  %v1474_v59 = vpop.xlane.xlu0 %1473 }
 0x204   : > { %v1480_v60 = vmul.f32 0.015625, %v1474_v59  ;;  %v1489_v61 = vmul.f32 %v1484_v57, %v1484_v57 }
 0x206   : > { %v1485_v62 = vsub.f32 %v1456_v40, %v1480_v60  ;;  %v1500_v63 = vsel %vm1459_vm0, %v1489_v61, 0.0 }
 0x207   : > { %1501 = vadd.xlane.f32.xlu0 %v1500_v63 }
 0x208   : > { %v1490_v0 = vmul.f32 %v1485_v62, %v1485_v62 }
 0x20a   : > { %v1503_v1 = vsel %vm1459_vm0, %v1490_v0, 0.0 }
 0x20b   : > { %1504 = vadd.xlane.f32.xlu1 %v1503_v1 }
 0x288   : > { %v1493_v3 = vpop.xlane.xlu1 %1492 }
 0x289   : > { %v1506_v4 = vmul.f32 0.015625, %v1493_v3 }
 0x28b   : > { %v1511_v5 = vadd.f32 1e-05, %v1506_v4 }
 0x28c   : > { %v1496_v6 = vpop.xlane.xlu0 %1495 }
 0x28d   : > { %4735 = vrsqrt.f32 %v1511_v5  ;;  %v1507_v7 = vmul.f32 0.015625, %v1496_v6 }
 0x28f   : > { %v1512_v8 = vadd.f32 1e-05, %v1507_v7 }
 0x290   : > { %v1499_v2 = vpop.xlane.xlu1 %1498 }
 0x291   : > { %4737 = vrsqrt.f32 %v1512_v8  ;;  %v1508_v9 = vmul.f32 0.015625, %v1499_v2 }
 0x293   : > { %v1513_v10 = vadd.f32 1e-05, %v1508_v9 }
 0x294   : > { %v1502_v11 = vpop.xlane.xlu0 %1501 }
 0x295   : > { %4739 = vrsqrt.f32 %v1513_v10  ;;  %v1509_v12 = vmul.f32 0.015625, %v1502_v11 }
 0x297   : > { %v4736_v13 = vpop.eup %4735  ;;  %v1514_v16 = vadd.f32 1e-05, %v1509_v12 }
 0x298   : > { %v1521_v18 = vmul.f32 %v4736_v13, %v1481_v44  ;;  %v1505_v19 = vpop.xlane.xlu1 %1504 }
 0x299   : > { %4741 = vrsqrt.f32 %v1514_v16  ;;  %v1510_v21 = vmul.f32 0.015625, %v1505_v19 }
 0x29a   : > { %v1532_v22 = vmul.f32 %v4033_v15, %v1521_v18 }
 0x29b   : > { %v4738_v23 = vpop.eup %4737  ;;  %v1515_v24 = vadd.f32 1e-05, %v1510_v21 }
 0x29c   : > { %v1543_v25 = vadd.f32 %v4034_v20, %v1532_v22  ;;  %v1522_v26 = vmul.f32 %v4738_v23, %v1482_v47 }
 0x29d   : > { %4743 = vrsqrt.f32 %v1515_v24 }
 0x29e   : > { %1548 = vst.msk [vmem:[#allocation2] sm:$0xff] %vm1459_vm0, %v1543_v25  ;;  %v1533_v14 = vmul.f32 %v4033_v15, %v1522_v26 }
 0x29f   : > { %v4740_v27 = vpop.eup %4739 }
 0x2a0   : > { %v1544_v28 = vadd.f32 %v4034_v20, %v1533_v14  ;;  %v1523_v29 = vmul.f32 %v4740_v27, %v1483_v52 }
 0x2a2   : > { %1549 = vst.msk [vmem:[#allocation2 + $0x8] sm:$0xff] %vm1459_vm0, %v1544_v28  ;;  %v1534_v30 = vmul.f32 %v4033_v15, %v1523_v29 }
 0x2a3   : > { %v4742_v31 = vpop.eup %4741 }
 0x2a4   : > { %v1545_v32 = vadd.f32 %v4034_v20, %v1534_v30  ;;  %v1524_v17 = vmul.f32 %v4742_v31, %v1484_v57 }
 0x2a6   : > { %1550 = vst.msk [vmem:[#allocation2 + $0x10] sm:$0xff] %vm1459_vm0, %v1545_v32  ;;  %v1535_v33 = vmul.f32 %v4033_v15, %v1524_v17 }
 0x2a7   : > { %v4744_v34 = vpop.eup %4743 }
 0x2a8   : > { %v1546_v35 = vadd.f32 %v4034_v20, %v1535_v33  ;;  %v1525_v37 = vmul.f32 %v4744_v34, %v1485_v62 }
 0x2aa   : > { %1551 = vst.msk [vmem:[#allocation2 + $0x18] sm:$0xff] %vm1459_vm0, %v1546_v35  ;;  %v1536_v38 = vmul.f32 %v4033_v15, %v1525_v37 }
 0x2ac   : > { %v1547_v39 = vadd.f32 %v4034_v20, %v1536_v38 }
 0x2ae   : > { %1552 = vst.msk [vmem:[#allocation2 + $0x20] sm:$0xff] %vm1459_vm0, %v1547_v39 }
 0x2af PF: > { %v4745_v40 = vld [vmem:[%s5252_s20 + $0x4] ss:$8 sps:$4 sm:$0xff]   ;;  %v4747_v36 = vld [vmem:[%s5252_s20] ss:$8 sps:$4 sm:$0xff]   ;;  %v5006_v42 = vmov 0   ;;  %vm1621_vm1 = vcmask 523264   ;;  %v1571_v57 = vlaneseq  ;;  %s6221_s24 = scalar_lea.vmem %s6129_s10, %s5245_s18 }
 0x2b0   : > { %1663 = vmatprep.mubr.bf16.mxu1 %v5006_v42  ;;  %1631 = vmatprep.subr.bf16.mxu1 %v4745_v40  ;;  %v4748_v43 = vld [vmem:[%s5252_s20 + $0x14] ss:$8 sps:$4 sm:$0xff]   ;;  %v4750_v44 = vld [vmem:[%s5252_s20 + $0x10] ss:$8 sps:$4 sm:$0xff]   ;;  %v4751_v41 = vld [vmem:[%s5252_s20 + $0x24] ss:$8 sps:$4 sm:$0xff]  }
 0x2b1   : > { %1632 = vmatpush1.bf16.msra.mxu1 %v4747_v36  ;;  %v4753_v45 = vld [vmem:[%s5252_s20 + $0x20] ss:$8 sps:$4 sm:$0xff]   ;;  %v4754_v46 = vld [vmem:[%s5252_s20 + $0x34] ss:$8 sps:$4 sm:$0xff]   ;;  %v4756_v47 = vld [vmem:[%s5252_s20 + $0x30] ss:$8 sps:$4 sm:$0xff]  }
 0x2b2   : > { %1633 = vmatprep.subr.bf16.mxu1 %v4748_v43  ;;  %v1553_v48 = vld [vmem:[#allocation2] sm:$0xff]  ;;  %v1554_v49 = vld [vmem:[#allocation2 + $0x8] sm:$0xff]  ;;  %v1555_v51 = vld [vmem:[#allocation2 + $0x10] sm:$0xff]  ;;  %v5007_v56 = vmov 0.0   ;;  %v1572_v58 = vshrl.u32 %v1571_v57, 7  ;;  %s5008_s20 = smov 64  }
 0x2b3   : > { %v1566_v50 = vpack.c.bf16 %v1554_v49, %v1553_v48  ;;  %v1556_v52 = vld [vmem:[#allocation2 + $0x18] sm:$0xff]  ;;  %4320 = vmatprep.subr.bf16.mxu0 %v5007_v56  ;;  %v1569_v60 = vld [vmem:[%s5257_s4] sm:$0x3]  ;;  %vm5009_vm2 = vmmov 0   ;;  %s5010_s4 = smov 48   ;;  %vm1875_vm3 = vcmask 1043456  }
 0x2b4   : > { %v1567_v53 = vpack.c.bf16 %v1556_v52, %v1555_v51  ;;  %v1573_v59 = vsub.s32 0, %v1572_v58  ;;  %v1577_v61 = vsub.s32 1, %v1572_v58  ;;  %4326 = vmatprep.mubr.msk.bf16.mxu0 %vm5009_vm2, %v5007_v56  ;;  %s5011_s6 = smov 112   ;;  %vm1713_vm4 = vcmask 130048   ;;  %s6218_s8 = sld [smem:[#allocation18_spill]] }
 0x2b5   : > { %1634 = vmatpush1.bf16.msra.mxu1 %v4750_v44  ;;  %v1557_v54 = vld [vmem:[#allocation2 + $0x20] sm:$0xff]  ;;  %s6219_s0 = sld [smem:[#allocation24_spill]]  ;;  %vm1804_vm5 = vcmask 326656   ;;  %s5012_s23 = smov 32  }
 0x2b6   : > { %1635 = vmatprep.subr.bf16.mxu1 %v4751_v41  ;;  %v1568_v55 = vpack.c.bf16 %v1557_v54, %v1557_v54  ;;  %v1574_v62 = vrot.slane %v1569_v60, %v1573_v59  ;;  %v1578_v0 = vrot.slane %v1569_v60, %v1577_v61  ;;  %s5013_s30 = smov 96   ;;  %s5014_s27 = smov 16  }
 0x2b7   : > { %s5015_s1 = smov 80   ;;  %s6223_s29 = sld [smem:[#allocation32_spill]] }
 0x2b8   : > { %p4109_p1 = scmp.ne.s32.totalorder %s4988_s28, 1 }
 0x2b9   : > { %1636 = vmatpush1.bf16.msra.mxu1 %v4753_v45  ;;  %vm5017_vm6 = vmmov (!%p4109_p1), 0  }
 0x2ba   : > { %1637 = vmatprep.subr.bf16.mxu1 %v4754_v46 }
 0x2bb   : > { %s6220_s19 = scalar_lea.vmem %s6219_s0, %s6218_s8  ;;  %s6227_s8 = sld [smem:[#allocation37_spill]] (!%p4109_p1) }
 0x2bc   : > { %v5555_v45 = vld [vmem:[%s6220_s19] ss:$0 sm:$0xff] }
 0x2bd   : > { %1638 = vmatpush1.bf16.msra.mxu1 %v4756_v47  ;;  %s6224_s2 = scalar_lea.vmem %s6223_s29, %s5245_s18 }
 0x2be   : > { %4302 = vmatprep.subr.bf16.mxu1 %v5007_v56 }
 0x2c0   : > { %4043 = vmatmul.mubr.msk.bf16.vlgmr.msra.gmra.mrb[0].mxu1 %vm1621_vm1, %v1566_v50 }
 0x2c1   : > { %1673 = vmatprep.mubr.bf16.mxu1 %v5006_v42 }
 0x2c8   : > { %4044 = vmatmul.mubr.msk.bf16.gmra.mrb[4].mxu1 %vm1621_vm1, %v1567_v53 }
 0x2c9   : > { %1683 = vmatprep.mubr.bf16.mxu1 %v5006_v42 }
 0x2d0   : > { %4045 = vmatmul.mubr.msk.bf16.gmra.mrb[8].mxu1 %vm1621_vm1, %v1568_v55 }
 0x2d1   : > { %4308 = vmatprep.mubr.msk.bf16.mxu1 %vm5009_vm2, %v5007_v56 }
 0x393   : > { %v1665_v63 = vpop.f32.mrb[0].mxu1 }
 0x394   : > { %v1667_v1 = vpop.f32.mrb[1].mxu1  ;;  %v1666_v4 = vadd.f32 %v1665_v63, %v1574_v62 }
 0x395   : > { %v1669_v3 = vpop.f32.mrb[2].mxu1  ;;  %v1668_v7 = vadd.f32 %v1667_v1, %v1578_v0 }
 0x396   : > { %v1670_v5 = vadd.f32 %v1669_v3, %v1574_v62  ;;  %v1671_v6 = vpop.f32.mrb[3].mxu1 }
 0x397   : > { %v1672_v8 = vadd.f32 %v1671_v6, %v1578_v0 }
 0x398   : > { %v5479_v2 = vpack.c.bf16 %v1670_v5, %v1666_v4 }
 0x399   : > { %v5481_v9 = vpack.c.bf16 %v1672_v8, %v1668_v7 }
 0x39a   : > { %1707 = vrot.lane.b32.xlu0 %v5479_v2, %s5008_s20 }
 0x39b   : > { %v1675_v10 = vpop.f32.mrb[4].mxu1  ;;  %4321 = vmatpush3.bf16.msra.mxu0 %v5481_v9 }
 0x39c   : > { %v1677_v11 = vpop.f32.mrb[5].mxu1  ;;  %4322 = vmatprep.subr.bf16.mxu0 %v5007_v56  ;;  %v1676_v13 = vadd.f32 %v1675_v10, %v1574_v62 }
 0x39d   : > { %v1679_v12 = vpop.f32.mrb[6].mxu1  ;;  %v1678_v18 = vadd.f32 %v1677_v11, %v1578_v0 }
 0x39e   : > { %v1680_v15 = vadd.f32 %v1679_v12, %v1574_v62  ;;  %v1681_v16 = vpop.f32.mrb[7].mxu1 }
 0x39f   : > { %v1682_v19 = vadd.f32 %v1681_v16, %v1578_v0 }
 0x3a0   : > { %v5487_v20 = vpack.c.bf16 %v1680_v15, %v1676_v13 }
 0x3a1   : > { %v5489_v21 = vpack.c.bf16 %v1682_v19, %v1678_v18 }
 0x3a2   : > { %1709 = vrot.lane.b32.xlu0 %v5487_v20, %s5008_s20 }
 0x3a3   : > { %v1685_v22 = vpop.f32.mrb[8].mxu1  ;;  %4323 = vmatpush3.bf16.msra.mxu0 %v5489_v21 }
 0x3a4   : > { %v1686_v23 = vadd.f32 %v1685_v22, %v1574_v62  ;;  %v1687_v24 = vpop.f32.mrb[9].mxu1  ;;  %4324 = vmatprep.subr.bf16.mxu0 %v5007_v56 }
 0x3a5   : > { %v1688_v25 = vadd.f32 %v1687_v24, %v1578_v0  ;;  %v1689_v26 = vpop.f32.mrb[10].mxu1 }
 0x3a6   : > { %v5499_v14 = vpack.c.bf16 %v1686_v23, %v1686_v23  ;;  %v1690_v27 = vpop.f32.mrb[11].mxu1  ;;  %1946 = vrot.lane.b32.xlu0 %v5487_v20, %s5010_s4 }
 0x3a7   : > { %v5502_v28 = vpack.c.bf16 %v1688_v25, %v1688_v25 }
 0x3a8   : > { %1711 = vrot.lane.b32.xlu1 %v5499_v14, %s5008_s20 }
 0x3a9   : > { %v1877_v29 = vsel %vm1875_vm3, %v5502_v28, 0 }
 0x3aa   : > { %1938 = vrot.lane.b32.xlu0 %v5479_v2, %s5011_s6  ;;  %4325 = vmatpush3.bf16.msra.mxu0 %v1877_v29 }
 0x3ab   : > { %4356 = vmatprep.subr.bf16.mxu0 %v5007_v56 }
 0x3ac   : > { %1944 = vrot.lane.b32.xlu1 %v5479_v2, %s5010_s4 }
 0x3ae   : > { %1942 = vrot.lane.b32.xlu0 %v5499_v14, %s5011_s6 }
 0x3b0   : > { %1948 = vrot.lane.b32.xlu1 %v5499_v14, %s5010_s4  ;;  %s6222_s4 = scalar_lea.vmem %s6130_s11, %s5245_s18 }
 0x3b4   : > { %1940 = vrot.lane.b32.xlu1 %v5487_v20, %s5011_s6 }
 0x40c   : > { %v1708_v30 = vpop.permute.xlu0 %1707 }
 0x40d   : > { %v1724_v31 = vsel %vm1713_vm4, %v1708_v30, 0 }
 0x40e   : > { %4303 = vmatpush3.bf16.xpose.msra.mxu1 %v1724_v31 }
 0x40f   : > { %4304 = vmatprep.subr.bf16.mxu1 %v5007_v56 }
 0x414   : > { %v1710_v32 = vpop.permute.xlu0 %1709 }
 0x415   : > { %v1727_v17 = vsel %vm1713_vm4, %v1710_v32, 0 }
 0x416   : > { %4305 = vmatpush3.bf16.xpose.msra.mxu1 %v1727_v17 }
 0x417   : > { %4306 = vmatprep.subr.bf16.mxu1 %v5007_v56 }
 0x418   : > { %v1947_v38 = vpop.permute.xlu0 %1946 }
 0x419   : > { %v1963_v39 = vsel %vm1713_vm4, %v1947_v38, 0 }
 0x41a   : > { %v1712_v33 = vpop.permute.xlu1 %1711 }
 0x41b   : > { %v1730_v34 = vsel %vm1713_vm4, %v1712_v33, 0 }
 0x41c   : > { %v1939_v42 = vpop.permute.xlu0 %1938 }
 0x41e   : > { %4307 = vmatpush3.bf16.xpose.msra.mxu1 %v1730_v34  ;;  %v1945_v35 = vpop.permute.xlu1 %1944 }
 0x41f   : > { %4338 = vmatprep.subr.bf16.mxu1 %v5007_v56  ;;  %v1960_v37 = vsel %vm1713_vm4, %v1945_v35, 0 }
 0x420   : > { %v1943_v44 = vpop.permute.xlu0 %1942 }
 0x422   : > { %v1949_v40 = vpop.permute.xlu1 %1948 }
 0x423   : > { %v1966_v36 = vsel %vm1713_vm4, %v1949_v40, 0 }
 0x425   : > { %4309 = vmatmul.mubr.msk.bf16.vlgmr.msra.gmra.mrb[12].mxu1 %vm1713_vm4, %v5479_v2 }
 0x426   : > { %4339 = vmatpush3.bf16.xpose.msra.mxu1 %v1960_v37  ;;  %4312 = vmatprep.mubr.msk.bf16.mxu1 %vm5009_vm2, %v5007_v56  ;;  %v1941_v43 = vpop.permute.xlu1 %1940 }
 0x427   : > { %4340 = vmatprep.subr.bf16.mxu1 %v5007_v56 }
 0x42d   : > { %4313 = vmatmul.mubr.msk.bf16.gmra.mrb[16].mxu1 %vm1713_vm4, %v5487_v20 }
 0x42e   : > { %4341 = vmatpush3.bf16.xpose.msra.mxu1 %v1963_v39  ;;  %4316 = vmatprep.mubr.msk.bf16.mxu1 %vm5009_vm2, %v5007_v56 }
 0x42f   : > { %4342 = vmatprep.subr.bf16.mxu1 %v5007_v56 }
 0x435   : > { %4317 = vmatmul.mubr.msk.bf16.gmra.mrb[20].mxu1 %vm1713_vm4, %v5499_v14 }
 0x436   : > { %4343 = vmatpush3.bf16.xpose.msra.mxu1 %v1966_v36  ;;  %4344 = vmatprep.mubr.msk.bf16.mxu1 %vm5009_vm2, %v5007_v56 }
 0x437   : > { %4374 = vmatprep.subr.bf16.mxu1 %v5007_v56 }
 0x43d   : > { %4345 = vmatmul.mubr.msk.bf16.vlgmr.msra.gmra.mrb[24].mxu1 %vm1713_vm4, %v1939_v42 }
 0x43e   : > { %4348 = vmatprep.mubr.msk.bf16.mxu1 %vm5009_vm2, %v5007_v56 }
 0x445   : > { %4349 = vmatmul.mubr.msk.bf16.gmra.mrb[28].mxu1 %vm1713_vm4, %v1941_v43 }
 0x446   : > { %4352 = vmatprep.mubr.msk.bf16.mxu1 %vm5009_vm2, %v5007_v56 }
 0x44d   : > { %4353 = vmatmul.mubr.msk.bf16.gmra.mrb[32].mxu1 %vm1713_vm4, %v1943_v44 }
 0x44e   : > { %4376 = vmatprep.mubr.msk.bf16.mxu1 %vm5009_vm2, %v5007_v56 }
 0x4f8   : > { %v1766_v41 = vpop.f32.mrb[12].mxu1 }
 0x4f9   : > { %v1788_v46 = vmul.f32 0.25, %v1766_v41  ;;  %v4310_v47 = vpop.f32.mrb[13].mxu1 }
 0x4fa   : > { %v1769_v48 = vpop.f32.mrb[14].mxu1 }
 0x4fb   : > { %v1789_v49 = vmul.f32 0.25, %v1769_v48  ;;  %v4311_v50 = vpop.f32.mrb[15].mxu1  ;;  %v1799_v51 = vadd.f32 %v5555_v45, %v1788_v46 }
 0x4fd   : > { %v1805_v52 = vsel %vm1804_vm5, %v1799_v51, -inf  ;;  %v1800_v53 = vadd.f32 %v5555_v45, %v1789_v49 }
 0x4fe   : > { %1806 = vmax.xlane.f32.xlu1 %v1805_v52 }
 0x4ff   : > { %v1808_v54 = vsel %vm1804_vm5, %v1800_v53, -inf }
 0x500   : > { %1809 = vmax.xlane.f32.xlu0 %v1808_v54  ;;  %v1774_v55 = vpop.f32.mrb[16].mxu1 }
 0x501   : > { %v1790_v57 = vmul.f32 0.25, %v1774_v55  ;;  %v4314_v58 = vpop.f32.mrb[17].mxu1 }
 0x502   : > { %v1777_v59 = vpop.f32.mrb[18].mxu1 }
 0x503   : > { %v1791_v60 = vmul.f32 0.25, %v1777_v59  ;;  %v4315_v61 = vpop.f32.mrb[19].mxu1  ;;  %v1801_v62 = vadd.f32 %v5555_v45, %v1790_v57 }
 0x505   : > { %v1811_v63 = vsel %vm1804_vm5, %v1801_v62, -inf  ;;  %v1802_v0 = vadd.f32 %v5555_v45, %v1791_v60 }
 0x506   : > { %1812 = vmax.xlane.f32.xlu0 %v1811_v63 }
 0x507   : > { %v1814_v1 = vsel %vm1804_vm5, %v1802_v0, -inf }
 0x508   : > { %1815 = vmax.xlane.f32.xlu1 %v1814_v1  ;;  %v1782_v3 = vpop.f32.mrb[20].mxu1 }
 0x509   : > { %v1792_v4 = vmul.f32 0.25, %v1782_v3  ;;  %v4318_v5 = vpop.f32.mrb[21].mxu1 }
 0x50a   : > { %v1785_v6 = vpop.f32.mrb[22].mxu1 }
 0x50b   : > { %v4319_v7 = vpop.f32.mrb[23].mxu1  ;;  %v1803_v8 = vadd.f32 %v5555_v45, %v1792_v4 }
 0x50d   : > { %v1817_v10 = vsel %vm1804_vm5, %v1803_v8, -inf }
 0x50e   : > { %1818 = vmax.xlane.f32.xlu0 %v1817_v10 }
 0x510   : > { %v2002_v11 = vpop.f32.mrb[24].mxu1 }
 0x511   : > { %v2024_v12 = vmul.f32 0.25, %v2002_v11  ;;  %v4346_v13 = vpop.f32.mrb[25].mxu1 }
 0x512   : > { %v2005_v15 = vpop.f32.mrb[26].mxu1 }
 0x513   : > { %v2025_v16 = vmul.f32 0.25, %v2005_v15  ;;  %v4347_v18 = vpop.f32.mrb[27].mxu1  ;;  %v2029_v19 = vadd.f32 %v5555_v45, %v2024_v12 }
 0x515   : > { %v2034_v22 = vsel %vm1804_vm5, %v2029_v19, -inf  ;;  %v2030_v23 = vadd.f32 %v5555_v45, %v2025_v16 }
 0x516   : > { %2035 = vmax.xlane.f32.xlu1 %v2034_v22 }
 0x517   : > { %v2037_v24 = vsel %vm1804_vm5, %v2030_v23, -inf }
 0x518   : > { %2038 = vmax.xlane.f32.xlu0 %v2037_v24  ;;  %v2010_v25 = vpop.f32.mrb[28].mxu1 }
 0x519   : > { %v2026_v26 = vmul.f32 0.25, %v2010_v25  ;;  %v4350_v27 = vpop.f32.mrb[29].mxu1 }
 0x51a   : > { %v2013_v29 = vpop.f32.mrb[30].mxu1 }
 0x51b   : > { %v2027_v30 = vmul.f32 0.25, %v2013_v29  ;;  %v4351_v31 = vpop.f32.mrb[31].mxu1  ;;  %v2031_v32 = vadd.f32 %v5555_v45, %v2026_v26 }
 0x51d   : > { %v2040_v17 = vsel %vm1804_vm5, %v2031_v32, -inf  ;;  %v2032_v33 = vadd.f32 %v5555_v45, %v2027_v30 }
 0x51e   : > { %2041 = vmax.xlane.f32.xlu1 %v2040_v17 }
 0x51f   : > { %v2043_v34 = vsel %vm1804_vm5, %v2032_v33, -inf }
 0x520   : > { %2044 = vmax.xlane.f32.xlu0 %v2043_v34  ;;  %v2018_v35 = vpop.f32.mrb[32].mxu1 }
 0x521   : > { %v2028_v37 = vmul.f32 0.25, %v2018_v35  ;;  %v4354_v38 = vpop.f32.mrb[33].mxu1 }
 0x522   : > { %v2021_v39 = vpop.f32.mrb[34].mxu1 }
 0x523   : > { %v4355_v40 = vpop.f32.mrb[35].mxu1  ;;  %v5576_v36 = vadd.f32 %v5555_v45, %v2028_v37 }
 0x525   : > { %v2046_v42 = vsel %vm1804_vm5, %v5576_v36, -inf }
 0x526   : > { %2047 = vmax.xlane.f32.xlu1 %v2046_v42 }
 0x58b   : > { %v1807_v43 = vpop.xlane.xlu1 %1806 }
 0x58c   : > { %v1820_v44 = vsub.f32 %v1799_v51, %v1807_v43 }
 0x58d   : > { %v1810_v41 = vpop.xlane.xlu0 %1809 }
 0x58e   : > { %v1825_v46 = vmul.f32 1.442695, %v1820_v44  ;;  %v1821_v47 = vsub.f32 %v1800_v53, %v1810_v41 }
 0x590   : > { %4773 = vpow2.f32 %v1825_v46  ;;  %v1827_v48 = vmul.f32 1.442695, %v1821_v47 }
 0x592   : > { %4775 = vpow2.f32 %v1827_v48 }
 0x593   : > { %v1813_v49 = vpop.xlane.xlu0 %1812 }
 0x594   : > { %v1822_v50 = vsub.f32 %v1801_v62, %v1813_v49 }
 0x595   : > { %v1816_v52 = vpop.xlane.xlu1 %1815 }
 0x596   : > { %v1829_v54 = vmul.f32 1.442695, %v1822_v50  ;;  %v1823_v55 = vsub.f32 %v1802_v0, %v1816_v52 }
 0x598   : > { %4777 = vpow2.f32 %v1829_v54  ;;  %v1831_v57 = vmul.f32 1.442695, %v1823_v55 }
 0x59a   : > { %v5580_v58 = vpop.eup %4773  ;;  %4779 = vpow2.f32 %v1831_v57 }
 0x59b   : > { %v1819_v59 = vpop.xlane.xlu0 %1818  ;;  %v1835_v51 = vsel %vm1804_vm5, %v5580_v58, 0.0 }
 0x59c   : > { %v5584_v60 = vpop.eup %4775  ;;  %v1824_v53 = vsub.f32 %v1803_v8, %v1819_v59  ;;  %1836 = vadd.xlane.f32.xlu0 %v1835_v51 }
 0x59d   : > { %v1838_v61 = vsel %vm1804_vm5, %v5584_v60, 0.0 }
 0x59e   : > { %v1833_v62 = vmul.f32 1.442695, %v1824_v53  ;;  %1839 = vadd.xlane.f32.xlu1 %v1838_v61 }
 0x5a0   : > { %4781 = vpow2.f32 %v1833_v62 }
 0x5a2   : > { %v5588_v63 = vpop.eup %4777 }
 0x5a3   : > { %v2036_v0 = vpop.xlane.xlu1 %2035  ;;  %v1841_v1 = vsel %vm1804_vm5, %v5588_v63, 0.0 }
 0x5a4   : > { %v5592_v3 = vpop.eup %4779  ;;  %v2049_v4 = vsub.f32 %v2029_v19, %v2036_v0  ;;  %1842 = vadd.xlane.f32.xlu0 %v1841_v1 }
 0x5a5   : > { %v2039_v5 = vpop.xlane.xlu0 %2038  ;;  %v1844_v6 = vsel %vm1804_vm5, %v5592_v3, 0.0 }
 0x5a6   : > { %v2054_v7 = vmul.f32 1.442695, %v2049_v4  ;;  %v2050_v8 = vsub.f32 %v2030_v23, %v2039_v5  ;;  %1845 = vadd.xlane.f32.xlu1 %v1844_v6 }
 0x5a8   : > { %4783 = vpow2.f32 %v2054_v7  ;;  %v2056_v10 = vmul.f32 1.442695, %v2050_v8 }
 0x5aa   : > { %v5596_v11 = vpop.eup %4781  ;;  %4785 = vpow2.f32 %v2056_v10 }
 0x5ab   : > { %v2042_v12 = vpop.xlane.xlu1 %2041  ;;  %v1847_v13 = vsel %vm1804_vm5, %v5596_v11, 0.0 }
 0x5ac   : > { %v2051_v15 = vsub.f32 %v2031_v32, %v2042_v12  ;;  %1848 = vadd.xlane.f32.xlu0 %v1847_v13 }
 0x5ad   : > { %v2045_v16 = vpop.xlane.xlu0 %2044 }
 0x5ae   : > { %v2058_v18 = vmul.f32 1.442695, %v2051_v15  ;;  %v2052_v19 = vsub.f32 %v2032_v33, %v2045_v16  ;;  %v4757_v15 = vld [vmem:[%s5267_s5] sm:$0xff]  }
 0x5b0   : > { %4787 = vpow2.f32 %v2058_v18  ;;  %v2060_v22 = vmul.f32 1.442695, %v2052_v19  ;;  %v4758_v19 = vld [vmem:[%s5267_s5 + $0x8] sm:$0xff]  }
 0x5b1   : > { %4375 = vmatpush3.bf16.msra.mxu1 %v4758_v19 }
 0x5b2   : > { %v5600_v24 = vpop.eup %4783  ;;  %4789 = vpow2.f32 %v2060_v22  ;;  %4402 = vmatprep.subr.bf16.mxu1 %v5007_v56 }
 0x5b3   : > { %v2064_v23 = vsel %vm1804_vm5, %v5600_v24, 0.0  ;;  %v2048_v32 = vpop.xlane.xlu1 %2047 }
 0x5b4   : > { %v5604_v25 = vpop.eup %4785  ;;  %2065 = vadd.xlane.f32.xlu1 %v2064_v23  ;;  %v2053_v17 = vsub.f32 %v5576_v36, %v2048_v32 }
 0x5b5   : > { %v2067_v26 = vsel %vm1804_vm5, %v5604_v25, 0.0 }
 0x5b6   : > { %2068 = vadd.xlane.f32.xlu0 %v2067_v26  ;;  %v2062_v33 = vmul.f32 1.442695, %v2053_v17 }
 0x5b8   : > { %4791 = vpow2.f32 %v2062_v33 }
 0x5ba   : > { %v5608_v27 = vpop.eup %4787 }
 0x5bb   : > { %v2070_v29 = vsel %vm1804_vm5, %v5608_v27, 0.0 }
 0x5bc   : > { %v5612_v30 = vpop.eup %4789  ;;  %2071 = vadd.xlane.f32.xlu1 %v2070_v29 }
 0x5bd   : > { %v2073_v31 = vsel %vm1804_vm5, %v5612_v30, 0.0 }
 0x5be   : > { %2074 = vadd.xlane.f32.xlu0 %v2073_v31 }
 0x5c2   : > { %v5625_v34 = vpop.eup %4791 }
 0x5c3   : > { %v2076_v35 = vsel %vm1804_vm5, %v5625_v34, 0.0 }
 0x5cd   : > { %2097 = vrot.lane.b32.xlu1 %v5489_v21, %s5011_s6 }
 0x5d4   : > { %2095 = vrot.lane.b32.xlu0 %v5481_v9, %s5011_s6 }
 0x5d8   : > { %2322 = vrot.lane.b32.xlu0 %v5479_v2, %s5012_s23 }
 0x5dc   : > { %2326 = vrot.lane.b32.xlu0 %v5499_v14, %s5012_s23 }
 0x5e0   : > { %2318 = vrot.lane.b32.xlu0 %v5487_v20, %s5013_s30 }
 0x5f1   : > { %2077 = vadd.xlane.f32.xlu1 %v2076_v35 }
 0x602   : > { %2099 = vrot.lane.b32.xlu1 %v5502_v28, %s5011_s6  ;;  %s6230_s6 = sld [smem:[#allocation38_spill]] (!%p4109_p1) }
 0x606   : > { %2324 = vrot.lane.b32.xlu1 %v5487_v20, %s5012_s23 }
 0x60a   : > { %2316 = vrot.lane.b32.xlu1 %v5479_v2, %s5013_s30 }
 0x60e   : > { %2320 = vrot.lane.b32.xlu1 %v5499_v14, %s5013_s30 }
 0x629   : > { %v1837_v37 = vpop.xlane.xlu0 %1836 }
 0x62a   : > { %4793 = vrcp.f32 %v1837_v37 }
 0x62b   : > { %v1840_v38 = vpop.xlane.xlu1 %1839 }
 0x62c   : > { %4795 = vrcp.f32 %v1840_v38 }
 0x631   : > { %v1843_v39 = vpop.xlane.xlu0 %1842 }
 0x632   : > { %4797 = vrcp.f32 %v1843_v39 }
 0x633   : > { %v1846_v40 = vpop.xlane.xlu1 %1845 }
 0x634   : > { %v4794_v36 = vpop.eup %4793  ;;  %4799 = vrcp.f32 %v1846_v40 }
 0x635   : > { %v1855_v43 = vmul.f32 %v4794_v36, %v5580_v58 }
 0x636   : > { %v4796_v42 = vpop.eup %4795 }
 0x637   : > { %v1856_v44 = vmul.f32 %v4796_v42, %v5584_v60 }
 0x639   : > { %v1849_v41 = vpop.xlane.xlu0 %1848  ;;  %v1860_v46 = vpack.c.bf16 %v1856_v44, %v1855_v43 }
 0x63a   : > { %4801 = vrcp.f32 %v1849_v41 }
 0x63b   : > { %4327 = vmatmul.mubr.msk.bf16.vlgmr.msra.gmra.mrb[0].mxu0 %vm1804_vm5, %v1860_v46 }
 0x63c   : > { %v4798_v47 = vpop.eup %4797  ;;  %4330 = vmatprep.mubr.msk.bf16.mxu0 %vm5009_vm2, %v5007_v56 }
 0x63d   : > { %v1857_v49 = vmul.f32 %v4798_v47, %v5588_v63 }
 0x63e   : > { %v4800_v48 = vpop.eup %4799 }
 0x63f   : > { %v1858_v50 = vmul.f32 %v4800_v48, %v5592_v3 }
 0x641   : > { %v1861_v52 = vpack.c.bf16 %v1858_v50, %v1857_v49  ;;  %v2066_v58 = vpop.xlane.xlu1 %2065 }
 0x643   : > { %4331 = vmatmul.mubr.msk.bf16.gmra.mrb[4].mxu0 %vm1804_vm5, %v1861_v52  ;;  %v2069_v57 = vpop.xlane.xlu0 %2068 }
 0x644   : > { %v4802_v54 = vpop.eup %4801  ;;  %4334 = vmatprep.mubr.msk.bf16.mxu0 %vm5009_vm2, %v5007_v56  ;;  %4803 = vrcp.f32 %v2069_v57 }
 0x645   : > { %v1859_v55 = vmul.f32 %v4802_v54, %v5596_v11  ;;  %4805 = vrcp.f32 %v2066_v58 }
 0x647   : > { %v1862_v59 = vpack.c.bf16 %v1859_v55, %v1859_v55 }
 0x649   : > { %v2072_v60 = vpop.xlane.xlu1 %2071 }
 0x64b   : > { %4335 = vmatmul.mubr.msk.bf16.gmra.mrb[8].mxu0 %vm1804_vm5, %v1862_v59  ;;  %v2075_v51 = vpop.xlane.xlu0 %2074 }
 0x64c   : > { %4362 = vmatprep.mubr.msk.bf16.mxu0 %vm5009_vm2, %v5007_v56  ;;  %4807 = vrcp.f32 %v2075_v51 }
 0x64d   : > { %v2098_v61 = vpop.permute.xlu1 %2097  ;;  %4809 = vrcp.f32 %v2072_v60 }
 0x64e   : > { %v4804_v62 = vpop.eup %4803 }
 0x64f   : > { %v2096_v53 = vpop.permute.xlu0 %2095  ;;  %v4806_v0 = vpop.eup %4805  ;;  %v2085_v1 = vmul.f32 %v4804_v62, %v5604_v25 }
 0x650   : > { %4357 = vmatpush3.bf16.msra.mxu0 %v2096_v53  ;;  %v2084_v4 = vmul.f32 %v4806_v0, %v5600_v24 }
 0x651   : > { %4358 = vmatprep.subr.bf16.mxu0 %v5007_v56 }
 0x652   : > { %v2089_v6 = vpack.c.bf16 %v2085_v1, %v2084_v4 }
 0x653   : > { %v2323_v40 = vpop.permute.xlu0 %2322 }
 0x654   : > { %4359 = vmatpush3.bf16.msra.mxu0 %v2098_v61  ;;  %v2338_v44 = vsel %vm1713_vm4, %v2323_v40, 0 }
 0x655   : > { %4360 = vmatprep.subr.bf16.mxu0 %v5007_v56 }
 0x656   : > { %v4808_v7 = vpop.eup %4807 }
 0x657   : > { %v4810_v8 = vpop.eup %4809  ;;  %v2087_v10 = vmul.f32 %v4808_v7, %v5612_v30  ;;  %v2327_v57 = vpop.permute.xlu0 %2326 }
 0x658   : > { %v2086_v11 = vmul.f32 %v4810_v8, %v5608_v27  ;;  %v2344_v60 = vsel %vm1713_vm4, %v2327_v57, 0 }
 0x65a   : > { %v2090_v12 = vpack.c.bf16 %v2087_v10, %v2086_v11 }
 0x65b   : > { %v2319_v61 = vpop.permute.xlu0 %2318 }
 0x67e   : > { %v2078_v63 = vpop.xlane.xlu1 %2077 }
 0x67f   : > { %4811 = vrcp.f32 %v2078_v63 }
 0x682   : > { %v2100_v3 = vpop.permute.xlu1 %2099 }
 0x683   : > { %v2113_v5 = vsel %vm1875_vm3, %v2100_v3, 0 }
 0x684   : > { %4361 = vmatpush3.bf16.msra.mxu0 %v2113_v5 }
 0x685   : > { %4388 = vmatprep.subr.bf16.mxu0 %v5007_v56 }
 0x686   : > { %v2325_v47 = vpop.permute.xlu1 %2324 }
 0x687   : > { %4363 = vmatmul.mubr.msk.bf16.vlgmr.msra.gmra.mrb[12].mxu0 %vm1804_vm5, %v2089_v6  ;;  %v2341_v52 = vsel %vm1713_vm4, %v2325_v47, 0 }
 0x688   : > { %4366 = vmatprep.mubr.msk.bf16.mxu0 %vm5009_vm2, %v5007_v56  ;;  %4389 = vmatpush3.bf16.msra.mxu0 %v4757_v15 }
 0x689   : > { %v4812_v13 = vpop.eup %4811  ;;  %4420 = vmatprep.subr.bf16.mxu0 %v5007_v56 }
 0x68a   : > { %v2088_v16 = vmul.f32 %v4812_v13, %v5625_v34  ;;  %v2317_v53 = vpop.permute.xlu1 %2316 }
 0x68c   : > { %v2091_v18 = vpack.c.bf16 %v2088_v16, %v2088_v16 }
 0x68e   : > { %v2321_v62 = vpop.permute.xlu1 %2320 }
 0x68f   : > { %4367 = vmatmul.mubr.msk.bf16.gmra.mrb[16].mxu0 %vm1804_vm5, %v2090_v12 }
 0x690   : > { %4370 = vmatprep.mubr.msk.bf16.mxu0 %vm5009_vm2, %v5007_v56 }
 0x697   : > { %4371 = vmatmul.mubr.msk.bf16.gmra.mrb[20].mxu0 %vm1804_vm5, %v2091_v18 }
 0x698   : > { %4390 = vmatprep.mubr.msk.bf16.mxu0 %vm5009_vm2, %v5007_v56 }
 0x70e   : > { %v1913_v22 = vpop.f32.mrb[0].mxu0 }
 0x70f   : > { %v4328_v24 = vpop.f32.mrb[1].mxu0 }
 0x710   : > { %v1916_v23 = vpop.f32.mrb[2].mxu0 }
 0x711   : > { %v1935_v25 = vpack.c.bf16 %v1916_v23, %v1913_v22  ;;  %v4329_v26 = vpop.f32.mrb[3].mxu0 }
 0x713   : > { %4391 = vmatmul.mubr.msk.bf16.vlgmr.msra.gmra.mrb[24].mxu0 %vm1713_vm4, %v1935_v25 }
 0x714   : > { %4394 = vmatprep.mubr.msk.bf16.mxu0 %vm5009_vm2, %v5007_v56 }
 0x716   : > { %v1921_v27 = vpop.f32.mrb[4].mxu0 }
 0x717   : > { %v4332_v29 = vpop.f32.mrb[5].mxu0 }
 0x718   : > { %v1924_v30 = vpop.f32.mrb[6].mxu0 }
 0x719   : > { %v1936_v31 = vpack.c.bf16 %v1924_v30, %v1921_v27  ;;  %v4333_v32 = vpop.f32.mrb[7].mxu0 }
 0x71b   : > { %4395 = vmatmul.mubr.msk.bf16.gmra.mrb[28].mxu0 %vm1713_vm4, %v1936_v31 }
 0x71c   : > { %4398 = vmatprep.mubr.msk.bf16.mxu0 %vm5009_vm2, %v5007_v56 }
 0x71e   : > { %v1929_v17 = vpop.f32.mrb[8].mxu0 }
 0x71f   : > { %v4336_v33 = vpop.f32.mrb[9].mxu0  ;;  %v1937_v35 = vpack.c.bf16 %v1929_v17, %v1929_v17 }
 0x720   : > { %v1932_v34 = vpop.f32.mrb[10].mxu0 }
 0x721   : > { %v4337_v37 = vpop.f32.mrb[11].mxu0 }
 0x723   : > { %4399 = vmatmul.mubr.msk.bf16.gmra.mrb[32].mxu0 %vm1713_vm4, %v1937_v35 }
 0x724   : > { %4426 = vmatprep.mubr.msk.bf16.mxu0 %vm5009_vm2, %v5007_v56 }
 0x75a   : > { %v2149_v38 = vpop.f32.mrb[12].mxu0 }
 0x75b   : > { %v4364_v39 = vpop.f32.mrb[13].mxu0 }
 0x75c   : > { %v2152_v36 = vpop.f32.mrb[14].mxu0 }
 0x75d   : > { %v2171_v42 = vpack.c.bf16 %v2152_v36, %v2149_v38  ;;  %v4365_v43 = vpop.f32.mrb[15].mxu0 }
 0x75f   : > { %4377 = vmatmul.mubr.msk.bf16.vlgmr.msra.gmra.mrb[36].mxu1 %vm1713_vm4, %v2171_v42 }
 0x760   : > { %4403 = vmatpush3.bf16.xpose.msra.mxu1 %v2338_v44  ;;  %4380 = vmatprep.mubr.msk.bf16.mxu1 %vm5009_vm2, %v5007_v56 }
 0x761   : > { %4404 = vmatprep.subr.bf16.mxu1 %v5007_v56 }
 0x762   : > { %v2157_v41 = vpop.f32.mrb[16].mxu0 }
 0x763   : > { %v4368_v46 = vpop.f32.mrb[17].mxu0 }
 0x764   : > { %v2160_v48 = vpop.f32.mrb[18].mxu0 }
 0x765   : > { %v2172_v49 = vpack.c.bf16 %v2160_v48, %v2157_v41  ;;  %v4369_v50 = vpop.f32.mrb[19].mxu0 }
 0x767   : > { %4381 = vmatmul.mubr.msk.bf16.gmra.mrb[40].mxu1 %vm1713_vm4, %v2172_v49 }
 0x768   : > { %4405 = vmatpush3.bf16.xpose.msra.mxu1 %v2341_v52  ;;  %4384 = vmatprep.mubr.msk.bf16.mxu1 %vm5009_vm2, %v5007_v56 }
 0x769   : > { %4406 = vmatprep.subr.bf16.mxu1 %v5007_v56 }
 0x76a   : > { %v2165_v54 = vpop.f32.mrb[20].mxu0 }
 0x76b   : > { %v4372_v55 = vpop.f32.mrb[21].mxu0  ;;  %v2173_v59 = vpack.c.bf16 %v2165_v54, %v2165_v54 }
 0x76c   : > { %v2168_v58 = vpop.f32.mrb[22].mxu0 }
 0x76d   : > { %v4373_v51 = vpop.f32.mrb[23].mxu0 }
 0x76f   : > { %4385 = vmatmul.mubr.msk.bf16.gmra.mrb[44].mxu1 %vm1713_vm4, %v2173_v59 }
 0x770   : > { %4407 = vmatpush3.bf16.xpose.msra.mxu1 %v2344_v60  ;;  %4408 = vmatprep.mubr.msk.bf16.mxu1 %vm5009_vm2, %v5007_v56 }
 0x771   : > { %4438 = vmatprep.subr.bf16.mxu1 %v5007_v56 }
 0x777   : > { %4409 = vmatmul.mubr.msk.bf16.vlgmr.msra.gmra.mrb[48].mxu1 %vm1713_vm4, %v2317_v53 }
 0x778   : > { %4412 = vmatprep.mubr.msk.bf16.mxu1 %vm5009_vm2, %v5007_v56 }
 0x77f   : > { %4413 = vmatmul.mubr.msk.bf16.gmra.mrb[52].mxu1 %vm1713_vm4, %v2319_v61 }
 0x780   : > { %4416 = vmatprep.mubr.msk.bf16.mxu1 %vm5009_vm2, %v5007_v56 }
 0x787   : > { %4417 = vmatmul.mubr.msk.bf16.gmra.mrb[56].mxu1 %vm1713_vm4, %v2321_v62 }
 0x788   : > { %4440 = vmatprep.mubr.msk.bf16.mxu1 %vm5009_vm2, %v5007_v56 }
 0x7e6   : > { %v2294_v63 = vpop.f32.mrb[24].mxu0 }
 0x7e7   : > { %v4392_v0 = vpop.f32.mrb[25].mxu0 }
 0x7e8   : > { %v2297_v1 = vpop.f32.mrb[26].mxu0 }
 0x7e9   : > { %v4393_v3 = vpop.f32.mrb[27].mxu0 }
 0x7ee   : > { %v2302_v4 = vpop.f32.mrb[28].mxu0 }
 0x7ef   : > { %v4396_v5 = vpop.f32.mrb[29].mxu0 }
 0x7f0   : > { %v2305_v6 = vpop.f32.mrb[30].mxu0 }
 0x7f1   : > { %v4397_v7 = vpop.f32.mrb[31].mxu0 }
 0x7f6   : > { %v2310_v8 = vpop.f32.mrb[32].mxu0 }
 0x7f7   : > { %v4400_v10 = vpop.f32.mrb[33].mxu0 }
 0x7f8   : > { %v2313_v11 = vpop.f32.mrb[34].mxu0 }
 0x7f9   : > { %v4401_v12 = vpop.f32.mrb[35].mxu0 }
 0x832   : > { %v2223_v13 = vpop.f32.mrb[36].mxu1 }
 0x833   : > { %v5705_v15 = vadd.f32 %v2294_v63, %v2223_v13  ;;  %v4378_v16 = vpop.f32.mrb[37].mxu1 }
 0x834   : > { %v2226_v18 = vpop.f32.mrb[38].mxu1 }
 0x835   : > { %v5707_v19 = vadd.f32 %v2297_v1, %v2226_v18  ;;  %v4379_v22 = vpop.f32.mrb[39].mxu1 }
 0x83a   : > { %v2231_v24 = vpop.f32.mrb[40].mxu1 }
 0x83b   : > { %v5709_v23 = vadd.f32 %v2302_v4, %v2231_v24  ;;  %v4382_v25 = vpop.f32.mrb[41].mxu1 }
 0x83c   : > { %v2234_v26 = vpop.f32.mrb[42].mxu1 }
 0x83d   : > { %v5711_v27 = vadd.f32 %v2305_v6, %v2234_v26  ;;  %v4383_v29 = vpop.f32.mrb[43].mxu1 }
 0x842   : > { %v2239_v30 = vpop.f32.mrb[44].mxu1 }
 0x843   : > { %v5713_v31 = vadd.f32 %v2310_v8, %v2239_v30  ;;  %v4386_v32 = vpop.f32.mrb[45].mxu1 }
 0x844   : > { %v2242_v17 = vpop.f32.mrb[46].mxu1 }
 0x845   : > { %v4387_v33 = vpop.f32.mrb[47].mxu1 }
 0x84a   : > { %v2380_v34 = vpop.f32.mrb[48].mxu1 }
 0x84b   : > { %v2402_v35 = vmul.f32 0.25, %v2380_v34  ;;  %v4410_v37 = vpop.f32.mrb[49].mxu1 }
 0x84c   : > { %v2383_v38 = vpop.f32.mrb[50].mxu1 }
 0x84d   : > { %v2403_v39 = vmul.f32 0.25, %v2383_v38  ;;  %v4411_v40 = vpop.f32.mrb[51].mxu1  ;;  %v2407_v36 = vadd.f32 %v5555_v45, %v2402_v35 }
 0x84f   : > { %v2412_v42 = vsel %vm1804_vm5, %v2407_v36, -inf  ;;  %v2408_v43 = vadd.f32 %v5555_v45, %v2403_v39 }
 0x850   : > { %2413 = vmax.xlane.f32.xlu0 %v2412_v42 }
 0x851   : > { %v2415_v44 = vsel %vm1804_vm5, %v2408_v43, -inf }
 0x852   : > { %2416 = vmax.xlane.f32.xlu1 %v2415_v44  ;;  %v2388_v41 = vpop.f32.mrb[52].mxu1 }
 0x853   : > { %v2404_v46 = vmul.f32 0.25, %v2388_v41  ;;  %v4414_v47 = vpop.f32.mrb[53].mxu1 }
 0x854   : > { %v2391_v48 = vpop.f32.mrb[54].mxu1 }
 0x855   : > { %v2405_v49 = vmul.f32 0.25, %v2391_v48  ;;  %v4415_v50 = vpop.f32.mrb[55].mxu1  ;;  %v2409_v52 = vadd.f32 %v5555_v45, %v2404_v46 }
 0x857   : > { %v2418_v54 = vsel %vm1804_vm5, %v2409_v52, -inf  ;;  %v2410_v55 = vadd.f32 %v5555_v45, %v2405_v49 }
 0x858   : > { %2419 = vmax.xlane.f32.xlu0 %v2418_v54 }
 0x859   : > { %v2421_v51 = vsel %vm1804_vm5, %v2410_v55, -inf }
 0x85a   : > { %v2396_v57 = vpop.f32.mrb[56].mxu1 }
 0x85b   : > { %v2406_v58 = vmul.f32 0.25, %v2396_v57  ;;  %v4418_v59 = vpop.f32.mrb[57].mxu1 }
 0x85c   : > { %2422 = vmax.xlane.f32.xlu0 %v2421_v51  ;;  %v2399_v60 = vpop.f32.mrb[58].mxu1 }
 0x85d   : > { %v4419_v53 = vpop.f32.mrb[59].mxu1  ;;  %v2411_v61 = vadd.f32 %v5555_v45, %v2406_v58 }
 0x85f   : > { %v2424_v62 = vsel %vm1804_vm5, %v2411_v61, -inf }
 0x860   : > { %2425 = vmax.xlane.f32.xlu1 %v2424_v62 }
 0x871   : > { %2472 = vrot.lane.b32.xlu1 %v5489_v21, %s5013_s30 }
 0x872   : > { %2470 = vrot.lane.b32.xlu0 %v5481_v9, %s5013_s30 }
 0x8dd   : > { %v2414_v63 = vpop.xlane.xlu0 %2413 }
 0x8de   : > { %v2427_v0 = vsub.f32 %v2407_v36, %v2414_v63 }
 0x8df   : > { %v2417_v1 = vpop.xlane.xlu1 %2416 }
 0x8e0   : > { %v2432_v3 = vmul.f32 1.442695, %v2427_v0  ;;  %v2428_v4 = vsub.f32 %v2408_v43, %v2417_v1  ;;  %v4759_v1 = vld [vmem:[%s5267_s5 + $0x10] sm:$0xff]  }
 0x8e1   : > { %4439 = vmatpush3.bf16.msra.mxu1 %v4759_v1 }
 0x8e2   : > { %4813 = vpow2.f32 %v2432_v3  ;;  %v2434_v5 = vmul.f32 1.442695, %v2428_v4  ;;  %4598 = vmatprep.subr.bf16.mxu1 %v5007_v56 }
 0x8e4   : > { %4815 = vpow2.f32 %v2434_v5 }
 0x8e5   : > { %v2420_v6 = vpop.xlane.xlu0 %2419 }
 0x8e6   : > { %v2429_v22 = vsub.f32 %v2409_v52, %v2420_v6 }
 0x8e8   : > { %v2436_v25 = vmul.f32 1.442695, %v2429_v22 }
 0x8e9   : > { %v2423_v7 = vpop.xlane.xlu0 %2422 }
 0x8ea   : > { %v2430_v24 = vsub.f32 %v2410_v55, %v2423_v7  ;;  %4817 = vpow2.f32 %v2436_v25 }
 0x8ec   : > { %v4814_v8 = vpop.eup %4813  ;;  %v2438_v26 = vmul.f32 1.442695, %v2430_v24 }
 0x8ed   : > { %v2426_v10 = vpop.xlane.xlu1 %2425  ;;  %v2471_v11 = vpop.permute.xlu0 %2470  ;;  %v2442_v12 = vsel %vm1804_vm5, %v4814_v8, 0.0 }
 0x8ee   : > { %v4816_v13 = vpop.eup %4815  ;;  %2443 = vadd.xlane.f32.xlu0 %v2442_v12  ;;  %4421 = vmatpush3.bf16.msra.mxu0 %v2471_v11  ;;  %v2431_v29 = vsub.f32 %v2411_v61, %v2426_v10  ;;  %4819 = vpow2.f32 %v2438_v26 }
 0x8ef   : > { %v2445_v16 = vsel %vm1804_vm5, %v4816_v13, 0.0  ;;  %4422 = vmatprep.subr.bf16.mxu0 %v5007_v56 }
 0x8f0   : > { %2446 = vadd.xlane.f32.xlu1 %v2445_v16  ;;  %v2440_v30 = vmul.f32 1.442695, %v2431_v29 }
 0x8f1   : > { %v2473_v18 = vpop.permute.xlu1 %2472 }
 0x8f2   : > { %4423 = vmatpush3.bf16.msra.mxu0 %v2473_v18  ;;  %4821 = vpow2.f32 %v2440_v30 }
 0x8f3   : > { %4424 = vmatprep.subr.bf16.mxu0 %v5007_v56 }
 0x8f4   : > { %v4818_v32 = vpop.eup %4817 }
 0x8f5   : > { %v2448_v33 = vsel %vm1804_vm5, %v4818_v32, 0.0 }
 0x8f8   : > { %v4820_v17 = vpop.eup %4819 }
 0x8f9   : > { %v2451_v34 = vsel %vm1804_vm5, %v4820_v17, 0.0 }
 0x8fc   : > { %v4822_v35 = vpop.eup %4821 }
 0x8fd   : > { %v2454_v37 = vsel %vm1804_vm5, %v4822_v35, 0.0 }
 0x901   : > { %2631 = vrot.lane.b32.xlu1 %v5479_v2, %s5014_s27 }
 0x904   : > { %2474 = vrot.lane.b32.xlu0 %v5502_v28, %s5013_s30 }
 0x923   : > { %2449 = vadd.xlane.f32.xlu0 %v2448_v33 }
 0x925   : > { %2452 = vadd.xlane.f32.xlu1 %v2451_v34 }
 0x929   : > { %2455 = vadd.xlane.f32.xlu1 %v2454_v37 }
 0x939   : > { %2633 = vrot.lane.b32.xlu0 %v5487_v20, %s5014_s27 }
 0x93a   : > { %2635 = vrot.lane.b32.xlu1 %v5499_v14, %s5014_s27 }
 0x93d   : > { %2625 = vrot.lane.b32.xlu0 %v5479_v2, %s5015_s1 }
 0x93e   : > { %2627 = vrot.lane.b32.xlu1 %v5487_v20, %s5015_s1 }
 0x941   : > { %2629 = vrot.lane.b32.xlu0 %v5499_v14, %s5015_s1 }
 0x97b   : > { %v2444_v38 = vpop.xlane.xlu0 %2443 }
 0x97c   : > { %4823 = vrcp.f32 %v2444_v38 }
 0x97d   : > { %v2447_v39 = vpop.xlane.xlu1 %2446 }
 0x97e   : > { %4825 = vrcp.f32 %v2447_v39 }
 0x97f   : > { %v2475_v40 = vpop.permute.xlu0 %2474 }
 0x980   : > { %v2488_v36 = vsel %vm1875_vm3, %v2475_v40, 0 }
 0x981   : > { %4425 = vmatpush3.bf16.msra.mxu0 %v2488_v36  ;;  %v2632_v41 = vpop.permute.xlu1 %2631 }
 0x982   : > { %4452 = vmatprep.subr.bf16.mxu0 %v5007_v56  ;;  %v2647_v20 = vsel %vm1713_vm4, %v2632_v41, 0 }
 0x986   : > { %v4824_v42 = vpop.eup %4823 }
 0x987   : > { %v2462_v44 = vmul.f32 %v4824_v42, %v4814_v8 }
 0x988   : > { %v4826_v43 = vpop.eup %4825 }
 0x989   : > { %v2463_v2 = vmul.f32 %v4826_v43, %v4816_v13 }
 0x98b   : > { %v2467_v46 = vpack.c.bf16 %v2463_v2, %v2462_v44 }
 0x98d   : > { %4427 = vmatmul.mubr.msk.bf16.vlgmr.msra.gmra.mrb[36].mxu0 %vm1804_vm5, %v2467_v46 }
 0x98e   : > { %4453 = vmatpush3.bf16.xpose.msra.mxu0 %v2647_v20  ;;  %4430 = vmatprep.mubr.msk.bf16.mxu0 %vm5009_vm2, %v5007_v56 }
 0x98f   : > { %4454 = vmatprep.subr.bf16.mxu0 %v5007_v56 }
 0x9b0   : > { %v2450_v14 = vpop.xlane.xlu0 %2449 }
 0x9b1   : > { %4827 = vrcp.f32 %v2450_v14 }
 0x9b2   : > { %v2453_v47 = vpop.xlane.xlu1 %2452 }
 0x9b3   : > { %4829 = vrcp.f32 %v2453_v47 }
 0x9b4   : > { %v2634_v48 = vpop.permute.xlu0 %2633 }
 0x9b5   : > { %v2650_v49 = vsel %vm1713_vm4, %v2634_v48, 0 }
 0x9b6   : > { %v2456_v50 = vpop.xlane.xlu1 %2455  ;;  %4455 = vmatpush3.bf16.xpose.msra.mxu0 %v2650_v49 }
 0x9b7   : > { %4831 = vrcp.f32 %v2456_v50  ;;  %4456 = vmatprep.subr.bf16.mxu0 %v5007_v56 }
 0x9b8   : > { %v2626_v62 = vpop.permute.xlu0 %2625 }
 0x9ba   : > { %v2636_v52 = vpop.permute.xlu1 %2635 }
 0x9bb   : > { %v4828_v54 = vpop.eup %4827  ;;  %v2653_v57 = vsel %vm1713_vm4, %v2636_v52, 0 }
 0x9bc   : > { %v2464_v58 = vmul.f32 %v4828_v54, %v4818_v32  ;;  %v2630_v0 = vpop.permute.xlu0 %2629 }
 0x9bd   : > { %v4830_v55 = vpop.eup %4829 }
 0x9be   : > { %4457 = vmatpush3.bf16.xpose.msra.mxu0 %v2653_v57  ;;  %v2465_v59 = vmul.f32 %v4830_v55, %v4820_v17  ;;  %v2628_v63 = vpop.permute.xlu1 %2627 }
 0x9bf   : > { %4470 = vmatprep.subr.bf16.mxu0 %v5007_v56 }
 0x9c0   : > { %v2468_v51 = vpack.c.bf16 %v2465_v59, %v2464_v58 }
 0x9c1   : > { %v4832_v60 = vpop.eup %4831 }
 0x9c2   : > { %4431 = vmatmul.mubr.msk.bf16.gmra.mrb[40].mxu0 %vm1804_vm5, %v2468_v51  ;;  %v2466_v53 = vmul.f32 %v4832_v60, %v4822_v35 }
 0x9c3   : > { %4434 = vmatprep.mubr.msk.bf16.mxu0 %vm5009_vm2, %v5007_v56 }
 0x9c4   : > { %v2469_v61 = vpack.c.bf16 %v2466_v53, %v2466_v53 }
 0x9ca   : > { %4435 = vmatmul.mubr.msk.bf16.gmra.mrb[44].mxu0 %vm1804_vm5, %v2469_v61 }
 0x9cb   : > { %4458 = vmatprep.mubr.msk.bf16.mxu0 %vm5009_vm2, %v5007_v56 }
 0x9d2   : > { %4459 = vmatmul.mubr.msk.bf16.vlgmr.msra.gmra.mrb[48].mxu0 %vm1713_vm4, %v2626_v62 }
 0x9d3   : > { %4462 = vmatprep.mubr.msk.bf16.mxu0 %vm5009_vm2, %v5007_v56 }
 0x9da   : > { %4463 = vmatmul.mubr.msk.bf16.gmra.mrb[52].mxu0 %vm1713_vm4, %v2628_v63 }
 0x9db   : > { %4466 = vmatprep.mubr.msk.bf16.mxu0 %vm5009_vm2, %v5007_v56 }
 0x9e2   : > { %4467 = vmatmul.mubr.msk.bf16.gmra.mrb[56].mxu0 %vm1713_vm4, %v2630_v0 }
 0x9e3   : > { %4476 = vmatprep.mubr.msk.bf16.mxu0 %vm5009_vm2, %v5007_v56 }
 0xa60   : > { %v2524_v3 = vpop.f32.mrb[36].mxu0 }
 0xa61   : > { %v4428_v4 = vpop.f32.mrb[37].mxu0 }
 0xa62   : > { %v2527_v5 = vpop.f32.mrb[38].mxu0 }
 0xa63   : > { %v2546_v6 = vpack.c.bf16 %v2527_v5, %v2524_v3  ;;  %v4429_v7 = vpop.f32.mrb[39].mxu0 }
 0xa65   : > { %4441 = vmatmul.mubr.msk.bf16.vlgmr.msra.gmra.mrb[60].mxu1 %vm1713_vm4, %v2546_v6 }
 0xa66   : > { %4444 = vmatprep.mubr.msk.bf16.mxu1 %vm5009_vm2, %v5007_v56 }
 0xa95   : > { %v2532_v8 = vpop.f32.mrb[40].mxu0 }
 0xa96   : > { %v4432_v10 = vpop.f32.mrb[41].mxu0 }
 0xa97   : > { %v2535_v11 = vpop.f32.mrb[42].mxu0 }
 0xa98   : > { %v2547_v12 = vpack.c.bf16 %v2535_v11, %v2532_v8  ;;  %v4433_v13 = vpop.f32.mrb[43].mxu0 }
 0xa9a   : > { %4445 = vmatmul.mubr.msk.bf16.gmra.mrb[64].mxu1 %vm1713_vm4, %v2547_v12 }
 0xa9b   : > { %4448 = vmatprep.mubr.msk.bf16.mxu1 %vm5009_vm2, %v5007_v56 }
 0xa9d   : > { %v2540_v16 = vpop.f32.mrb[44].mxu0 }
 0xa9e   : > { %v4436_v18 = vpop.f32.mrb[45].mxu0  ;;  %v2548_v24 = vpack.c.bf16 %v2540_v16, %v2540_v16 }
 0xa9f   : > { %v2543_v22 = vpop.f32.mrb[46].mxu0 }
 0xaa0   : > { %v4437_v25 = vpop.f32.mrb[47].mxu0 }
 0xaa2   : > { %4449 = vmatmul.mubr.msk.bf16.gmra.mrb[68].mxu1 %vm1713_vm4, %v2548_v24 }
 0xaa3   : > { %4480 = vmatprep.mubr.msk.bf16.mxu1 %vm5009_vm2, %v5007_v56 }
 0xaa5   : > { %v2689_v26 = vpop.f32.mrb[48].mxu0 }
 0xaa6   : > { %v2711_v29 = vmul.f32 0.25, %v2689_v26  ;;  %v4460_v30 = vpop.f32.mrb[49].mxu0 }
 0xaa7   : > { %v2692_v32 = vpop.f32.mrb[50].mxu0 }
 0xaa8   : > { %v2712_v17 = vmul.f32 0.25, %v2692_v32  ;;  %v4461_v33 = vpop.f32.mrb[51].mxu0  ;;  %v2716_v34 = vadd.f32 %v5555_v45, %v2711_v29 }
 0xaaa   : > { %v2721_v35 = vsel %vm1804_vm5, %v2716_v34, -inf  ;;  %v2717_v37 = vadd.f32 %v5555_v45, %v2712_v17 }
 0xaab   : > { %2722 = vmax.xlane.f32.xlu1 %v2721_v35 }
 0xaac   : > { %v2724_v38 = vsel %vm1804_vm5, %v2717_v37, -inf }
 0xaad   : > { %2725 = vmax.xlane.f32.xlu0 %v2724_v38  ;;  %v2697_v39 = vpop.f32.mrb[52].mxu0 }
 0xaae   : > { %v2713_v40 = vmul.f32 0.25, %v2697_v39  ;;  %v4464_v36 = vpop.f32.mrb[53].mxu0 }
 0xaaf   : > { %v2700_v42 = vpop.f32.mrb[54].mxu0 }
 0xab0   : > { %v2714_v43 = vmul.f32 0.25, %v2700_v42  ;;  %v4465_v44 = vpop.f32.mrb[55].mxu0  ;;  %v2718_v2 = vadd.f32 %v5555_v45, %v2713_v40 }
 0xab2   : > { %v2727_v41 = vsel %vm1804_vm5, %v2718_v2, -inf  ;;  %v2719_v46 = vadd.f32 %v5555_v45, %v2714_v43 }
 0xab3   : > { %2728 = vmax.xlane.f32.xlu0 %v2727_v41 }
 0xab4   : > { %v2730_v20 = vsel %vm1804_vm5, %v2719_v46, -inf }
 0xab5   : > { %2731 = vmax.xlane.f32.xlu1 %v2730_v20  ;;  %v2705_v14 = vpop.f32.mrb[56].mxu0 }
 0xab6   : > { %v2715_v47 = vmul.f32 0.25, %v2705_v14  ;;  %v4468_v48 = vpop.f32.mrb[57].mxu0 }
 0xab7   : > { %v2708_v49 = vpop.f32.mrb[58].mxu0 }
 0xab8   : > { %v4469_v50 = vpop.f32.mrb[59].mxu0  ;;  %v2720_v52 = vadd.f32 %v5555_v45, %v2715_v47 }
 0xaba   : > { %v2733_v54 = vsel %vm1804_vm5, %v2720_v52, -inf }
 0xabb   : > { %2734 = vmax.xlane.f32.xlu0 %v2733_v54 }
 0xac6   : > { %2779 = vrot.lane.b32.xlu1 %v5481_v9, %s5015_s1 }
 0xb38   : > { %v2598_v55 = vpop.f32.mrb[60].mxu1  ;;  %v2723_v57 = vpop.xlane.xlu1 %2722 }
 0xb39   : > { %v5797_v58 = vadd.f32 %v2598_v55, %v5705_v15  ;;  %v2736_v59 = vsub.f32 %v2716_v34, %v2723_v57  ;;  %v4442_v51 = vpop.f32.mrb[61].mxu1  ;;  %v4760_v57 = vld [vmem:[%s5267_s5 + $0x18] sm:$0xff]  }
 0xb3a   : > { %v2601_v60 = vpop.f32.mrb[62].mxu1  ;;  %v2726_v53 = vpop.xlane.xlu0 %2725 }
 0xb3b   : > { %v2741_v61 = vmul.f32 1.442695, %v2736_v59  ;;  %v5800_v62 = vadd.f32 %v2601_v60, %v5707_v19  ;;  %v2737_v45 = vsub.f32 %v2717_v37, %v2726_v53  ;;  %v4443_v63 = vpop.f32.mrb[63].mxu1 }
 0xb3d   : > { %4833 = vpow2.f32 %v2741_v61  ;;  %v2743_v0 = vmul.f32 1.442695, %v2737_v45 }
 0xb3f   : > { %4835 = vpow2.f32 %v2743_v0 }
 0xb40   : > { %v2729_v1 = vpop.xlane.xlu0 %2728 }
 0xb41   : > { %v2738_v9 = vsub.f32 %v2718_v2, %v2729_v1 }
 0xb42   : > { %v2732_v3 = vpop.xlane.xlu1 %2731 }
 0xb43   : > { %v2745_v4 = vmul.f32 1.442695, %v2738_v9  ;;  %v2739_v5 = vsub.f32 %v2719_v46, %v2732_v3 }
 0xb45   : > { %4837 = vpow2.f32 %v2745_v4  ;;  %v2747_v15 = vmul.f32 1.442695, %v2739_v5 }
 0xb46   : > { %v2780_v6 = vpop.permute.xlu1 %2779 }
 0xb47   : > { %v4834_v7 = vpop.eup %4833  ;;  %4839 = vpow2.f32 %v2747_v15  ;;  %4471 = vmatpush3.bf16.msra.mxu0 %v2780_v6  ;;  %4601 = vmatpush3.bf16.msra.mxu1 %v2780_v6 }
 0xb48   : > { %v2735_v8 = vpop.xlane.xlu0 %2734  ;;  %v2751_v19 = vsel %vm1804_vm5, %v4834_v7, 0.0  ;;  %4472 = vmatprep.subr.bf16.mxu0 %v5007_v56  ;;  %4599 = vmatprep.subr.bf16.mxu1 %v5007_v56 }
 0xb49   : > { %v4836_v10 = vpop.eup %4835  ;;  %v2740_v11 = vsub.f32 %v2720_v52, %v2735_v8  ;;  %2752 = vadd.xlane.f32.xlu1 %v2751_v19  ;;  %v4087_v8 = vld [vmem:[%s6221_s24] ss:$0 sm:$0xff]  ;;  %s6228_s24 = sld [smem:[#allocation36_spill]] (!%p4109_p1) }
 0xb4a   : > { %v2754_v12 = vsel %vm1804_vm5, %v4836_v10, 0.0 }
 0xb4b   : > { %v2749_v13 = vmul.f32 1.442695, %v2740_v11  ;;  %2755 = vadd.xlane.f32.xlu0 %v2754_v12 }
 0xb4d   : > { %4841 = vpow2.f32 %v2749_v13 }
 0xb4f   : > { %v4838_v16 = vpop.eup %4837 }
 0xb50   : > { %v2757_v18 = vsel %vm1804_vm5, %v4838_v16, 0.0 }
 0xb51   : > { %v4840_v22 = vpop.eup %4839  ;;  %2758 = vadd.xlane.f32.xlu1 %v2757_v18 }
 0xb52   : > { %v2760_v24 = vsel %vm1804_vm5, %v4840_v22, 0.0 }
 0xb53   : > { %2761 = vadd.xlane.f32.xlu0 %v2760_v24 }
 0xb57   : > { %v4842_v25 = vpop.eup %4841 }
 0xb58   : > { %v2763_v26 = vsel %vm1804_vm5, %v4842_v25, 0.0 }
 0xb59   : > { %2764 = vadd.xlane.f32.xlu0 %v2763_v26  ;;  %v4884_v26 = vld [vmem:[#allocation2 + $0x8] sm:$0xff] }
 0xb62   : > { %2783 = vrot.lane.b32.xlu1 %v5502_v28, %s5015_s1 }
 0xb6d   : > { %v2606_v29 = vpop.f32.mrb[64].mxu1 }
 0xb6e   : > { %v5812_v30 = vadd.f32 %v2606_v29, %v5709_v23  ;;  %v4446_v32 = vpop.f32.mrb[65].mxu1 }
 0xb6f   : > { %v2609_v17 = vpop.f32.mrb[66].mxu1  ;;  %2781 = vrot.lane.b32.xlu0 %v5489_v21, %s5015_s1 }
 0xb70   : > { %v5817_v33 = vadd.f32 %v2609_v17, %v5711_v27  ;;  %v4447_v34 = vpop.f32.mrb[67].mxu1 }
 0xb75   : > { %v2614_v35 = vpop.f32.mrb[68].mxu1 }
 0xb76   : > { %v5820_v37 = vadd.f32 %v2614_v35, %v5713_v31  ;;  %v4450_v38 = vpop.f32.mrb[69].mxu1 }
 0xb77   : > { %v2617_v39 = vpop.f32.mrb[70].mxu1 }
 0xb78   : > { %v4451_v28 = vpop.f32.mrb[71].mxu1 }
 0xbd6   : > { %v2753_v40 = vpop.xlane.xlu1 %2752 }
 0xbd7   : > { %4843 = vrcp.f32 %v2753_v40  ;;  %v4885_v40 = vld [vmem:[#allocation2 + $0x10] sm:$0xff] }
 0xbd8   : > { %v2756_v36 = vpop.xlane.xlu0 %2755 }
 0xbd9   : > { %4845 = vrcp.f32 %v2756_v36 }
 0xbde   : > { %v2759_v23 = vpop.xlane.xlu1 %2758 }
 0xbdf   : > { %4847 = vrcp.f32 %v2759_v23 }
 0xbe0   : > { %v2762_v42 = vpop.xlane.xlu0 %2761 }
 0xbe1   : > { %4849 = vrcp.f32 %v2762_v42  ;;  %v4844_v27 = vpop.eup %4843  ;;  %v4886_v42 = vld [vmem:[#allocation2 + $0x18] sm:$0xff] }
 0xbe2   : > { %v2784_v31 = vpop.permute.xlu1 %2783  ;;  %v2771_v14 = vmul.f32 %v4844_v27, %v4834_v7 }
 0xbe3   : > { %v4846_v43 = vpop.eup %4845  ;;  %v2797_v48 = vsel %vm1875_vm3, %v2784_v31, 0 }
 0xbe4   : > { %v2772_v46 = vmul.f32 %v4846_v43, %v4836_v10 }
 0xbe6   : > { %v2765_v21 = vpop.xlane.xlu0 %2764  ;;  %v2776_v49 = vpack.c.bf16 %v2772_v46, %v2771_v14 }
 0xbe7   : > { %4851 = vrcp.f32 %v2765_v21 }
 0xbe9   : > { %v4848_v44 = vpop.eup %4847 }
 0xbea   : > { %v2782_v2 = vpop.permute.xlu0 %2781  ;;  %v2773_v47 = vmul.f32 %v4848_v44, %v4838_v16 }
 0xbeb   : > { %v4850_v41 = vpop.eup %4849  ;;  %4473 = vmatpush3.bf16.msra.mxu0 %v2782_v2  ;;  %4602 = vmatpush3.bf16.msra.mxu1 %v2782_v2 }
 0xbec   : > { %v2774_v20 = vmul.f32 %v4850_v41, %v4840_v22  ;;  %4474 = vmatprep.subr.bf16.mxu0 %v5007_v56  ;;  %4600 = vmatprep.subr.bf16.mxu1 %v5007_v56  ;;  %v4883_v22 = vld [vmem:[#allocation2] sm:$0xff] }
 0xbee   : > { %v2777_v50 = vpack.c.bf16 %v2774_v20, %v2773_v47 }
 0xbef   : > { %4475 = vmatpush3.bf16.msra.mxu0 %v2797_v48  ;;  %4603 = vmatpush3.bf16.msra.mxu1 %v2797_v48 }
 0xbf0   : > { %4488 = vmatprep.subr.bf16.mxu0 %v5007_v56  ;;  %4502 = vmatprep.subr.bf16.mxu1 %v5007_v56 }
 0xbf1   : > { %v4852_v52 = vpop.eup %4851 }
 0xbf2   : > { %4477 = vmatmul.mubr.msk.bf16.vlgmr.msra.gmra.mrb[60].mxu0 %vm1804_vm5, %v2776_v49  ;;  %4481 = vmatmul.mubr.msk.bf16.vlgmr.msra.gmra.mrb[72].mxu1 %vm1804_vm5, %v2777_v50  ;;  %v2775_v54 = vmul.f32 %v4852_v52, %v4842_v25 }
 0xbf3   : > { %4484 = vmatprep.mubr.msk.bf16.mxu1 %vm5009_vm2, %v5007_v56  ;;  %4490 = vmatprep.mubr.msk.bf16.mxu0 %vm5009_vm2, %v5007_v56 }
 0xbf4   : > { %v2778_v55 = vpack.c.bf16 %v2775_v54, %v2775_v54  ;;  %4489 = vmatpush3.bf16.msra.mxu0 %v4760_v57 }
 0xbf5   : > { %4522 = vmatprep.subr.bf16.mxu0 %v5007_v56 }
 0xbfa   : > { %4485 = vmatmul.mubr.msk.bf16.gmra.mrb[76].mxu1 %vm1804_vm5, %v2778_v55 }
 0xbfb   : > { %4510 = vmatprep.mubr.msk.bf16.mxu1 %vm5009_vm2, %v5007_v56 }
 0xcc5   : > { %v2833_v59 = vpop.f32.mrb[60].mxu0  ;;  %v2841_v51 = vpop.f32.mrb[72].mxu1 }
 0xcc6   : > { %v4478_v60 = vpop.f32.mrb[61].mxu0  ;;  %v4482_v53 = vpop.f32.mrb[73].mxu1 }
 0xcc7   : > { %v2836_v61 = vpop.f32.mrb[62].mxu0  ;;  %v2844_v45 = vpop.f32.mrb[74].mxu1 }
 0xcc8   : > { %v2855_v63 = vpack.c.bf16 %v2836_v61, %v2833_v59  ;;  %v2856_v0 = vpack.c.bf16 %v2844_v45, %v2841_v51  ;;  %v4479_v1 = vpop.f32.mrb[63].mxu0  ;;  %v4483_v9 = vpop.f32.mrb[75].mxu1 }
 0xcca   : > { %4491 = vmatmul.mubr.msk.bf16.vlgmr.msra.gmra.mrb[64].mxu0 %vm1713_vm4, %v2855_v63 }
 0xccb   : > { %4494 = vmatprep.mubr.msk.bf16.mxu0 %vm5009_vm2, %v5007_v56 }
 0xccd   : > { %v2849_v3 = vpop.f32.mrb[76].mxu1 }
 0xcce   : > { %v4486_v4 = vpop.f32.mrb[77].mxu1  ;;  %v2857_v6 = vpack.c.bf16 %v2849_v3, %v2849_v3 }
 0xccf   : > { %v2852_v5 = vpop.f32.mrb[78].mxu1 }
 0xcd0   : > { %v4487_v15 = vpop.f32.mrb[79].mxu1 }
 0xcd2   : > { %4495 = vmatmul.mubr.msk.bf16.gmra.mrb[68].mxu0 %vm1713_vm4, %v2856_v0 }
 0xcd3   : > { %4498 = vmatprep.mubr.msk.bf16.mxu0 %vm5009_vm2, %v5007_v56 }
 0xcda   : > { %4499 = vmatmul.mubr.msk.bf16.gmra.mrb[72].mxu0 %vm1713_vm4, %v2857_v6 }
 0xcdb   : > { %4538 = vmatprep.mubr.msk.bf16.mxu0 %vm5009_vm2, %v5007_v56 }
 0xd9d   : > { %v2907_v7 = vpop.f32.mrb[64].mxu0 }
 0xd9e   : > { %v2929_v19 = vadd.f32 %v2907_v7, %v5797_v58  ;;  %v4492_v10 = vpop.f32.mrb[65].mxu0  ;;  %v4761_v7 = vld [vmem:[%s5280_s25] sm:$0xff]  }
 0xd9f   : > { %v2910_v11 = vpop.f32.mrb[66].mxu0  ;;  %4503 = vmatpush3.bf16.msra.mxu1 %v4761_v7  ;;  %v4764_v10 = vld [vmem:[%s5280_s25 + $0x18] sm:$0xff]  }
 0xda0   : > { %v2941_v12 = vadd.f32 %v4087_v8, %v2929_v19  ;;  %v2930_v13 = vadd.f32 %v2910_v11, %v5800_v62  ;;  %v4493_v16 = vpop.f32.mrb[67].mxu0  ;;  %4504 = vmatprep.subr.bf16.mxu1 %v5007_v56  ;;  %v4763_v19 = vld [vmem:[%s5280_s25 + $0x10] sm:$0xff]  }
 0xda2   : > { %v2942_v18 = vadd.f32 %v4087_v8, %v2930_v13  ;;  %v2946_v24 = vadd.f32 %v4883_v22, %v2941_v12 }
 0xda4   : > { %v2953_v25 = vsel %vm1621_vm1, %v2946_v24, 0.0  ;;  %v2947_v29 = vadd.f32 %v4884_v26, %v2942_v18 }
 0xda5   : > { %2954 = vadd.xlane.f32.xlu1 %v2953_v25  ;;  %v2915_v32 = vpop.f32.mrb[68].mxu0 }
 0xda6   : > { %v2931_v17 = vadd.f32 %v2915_v32, %v5812_v30  ;;  %v4496_v34 = vpop.f32.mrb[69].mxu0  ;;  %v2956_v58 = vsel %vm1621_vm1, %v2947_v29, 0.0 }
 0xda7   : > { %2957 = vadd.xlane.f32.xlu0 %v2956_v58  ;;  %v2918_v35 = vpop.f32.mrb[70].mxu0  ;;  %v4088_v58 = vld [vmem:[%s6222_s4] ss:$0 sm:$0xff] }
 0xda8   : > { %v2943_v38 = vadd.f32 %v4087_v8, %v2931_v17  ;;  %v2932_v62 = vadd.f32 %v2918_v35, %v5817_v33  ;;  %v4497_v39 = vpop.f32.mrb[71].mxu0  ;;  %v4887_v33 = vld [vmem:[#allocation2 + $0x20] sm:$0xff] }
 0xdaa   : > { %v2944_v28 = vadd.f32 %v4087_v8, %v2932_v62  ;;  %v2948_v36 = vadd.f32 %v4885_v40, %v2943_v38 }
 0xdac   : > { %v2959_v23 = vsel %vm1621_vm1, %v2948_v36, 0.0  ;;  %v2949_v21 = vadd.f32 %v4886_v42, %v2944_v28 }
 0xdad   : > { %2960 = vadd.xlane.f32.xlu1 %v2959_v23  ;;  %v2923_v27 = vpop.f32.mrb[72].mxu0 }
 0xdae   : > { %v2933_v30 = vadd.f32 %v2923_v27, %v5820_v37  ;;  %v4500_v43 = vpop.f32.mrb[73].mxu0  ;;  %v2962_v44 = vsel %vm1621_vm1, %v2949_v21, 0.0 }
 0xdaf   : > { %2963 = vadd.xlane.f32.xlu0 %v2962_v44  ;;  %v2926_v2 = vpop.f32.mrb[74].mxu0 }
 0xdb0   : > { %v2945_v41 = vadd.f32 %v4087_v8, %v2933_v30  ;;  %v4501_v31 = vpop.f32.mrb[75].mxu0  ;;  %v4762_v8 = vld [vmem:[%s5280_s25 + $0x8] sm:$0xff]   ;;  %s6229_s25 = sld [smem:[#allocation21_spill]] (!%p4109_p1) }
 0xdb1   : > { %4505 = vmatpush3.bf16.msra.mxu1 %v4762_v8 }
 0xdb2   : > { %v2950_v46 = vadd.f32 %v4887_v33, %v2945_v41  ;;  %4506 = vmatprep.subr.bf16.mxu1 %v5007_v56 }
 0xdb4   : > { %v2965_v20 = vsel %vm1621_vm1, %v2950_v46, 0.0 }
 0xdb5   : > { %2966 = vadd.xlane.f32.xlu1 %v2965_v20  ;;  %4507 = vmatpush3.bf16.msra.mxu1 %v4763_v19 }
 0xdb6   : > { %4508 = vmatprep.subr.bf16.mxu1 %v5007_v56 }
 0xdb9   : > { %4509 = vmatpush3.bf16.msra.mxu1 %v4764_v10 }
 0xe32   : > { %v2955_v14 = vpop.xlane.xlu1 %2954 }
 0xe33   : > { %v2969_v47 = vmul.f32 0.015625, %v2955_v14 }
 0xe34   : > { %v2958_v48 = vpop.xlane.xlu0 %2957 }
 0xe35   : > { %v2974_v49 = vsub.f32 %v2946_v24, %v2969_v47  ;;  %v2970_v50 = vmul.f32 0.015625, %v2958_v48 }
 0xe37   : > { %v2975_v52 = vsub.f32 %v2947_v29, %v2970_v50  ;;  %v2979_v54 = vmul.f32 %v2974_v49, %v2974_v49 }
 0xe39   : > { %v2984_v37 = vsel %vm1621_vm1, %v2979_v54, 0.0  ;;  %v2980_v55 = vmul.f32 %v2975_v52, %v2975_v52  ;;  %v4765_v54 = vld [vmem:[%s5289_s9] sm:$0xff]  }
 0xe3a   : > { %v2961_v57 = vpop.xlane.xlu1 %2960  ;;  %2985 = vadd.xlane.f32.xlu0 %v2984_v37  ;;  %4523 = vmatpush3.bf16.msra.mxu0 %v4765_v54  ;;  %v4766_v37 = vld [vmem:[%s5289_s9 + $0x8] sm:$0xff]  }
 0xe3b   : > { %v2971_v59 = vmul.f32 0.015625, %v2961_v57  ;;  %v2987_v51 = vsel %vm1621_vm1, %v2980_v55, 0.0  ;;  %4524 = vmatprep.subr.bf16.mxu0 %v5007_v56  ;;  %v4767_v55 = vld [vmem:[%s5289_s9 + $0x10] sm:$0xff]   ;;  %v4768_v57 = vld [vmem:[%s5289_s9 + $0x18] sm:$0xff]  }
 0xe3c   : > { %v2964_v60 = vpop.xlane.xlu0 %2963  ;;  %2988 = vadd.xlane.f32.xlu1 %v2987_v51  ;;  %v4770_v51 = vld [vmem:[%s5289_s9 + $0x28] sm:$0xff]  }
 0xe3d   : > { %v2976_v53 = vsub.f32 %v2948_v36, %v2971_v59  ;;  %v2972_v61 = vmul.f32 0.015625, %v2964_v60  ;;  %v4089_v36 = vld [vmem:[%s6224_s2] ss:$0 sm:$0xff]  ;;  %v4771_v60 = vld [vmem:[%s5289_s9 + $0x30] sm:$0xff]  }
 0xe3e   : > { %4525 = vmatpush3.bf16.msra.mxu0 %v4766_v37  ;;  %v4769_v59 = vld [vmem:[%s5289_s9 + $0x20] sm:$0xff]  }
 0xe3f   : > { %v2977_v45 = vsub.f32 %v2949_v21, %v2972_v61  ;;  %v2981_v63 = vmul.f32 %v2976_v53, %v2976_v53  ;;  %4526 = vmatprep.subr.bf16.mxu0 %v5007_v56  ;;  %v4090_v61 = vld [vmem:[%s970_s3] ss:$0 sm:$0xff] }
 0xe41   : > { %v2990_v0 = vsel %vm1621_vm1, %v2981_v63, 0.0  ;;  %v2982_v1 = vmul.f32 %v2977_v45, %v2977_v45 }
 0xe42   : > { %2991 = vadd.xlane.f32.xlu0 %v2990_v0  ;;  %v2967_v9 = vpop.xlane.xlu1 %2966  ;;  %4527 = vmatpush3.bf16.msra.mxu0 %v4767_v55 }
 0xe43   : > { %v2973_v3 = vmul.f32 0.015625, %v2967_v9  ;;  %v2993_v4 = vsel %vm1621_vm1, %v2982_v1, 0.0  ;;  %4528 = vmatprep.subr.bf16.mxu0 %v5007_v56 }
 0xe44   : > { %2994 = vadd.xlane.f32.xlu1 %v2993_v4 }
 0xe45   : > { %v2978_v5 = vsub.f32 %v2950_v46, %v2973_v3 }
 0xe46   : > { %4529 = vmatpush3.bf16.msra.mxu0 %v4768_v57 }
 0xe47   : > { %v2983_v15 = vmul.f32 %v2978_v5, %v2978_v5  ;;  %4530 = vmatprep.subr.bf16.mxu0 %v5007_v56 }
 0xe49   : > { %v2996_v6 = vsel %vm1621_vm1, %v2983_v15, 0.0 }
 0xe4a   : > { %2997 = vadd.xlane.f32.xlu0 %v2996_v6  ;;  %4531 = vmatpush3.bf16.msra.mxu0 %v4769_v59 }
 0xe4b   : > { %4532 = vmatprep.subr.bf16.mxu0 %v5007_v56 }
 0xe4e   : > { %4533 = vmatpush3.bf16.msra.mxu0 %v4770_v51 }
 0xe4f   : > { %4534 = vmatprep.subr.bf16.mxu0 %v5007_v56 }
 0xe52   : > { %4535 = vmatpush3.bf16.msra.mxu0 %v4771_v60 }
 0xe53   : > { %4536 = vmatprep.subr.bf16.mxu0 %v5007_v56 }
 0xec7   : > { %v2986_v11 = vpop.xlane.xlu0 %2985 }
 0xec8   : > { %v2999_v12 = vmul.f32 0.015625, %v2986_v11 }
 0xec9   : > { %v2989_v13 = vpop.xlane.xlu1 %2988 }
 0xeca   : > { %v3004_v16 = vadd.f32 1e-05, %v2999_v12  ;;  %v3000_v18 = vmul.f32 0.015625, %v2989_v13 }
 0xecc   : > { %4853 = vrsqrt.f32 %v3004_v16  ;;  %v3005_v22 = vadd.f32 1e-05, %v3000_v18 }
 0xece   : > { %4855 = vrsqrt.f32 %v3005_v22 }
 0xecf   : > { %v2992_v24 = vpop.xlane.xlu0 %2991 }
 0xed0   : > { %v3001_v25 = vmul.f32 0.015625, %v2992_v24 }
 0xed1   : > { %v2995_v26 = vpop.xlane.xlu1 %2994 }
 0xed2   : > { %v3006_v29 = vadd.f32 1e-05, %v3001_v25  ;;  %v3002_v32 = vmul.f32 0.015625, %v2995_v26 }
 0xed4   : > { %4857 = vrsqrt.f32 %v3006_v29  ;;  %v3007_v17 = vadd.f32 1e-05, %v3002_v32 }
 0xed6   : > { %v4854_v34 = vpop.eup %4853  ;;  %4859 = vrsqrt.f32 %v3007_v17 }
 0xed7   : > { %v3014_v35 = vmul.f32 %v4854_v34, %v2974_v49  ;;  %v2998_v38 = vpop.xlane.xlu0 %2997 }
 0xed8   : > { %v4856_v62 = vpop.eup %4855  ;;  %v3003_v39 = vmul.f32 0.015625, %v2998_v38 }
 0xed9   : > { %v3025_v28 = vmul.f32 %v4088_v58, %v3014_v35  ;;  %v3015_v40 = vmul.f32 %v4856_v62, %v2975_v52 }
 0xeda   : > { %v3008_v23 = vadd.f32 1e-05, %v3003_v39 }
 0xedb   : > { %v3026_v42 = vmul.f32 %v4088_v58, %v3015_v40  ;;  %v5884_v21 = vadd.f32 %v4089_v36, %v3025_v28 }
 0xedc   : > { %4861 = vrsqrt.f32 %v3008_v23 }
 0xedd   : > { %v5886_v27 = vadd.f32 %v4089_v36, %v3026_v42 }
 0xede   : > { %v4858_v30 = vpop.eup %4857 }
 0xedf   : > { %v3016_v43 = vmul.f32 %v4858_v30, %v2976_v53  ;;  %v3049_v44 = vpack.c.bf16 %v5886_v27, %v5884_v21  ;;  %v4772_v53 = vld [vmem:[%s5289_s9 + $0x38] sm:$0xff]  }
 0xee0   : > { %v4860_v2 = vpop.eup %4859  ;;  %4537 = vmatpush3.bf16.msra.mxu0 %v4772_v53 }
 0xee1   : > { %v3017_v41 = vmul.f32 %v4860_v2, %v2977_v45  ;;  %4511 = vmatmul.mubr.msk.bf16.vlgmr.msra.gmra.mrb[80].mxu1 %vm1621_vm1, %v3049_v44  ;;  %v3027_v31 = vmul.f32 %v4088_v58, %v3016_v43 }
 0xee2   : > { %4514 = vmatprep.mubr.msk.bf16.mxu1 %vm5009_vm2, %v5007_v56 }
 0xee3   : > { %v3028_v33 = vmul.f32 %v4088_v58, %v3017_v41  ;;  %v5893_v46 = vadd.f32 %v4089_v36, %v3027_v31 }
 0xee5   : > { %v5895_v20 = vadd.f32 %v4089_v36, %v3028_v33 }
 0xee6   : > { %v4862_v14 = vpop.eup %4861 }
 0xee7   : > { %v3018_v47 = vmul.f32 %v4862_v14, %v2978_v5  ;;  %v3050_v48 = vpack.c.bf16 %v5895_v20, %v5893_v46 }
 0xee9   : > { %4515 = vmatmul.mubr.msk.bf16.gmra.mrb[84].mxu1 %vm1621_vm1, %v3050_v48  ;;  %v3029_v49 = vmul.f32 %v4088_v58, %v3018_v47 }
 0xeea   : > { %4518 = vmatprep.mubr.msk.bf16.mxu1 %vm5009_vm2, %v5007_v56 }
 0xeeb   : > { %v5902_v50 = vadd.f32 %v4089_v36, %v3029_v49 }
 0xeed   : > { %v3051_v52 = vpack.c.bf16 %v5902_v50, %v5902_v50 }
 0xef1   : > { %4519 = vmatmul.mubr.msk.bf16.gmra.mrb[88].mxu1 %vm1621_vm1, %v3051_v52 }
 0xfb4   : > { %v3126_v45 = vpop.f32.mrb[80].mxu1 }
 0xfb5   : > { %v3127_v63 = vadd.f32 %v4090_v61, %v3126_v45  ;;  %v4512_v0 = vpop.f32.mrb[81].mxu1 }
 0xfb6   : > { %v3129_v1 = vpop.f32.mrb[82].mxu1 }
 0xfb7   : > { %v3148_v9 = vmul.f32 %v3127_v63, %v3127_v63  ;;  %v3130_v3 = vadd.f32 %v4090_v61, %v3129_v1  ;;  %v4513_v4 = vpop.f32.mrb[83].mxu1 }
 0xfb9   : > { %v3153_v5 = vmul.f32 %v3148_v9, %v3127_v63  ;;  %v3149_v15 = vmul.f32 %v3130_v3, %v3130_v3 }
 0xfbb   : > { %v3158_v6 = vmul.f32 0.044715, %v3153_v5  ;;  %v3154_v7 = vmul.f32 %v3149_v15, %v3130_v3  ;;  %v4098_v5 = vld [vmem:[%s978_s26] ss:$0 sm:$0xff] }
 0xfbc   : > { %v3134_v8 = vpop.f32.mrb[84].mxu1 }
 0xfbd   : > { %v3163_v19 = vadd.f32 %v3158_v6, %v3127_v63  ;;  %v3159_v10 = vmul.f32 0.044715, %v3154_v7  ;;  %v3135_v11 = vadd.f32 %v4090_v61, %v3134_v8  ;;  %v4516_v12 = vpop.f32.mrb[85].mxu1 }
 0xfbe   : > { %v3137_v13 = vpop.f32.mrb[86].mxu1 }
 0xfbf   : > { %v3168_v16 = vmul.f32 0.7978846, %v3163_v19  ;;  %v3164_v18 = vadd.f32 %v3159_v10, %v3130_v3  ;;  %v3150_v22 = vmul.f32 %v3135_v11, %v3135_v11  ;;  %v3138_v24 = vadd.f32 %v4090_v61, %v3137_v13  ;;  %v4517_v25 = vpop.f32.mrb[87].mxu1 }
 0xfc1   : > { %4863 = vtanh.f32 %v3168_v16  ;;  %v3169_v26 = vmul.f32 0.7978846, %v3164_v18  ;;  %v3155_v29 = vmul.f32 %v3150_v22, %v3135_v11  ;;  %v3151_v32 = vmul.f32 %v3138_v24, %v3138_v24 }
 0xfc3   : > { %4865 = vtanh.f32 %v3169_v26  ;;  %v3160_v17 = vmul.f32 0.044715, %v3155_v29  ;;  %v3156_v34 = vmul.f32 %v3151_v32, %v3138_v24 }
 0xfc4   : > { %v3142_v58 = vpop.f32.mrb[88].mxu1 }
 0xfc5   : > { %v3165_v35 = vadd.f32 %v3160_v17, %v3135_v11  ;;  %v3161_v38 = vmul.f32 0.044715, %v3156_v34  ;;  %v3143_v62 = vadd.f32 %v4090_v61, %v3142_v58  ;;  %v4520_v39 = vpop.f32.mrb[89].mxu1 }
 0xfc6   : > { %v3145_v28 = vpop.f32.mrb[90].mxu1 }
 0xfc7   : > { %v3170_v40 = vmul.f32 0.7978846, %v3165_v35  ;;  %v3166_v36 = vadd.f32 %v3161_v38, %v3138_v24  ;;  %v3152_v23 = vmul.f32 %v3143_v62, %v3143_v62  ;;  %v4521_v42 = vpop.f32.mrb[91].mxu1 }
 0xfc9   : > { %4867 = vtanh.f32 %v3170_v40  ;;  %v3171_v30 = vmul.f32 0.7978846, %v3166_v36  ;;  %v3157_v43 = vmul.f32 %v3152_v23, %v3143_v62 }
 0xfcb   : > { %v4864_v44 = vpop.eup %4863  ;;  %4869 = vtanh.f32 %v3171_v30  ;;  %v3162_v2 = vmul.f32 0.044715, %v3157_v43 }
 0xfcc   : > { %v3178_v41 = vadd.f32 1.0, %v4864_v44 }
 0xfcd   : > { %v4866_v31 = vpop.eup %4865  ;;  %v3167_v33 = vadd.f32 %v3162_v2, %v3143_v62 }
 0xfce   : > { %v3183_v14 = vmul.f32 0.5, %v3178_v41  ;;  %v3179_v47 = vadd.f32 1.0, %v4866_v31 }
 0xfcf   : > { %v3172_v48 = vmul.f32 0.7978846, %v3167_v33 }
 0xfd0   : > { %v3184_v49 = vmul.f32 0.5, %v3179_v47  ;;  %v3188_v52 = vmul.f32 %v3183_v14, %v3127_v63 }
 0xfd1   : > { %4871 = vtanh.f32 %v3172_v48 }
 0xfd2   : > { %v3189_v54 = vmul.f32 %v3184_v49, %v3130_v3 }
 0xfd3   : > { %v4868_v37 = vpop.eup %4867 }
 0xfd4   : > { %v3209_v55 = vpack.c.bf16 %v3189_v54, %v3188_v52  ;;  %v3180_v57 = vadd.f32 1.0, %v4868_v37 }
 0xfd5   : > { %v4870_v59 = vpop.eup %4869 }
 0xfd6   : > { %4539 = vmatmul.mubr.bf16.vlgmr.msra.gmra.mrb[76].mxu0 %v3209_v55  ;;  %v3181_v51 = vadd.f32 1.0, %v4870_v59  ;;  %v3185_v60 = vmul.f32 0.5, %v3180_v57 }
 0xfd7   : > { %4542 = vmatprep.mubr.msk.bf16.mxu0 %vm5009_vm2, %v5007_v56 }
 0xfd8   : > { %v3186_v53 = vmul.f32 0.5, %v3181_v51  ;;  %v3190_v61 = vmul.f32 %v3185_v60, %v3135_v11 }
 0xfda   : > { %v3191_v45 = vmul.f32 %v3186_v53, %v3138_v24 }
 0xfdb   : > { %v4872_v0 = vpop.eup %4871 }
 0xfdc   : > { %v3210_v1 = vpack.c.bf16 %v3191_v45, %v3190_v61  ;;  %v3182_v9 = vadd.f32 1.0, %v4872_v0 }
 0xfde   : > { %4543 = vmatmul.mubr.bf16.gmra.mrb[80].mxu0 %v3210_v1  ;;  %v3187_v63 = vmul.f32 0.5, %v3182_v9 }
 0xfdf   : > { %4546 = vmatprep.mubr.msk.bf16.mxu0 %vm5009_vm2, %v5007_v56 }
 0xfe0   : > { %v3192_v3 = vmul.f32 %v3187_v63, %v3143_v62 }
 0xfe2   : > { %v3211_v4 = vpack.c.bf16 %v3192_v3, %v3192_v3 }
 0xfe6   : > { %4547 = vmatmul.mubr.bf16.gmra.mrb[84].mxu0 %v3211_v4 }
0x10a9   : > { %v3301_v15 = vpop.f32.mrb[76].mxu0 }
0x10aa   : > { %v3302_v6 = vadd.f32 %v4098_v5, %v3301_v15  ;;  %v4540_v7 = vpop.f32.mrb[77].mxu0 }
0x10ab   : > { %v3304_v8 = vpop.f32.mrb[78].mxu0 }
0x10ac   : > { %v3305_v19 = vadd.f32 %v4098_v5, %v3304_v8  ;;  %v4541_v10 = vpop.f32.mrb[79].mxu0  ;;  %v3323_v11 = vadd.f32 %v3302_v6, %v5884_v21  ;;  %v4107_v6 = vld [vmem:[%s981_s21] ss:$0 sm:$0xff]  ;;  %s6226_s21 = sld [smem:[#allocation35_spill]] (!%p4109_p1) }
0x10ad   : > { %v4108_v10 = vld [vmem:[%s984_s13] ss:$0 sm:$0xff] }
0x10ae   : > { %v3330_v12 = vsel %vm1621_vm1, %v3323_v11, 0.0  ;;  %v3324_v56 = vadd.f32 %v3305_v19, %v5886_v27 }
0x10af   : > { %3331 = vadd.xlane.f32.xlu1 %v3330_v12 }
0x10b0   : > { %v3333_v13 = vsel %vm1621_vm1, %v3324_v56, 0.0 }
0x10b1   : > { %3334 = vadd.xlane.f32.xlu0 %v3333_v13  ;;  %v3309_v16 = vpop.f32.mrb[80].mxu0 }
0x10b2   : > { %v3310_v18 = vadd.f32 %v4098_v5, %v3309_v16  ;;  %v4544_v22 = vpop.f32.mrb[81].mxu0 }
0x10b3   : > { %v3312_v24 = vpop.f32.mrb[82].mxu0 }
0x10b4   : > { %v3313_v25 = vadd.f32 %v4098_v5, %v3312_v24  ;;  %v4545_v26 = vpop.f32.mrb[83].mxu0  ;;  %v3325_v29 = vadd.f32 %v3310_v18, %v5893_v46 }
0x10b6   : > { %v3336_v32 = vsel %vm1621_vm1, %v3325_v29, 0.0  ;;  %v3326_v21 = vadd.f32 %v3313_v25, %v5895_v20 }
0x10b7   : > { %3337 = vadd.xlane.f32.xlu1 %v3336_v32 }
0x10b8   : > { %v3339_v17 = vsel %vm1621_vm1, %v3326_v21, 0.0 }
0x10b9   : > { %3340 = vadd.xlane.f32.xlu0 %v3339_v17  ;;  %v3317_v27 = vpop.f32.mrb[84].mxu0 }
0x10ba   : > { %v3318_v34 = vadd.f32 %v4098_v5, %v3317_v27  ;;  %v4548_v58 = vpop.f32.mrb[85].mxu0 }
0x10bb   : > { %v3320_v35 = vpop.f32.mrb[86].mxu0 }
0x10bc   : > { %v4549_v38 = vpop.f32.mrb[87].mxu0  ;;  %v3327_v62 = vadd.f32 %v3318_v34, %v5902_v50 }
0x10be   : > { %v3342_v39 = vsel %vm1621_vm1, %v3327_v62, 0.0 }
0x10bf   : > { %3343 = vadd.xlane.f32.xlu1 %v3342_v39  ;;  %v5016_v39 = vmov (!%p4109_p1), 0.0  }
0x10c0   : > { %4550 = vmatprep.subr.bf16.mxu0 (!%p4109_p1), %v5016_v39  ;;  %4570 = vmatprep.subr.bf16.mxu1 (!%p4109_p1), %v5016_v39 }
0x10c1   : > { %4558 = vmatprep.mubr.msk.bf16.mxu0 (!%p4109_p1), %vm5017_vm6, %v5016_v39  ;;  %4586 = vmatprep.mubr.msk.bf16.mxu1 (!%p4109_p1), %vm5017_vm6, %v5016_v39 }
0x113c   : > { %v3332_v28 = vpop.xlane.xlu1 %3331 }
0x113d   : > { %v3345_v46 = vmul.f32 0.015625, %v3332_v28  ;;  %v4889_v28 = vld [vmem:[%s6226_s21 + $0x8] sm:$0xff] (!%p4109_p1)  }
0x113e   : > { %v3335_v40 = vpop.xlane.xlu0 %3334 }
0x113f   : > { %v3350_v36 = vsub.f32 %v3323_v11, %v3345_v46  ;;  %v3346_v23 = vmul.f32 0.015625, %v3335_v40  ;;  %v4890_v46 = vld [vmem:[%s6226_s21 + $0x10] sm:$0xff] (!%p4109_p1)   ;;  %v4891_v40 = vld [vmem:[%s6226_s21 + $0x18] sm:$0xff] (!%p4109_p1)  }
0x1141   : > { %v3351_v20 = vsub.f32 %v3324_v56, %v3346_v23  ;;  %v3355_v42 = vmul.f32 %v3350_v36, %v3350_v36 }
0x1143   : > { %v3360_v30 = vsel %vm1621_vm1, %v3355_v42, 0.0  ;;  %v3356_v43 = vmul.f32 %v3351_v20, %v3351_v20  ;;  %v4892_v42 = vld [vmem:[%s6227_s8] sm:$0xff] (!%p4109_p1)  }
0x1144   : > { %v3338_v44 = vpop.xlane.xlu1 %3337  ;;  %3361 = vadd.xlane.f32.xlu0 %v3360_v30  ;;  %4571 = vmatpush3.bf16.msra.mxu1 (!%p4109_p1), %v4892_v42  ;;  %v4893_v30 = vld [vmem:[%s6227_s8 + $0x8] sm:$0xff] (!%p4109_p1)  }
0x1145   : > { %v3347_v2 = vmul.f32 0.015625, %v3338_v44  ;;  %v3363_v41 = vsel %vm1621_vm1, %v3356_v43, 0.0  ;;  %4572 = vmatprep.subr.bf16.mxu1 (!%p4109_p1), %v5016_v39  ;;  %v4894_v43 = vld [vmem:[%s6227_s8 + $0x10] sm:$0xff] (!%p4109_p1)   ;;  %v4895_v44 = vld [vmem:[%s6227_s8 + $0x18] sm:$0xff] (!%p4109_p1)  }
0x1146   : > { %v3341_v31 = vpop.xlane.xlu0 %3340  ;;  %3364 = vadd.xlane.f32.xlu1 %v3363_v41  ;;  %v4897_v41 = vld [vmem:[%s6227_s8 + $0x28] sm:$0xff] (!%p4109_p1)  }
0x1147   : > { %v3352_v50 = vsub.f32 %v3325_v29, %v3347_v2  ;;  %v3348_v33 = vmul.f32 0.015625, %v3341_v31  ;;  %v4896_v2 = vld [vmem:[%s6227_s8 + $0x20] sm:$0xff] (!%p4109_p1)   ;;  %v4898_v31 = vld [vmem:[%s6227_s8 + $0x30] sm:$0xff] (!%p4109_p1)  }
0x1148   : > { %4573 = vmatpush3.bf16.msra.mxu1 (!%p4109_p1), %v4893_v30 }
0x1149   : > { %v3353_v14 = vsub.f32 %v3326_v21, %v3348_v33  ;;  %v3357_v47 = vmul.f32 %v3352_v50, %v3352_v50  ;;  %4574 = vmatprep.subr.bf16.mxu1 (!%p4109_p1), %v5016_v39  ;;  %v4110_v33 = vld [vmem:[%s6228_s24] ss:$0 sm:$0xff] (!%p4109_p1) }
0x114b   : > { %v3366_v48 = vsel %vm1621_vm1, %v3357_v47, 0.0  ;;  %v3358_v49 = vmul.f32 %v3353_v14, %v3353_v14 }
0x114c   : > { %3367 = vadd.xlane.f32.xlu0 %v3366_v48  ;;  %v3344_v52 = vpop.xlane.xlu1 %3343  ;;  %4575 = vmatpush3.bf16.msra.mxu1 (!%p4109_p1), %v4894_v43 }
0x114d   : > { %v3349_v54 = vmul.f32 0.015625, %v3344_v52  ;;  %v3369_v37 = vsel %vm1621_vm1, %v3358_v49, 0.0  ;;  %4576 = vmatprep.subr.bf16.mxu1 (!%p4109_p1), %v5016_v39 }
0x114e   : > { %3370 = vadd.xlane.f32.xlu1 %v3369_v37 }
0x114f   : > { %v3354_v55 = vsub.f32 %v3327_v62, %v3349_v54  ;;  %v4888_v62 = vld [vmem:[%s6226_s21] sm:$0xff] (!%p4109_p1)  }
0x1150   : > { %4551 = vmatpush3.bf16.msra.mxu0 (!%p4109_p1), %v4888_v62  ;;  %4577 = vmatpush3.bf16.msra.mxu1 (!%p4109_p1), %v4895_v44 }
0x1151   : > { %v3359_v57 = vmul.f32 %v3354_v55, %v3354_v55  ;;  %4552 = vmatprep.subr.bf16.mxu0 (!%p4109_p1), %v5016_v39  ;;  %4578 = vmatprep.subr.bf16.mxu1 (!%p4109_p1), %v5016_v39 }
0x1153   : > { %v3372_v59 = vsel %vm1621_vm1, %v3359_v57, 0.0 }
0x1154   : > { %3373 = vadd.xlane.f32.xlu0 %v3372_v59  ;;  %4553 = vmatpush3.bf16.msra.mxu0 (!%p4109_p1), %v4889_v28 }
0x1155   : > { %4554 = vmatprep.subr.bf16.mxu0 (!%p4109_p1), %v5016_v39  ;;  %4579 = vmatpush3.bf16.msra.mxu1 (!%p4109_p1), %v4896_v2 }
0x1156   : > { %4580 = vmatprep.subr.bf16.mxu1 (!%p4109_p1), %v5016_v39 }
0x1158   : > { %4555 = vmatpush3.bf16.msra.mxu0 (!%p4109_p1), %v4890_v46 }
0x1159   : > { %4556 = vmatprep.subr.bf16.mxu0 (!%p4109_p1), %v5016_v39  ;;  %4581 = vmatpush3.bf16.msra.mxu1 (!%p4109_p1), %v4897_v41 }
0x115a   : > { %4582 = vmatprep.subr.bf16.mxu1 (!%p4109_p1), %v5016_v39 }
0x115c   : > { %4557 = vmatpush3.bf16.msra.mxu0 (!%p4109_p1), %v4891_v40 }
0x115d   : > { %4583 = vmatpush3.bf16.msra.mxu1 (!%p4109_p1), %v4898_v31 }
0x115e   : > { %4584 = vmatprep.subr.bf16.mxu1 (!%p4109_p1), %v5016_v39 }
0x11d1   : > { %v3362_v51 = vpop.xlane.xlu0 %3361 }
0x11d2   : > { %v3375_v60 = vmul.f32 0.015625, %v3362_v51 }
0x11d3   : > { %v3365_v53 = vpop.xlane.xlu1 %3364 }
0x11d4   : > { %v3380_v61 = vadd.f32 1e-05, %v3375_v60  ;;  %v3376_v45 = vmul.f32 0.015625, %v3365_v53 }
0x11d6   : > { %4873 = vrsqrt.f32 %v3380_v61  ;;  %v3381_v0 = vadd.f32 1e-05, %v3376_v45 }
0x11d8   : > { %4875 = vrsqrt.f32 %v3381_v0 }
0x11d9   : > { %v3368_v1 = vpop.xlane.xlu0 %3367 }
0x11da   : > { %v3377_v9 = vmul.f32 0.015625, %v3368_v1 }
0x11db   : > { %v3371_v63 = vpop.xlane.xlu1 %3370 }
0x11dc   : > { %v3382_v3 = vadd.f32 1e-05, %v3377_v9  ;;  %v3378_v4 = vmul.f32 0.015625, %v3371_v63 }
0x11de   : > { %4877 = vrsqrt.f32 %v3382_v3  ;;  %v3383_v5 = vadd.f32 1e-05, %v3378_v4 }
0x11e0   : > { %v4874_v15 = vpop.eup %4873  ;;  %4879 = vrsqrt.f32 %v3383_v5 }
0x11e1   : > { %v3390_v7 = vmul.f32 %v4874_v15, %v3350_v36  ;;  %v3374_v8 = vpop.xlane.xlu0 %3373 }
0x11e2   : > { %v4876_v19 = vpop.eup %4875  ;;  %v3379_v11 = vmul.f32 0.015625, %v3374_v8 }
0x11e3   : > { %v3401_v12 = vmul.f32 %v4107_v6, %v3390_v7  ;;  %v3391_v56 = vmul.f32 %v4876_v19, %v3351_v20 }
0x11e4   : > { %v3384_v13 = vadd.f32 1e-05, %v3379_v11 }
0x11e5   : > { %v3412_v16 = vadd.f32 %v4108_v10, %v3401_v12  ;;  %v3402_v18 = vmul.f32 %v4107_v6, %v3391_v56 }
0x11e6   : > { %4881 = vrsqrt.f32 %v3384_v13 }
0x11e7   : > { %3417 = vst.msk [vmem:[#allocation2] sm:$0xff] %vm1621_vm1, %v3412_v16  ;;  %v3413_v22 = vadd.f32 %v4108_v10, %v3402_v18  ;;  %3426 = vst.msk [vmem:[%s5303_s12] sm:$0xff] (!%p4109_p1), %vm1621_vm1, %v3412_v16 }
0x11e8   : > { %v4878_v24 = vpop.eup %4877 }
0x11e9   : > { %3418 = vst.msk [vmem:[#allocation2 + $0x8] sm:$0xff] %vm1621_vm1, %v3413_v22  ;;  %v3392_v25 = vmul.f32 %v4878_v24, %v3352_v50  ;;  %3427 = vst.msk [vmem:[%s5303_s12 + $0x8] sm:$0xff] (!%p4109_p1), %vm1621_vm1, %v3413_v22  ;;  %v3439_v36 = vpack.c.bf16 (!%p4109_p1), %v3413_v22, %v3412_v16  ;;  %v4899_v50 = vld [vmem:[%s6227_s8 + $0x38] sm:$0xff] (!%p4109_p1)  }
0x11ea   : > { %v4880_v26 = vpop.eup %4879  ;;  %4585 = vmatpush3.bf16.msra.mxu1 (!%p4109_p1), %v4899_v50 }
0x11eb   : > { %v3403_v29 = vmul.f32 %v4107_v6, %v3392_v25  ;;  %v3393_v32 = vmul.f32 %v4880_v26, %v3353_v14  ;;  %4559 = vmatmul.mubr.msk.bf16.vlgmr.msra.gmra.mrb[0].mxu0 (!%p4109_p1), %vm1621_vm1, %v3439_v36 }
0x11ec   : > { %4562 = vmatprep.mubr.msk.bf16.mxu0 (!%p4109_p1), %vm5017_vm6, %v5016_v39 }
0x11ed   : > { %v3414_v21 = vadd.f32 %v4108_v10, %v3403_v29  ;;  %v3404_v17 = vmul.f32 %v4107_v6, %v3393_v32 }
0x11ef   : > { %3419 = vst.msk [vmem:[#allocation2 + $0x10] sm:$0xff] %vm1621_vm1, %v3414_v21  ;;  %v3415_v27 = vadd.f32 %v4108_v10, %v3404_v17  ;;  %3428 = vst.msk [vmem:[%s5303_s12 + $0x10] sm:$0xff] (!%p4109_p1), %vm1621_vm1, %v3414_v21 }
0x11f0   : > { %v4882_v34 = vpop.eup %4881 }
0x11f1   : > { %3420 = vst.msk [vmem:[#allocation2 + $0x18] sm:$0xff] %vm1621_vm1, %v3415_v27  ;;  %v3394_v58 = vmul.f32 %v4882_v34, %v3354_v55  ;;  %3425 = sbr.rel (%p4109_p1) target bundleno = 5063 (0x13c7), region = 120  ;;  %3429 = vst.msk [vmem:[%s5303_s12 + $0x18] sm:$0xff] (!%p4109_p1), %vm1621_vm1, %v3415_v27  ;;  %v3440_v23 = vpack.c.bf16 (!%p4109_p1), %v3415_v27, %v3414_v21 }
0x11f3   : > { %v3405_v35 = vmul.f32 %v4107_v6, %v3394_v58  ;;  %4563 = vmatmul.mubr.msk.bf16.gmra.mrb[4].mxu0 (!%p4109_p1), %vm1621_vm1, %v3440_v23 }
0x11f4   : > { %4566 = vmatprep.mubr.msk.bf16.mxu0 (!%p4109_p1), %vm5017_vm6, %v5016_v39 }
0x11f5   : > { %v3416_v38 = vadd.f32 %v4108_v10, %v3405_v35 }
0x11f7   : > { %3421 = vst.msk [vmem:[#allocation2 + $0x20] sm:$0xff] %vm1621_vm1, %v3416_v38  ;;  %3430 = vst.msk [vmem:[%s5303_s12 + $0x20] sm:$0xff] (!%p4109_p1), %vm1621_vm1, %v3416_v38  ;;  %v3441_v20 = vpack.c.bf16 (!%p4109_p1), %v3416_v38, %v3416_v38 }
0x11fb   : > { %4567 = vmatmul.mubr.msk.bf16.gmra.mrb[8].mxu0 %vm1621_vm1, %v3441_v20 }
0x12be   : > { %v3516_v14 = vpop.f32.mrb[0].mxu0 }
0x12bf   : > { %v3517_v47 = vadd.f32 %v4110_v33, %v3516_v14  ;;  %v4560_v48 = vpop.f32.mrb[1].mxu0 }
0x12c0   : > { %v3519_v49 = vpop.f32.mrb[2].mxu0  ;;  %v4118_v48 = vld [vmem:[%s6230_s6] ss:$0 sm:$0xff] }
0x12c1   : > { %v3538_v52 = vmul.f32 %v3517_v47, %v3517_v47  ;;  %v3520_v54 = vadd.f32 %v4110_v33, %v3519_v49  ;;  %v4561_v37 = vpop.f32.mrb[3].mxu0 }
0x12c3   : > { %v3543_v55 = vmul.f32 %v3538_v52, %v3517_v47  ;;  %v3539_v57 = vmul.f32 %v3520_v54, %v3520_v54 }
0x12c5   : > { %v3548_v59 = vmul.f32 0.044715, %v3543_v55  ;;  %v3544_v51 = vmul.f32 %v3539_v57, %v3520_v54 }
0x12c6   : > { %v3524_v60 = vpop.f32.mrb[4].mxu0 }
0x12c7   : > { %v3553_v53 = vadd.f32 %v3548_v59, %v3517_v47  ;;  %v3549_v61 = vmul.f32 0.044715, %v3544_v51  ;;  %v3525_v45 = vadd.f32 %v4110_v33, %v3524_v60  ;;  %v4564_v0 = vpop.f32.mrb[5].mxu0 }
0x12c8   : > { %v3527_v1 = vpop.f32.mrb[6].mxu0 }
0x12c9   : > { %v3558_v9 = vmul.f32 0.7978846, %v3553_v53  ;;  %v3554_v63 = vadd.f32 %v3549_v61, %v3520_v54  ;;  %v3540_v3 = vmul.f32 %v3525_v45, %v3525_v45  ;;  %v3528_v4 = vadd.f32 %v4110_v33, %v3527_v1  ;;  %v4565_v5 = vpop.f32.mrb[7].mxu0 }
0x12cb   : > { %4900 = vtanh.f32 %v3558_v9  ;;  %v3559_v15 = vmul.f32 0.7978846, %v3554_v63  ;;  %v3545_v6 = vmul.f32 %v3540_v3, %v3525_v45  ;;  %v3541_v7 = vmul.f32 %v3528_v4, %v3528_v4 }
0x12cd   : > { %4902 = vtanh.f32 %v3559_v15  ;;  %v3550_v8 = vmul.f32 0.044715, %v3545_v6  ;;  %v3546_v19 = vmul.f32 %v3541_v7, %v3528_v4 }
0x12ce   : > { %v3532_v10 = vpop.f32.mrb[8].mxu0 }
0x12cf   : > { %v3555_v11 = vadd.f32 %v3550_v8, %v3525_v45  ;;  %v3551_v12 = vmul.f32 0.044715, %v3546_v19  ;;  %v3533_v56 = vadd.f32 %v4110_v33, %v3532_v10  ;;  %v4568_v13 = vpop.f32.mrb[9].mxu0 }
0x12d0   : > { %v3535_v16 = vpop.f32.mrb[10].mxu0 }
0x12d1   : > { %v3560_v18 = vmul.f32 0.7978846, %v3555_v11  ;;  %v3556_v22 = vadd.f32 %v3551_v12, %v3528_v4  ;;  %v3542_v24 = vmul.f32 %v3533_v56, %v3533_v56  ;;  %v4569_v25 = vpop.f32.mrb[11].mxu0 }
0x12d3   : > { %4904 = vtanh.f32 %v3560_v18  ;;  %v3561_v26 = vmul.f32 0.7978846, %v3556_v22  ;;  %v3547_v29 = vmul.f32 %v3542_v24, %v3533_v56 }
0x12d5   : > { %v4901_v32 = vpop.eup %4900  ;;  %4906 = vtanh.f32 %v3561_v26  ;;  %v3552_v21 = vmul.f32 0.044715, %v3547_v29 }
0x12d6   : > { %v3568_v17 = vadd.f32 1.0, %v4901_v32 }
0x12d7   : > { %v4903_v27 = vpop.eup %4902  ;;  %v3557_v34 = vadd.f32 %v3552_v21, %v3533_v56 }
0x12d8   : > { %v3569_v58 = vadd.f32 1.0, %v4903_v27  ;;  %v3573_v35 = vmul.f32 0.5, %v3568_v17 }
0x12d9   : > { %v3562_v38 = vmul.f32 0.7978846, %v3557_v34 }
0x12da   : > { %v3574_v62 = vmul.f32 0.5, %v3569_v58  ;;  %v3578_v28 = vmul.f32 %v3573_v35, %v3517_v47 }
0x12db   : > { %4908 = vtanh.f32 %v3562_v38 }
0x12dc   : > { %v3579_v46 = vmul.f32 %v3574_v62, %v3520_v54 }
0x12dd   : > { %v4905_v40 = vpop.eup %4904 }
0x12de   : > { %v3599_v36 = vpack.c.bf16 %v3579_v46, %v3578_v28  ;;  %v3570_v23 = vadd.f32 1.0, %v4905_v40 }
0x12df   : > { %v4907_v20 = vpop.eup %4906 }
0x12e0   : > { %4587 = vmatmul.mubr.bf16.vlgmr.msra.gmra.mrb[0].mxu1 %v3599_v36  ;;  %v3571_v42 = vadd.f32 1.0, %v4907_v20  ;;  %v3575_v30 = vmul.f32 0.5, %v3570_v23 }
0x12e1   : > { %4590 = vmatprep.mubr.msk.bf16.mxu1 %vm5017_vm6, %v5016_v39 }
0x12e2   : > { %v3576_v43 = vmul.f32 0.5, %v3571_v42  ;;  %v3580_v44 = vmul.f32 %v3575_v30, %v3525_v45 }
0x12e4   : > { %v3581_v2 = vmul.f32 %v3576_v43, %v3528_v4 }
0x12e5   : > { %v4909_v41 = vpop.eup %4908 }
0x12e6   : > { %v3600_v31 = vpack.c.bf16 %v3581_v2, %v3580_v44  ;;  %v3572_v50 = vadd.f32 1.0, %v4909_v41 }
0x12e8   : > { %4591 = vmatmul.mubr.bf16.gmra.mrb[4].mxu1 %v3600_v31  ;;  %v3577_v33 = vmul.f32 0.5, %v3572_v50 }
0x12e9   : > { %4594 = vmatprep.mubr.msk.bf16.mxu1 %vm5017_vm6, %v5016_v39 }
0x12ea   : > { %v3582_v14 = vmul.f32 %v3577_v33, %v3533_v56 }
0x12ec   : > { %v3601_v47 = vpack.c.bf16 %v3582_v14, %v3582_v14 }
0x12f0   : > { %4595 = vmatmul.mubr.bf16.gmra.mrb[8].mxu1 %v3601_v47 }
0x13b3   : > { %v3691_v49 = vpop.f32.mrb[0].mxu1 }
0x13b4   : > { %v3692_v52 = vadd.f32 %v4118_v48, %v3691_v49  ;;  %v4588_v54 = vpop.f32.mrb[1].mxu1 }
0x13b5   : > { %v3694_v37 = vpop.f32.mrb[2].mxu1 }
0x13b6   : > { %3713 = vst.msk [vmem:[%s6229_s25] sm:$0xff] %vm1621_vm1, %v3692_v52  ;;  %v3695_v55 = vadd.f32 %v4118_v48, %v3694_v37  ;;  %v4589_v57 = vpop.f32.mrb[3].mxu1 }
0x13b8   : > { %3714 = vst.msk [vmem:[%s6229_s25 + $0x8] sm:$0xff] %vm1621_vm1, %v3695_v55 }
0x13bb   : > { %v3699_v39 = vpop.f32.mrb[4].mxu1 }
0x13bc   : > { %v3700_v59 = vadd.f32 %v4118_v48, %v3699_v39  ;;  %v4592_v51 = vpop.f32.mrb[5].mxu1 }
0x13bd   : > { %v3702_v60 = vpop.f32.mrb[6].mxu1 }
0x13be   : > { %3715 = vst.msk [vmem:[%s6229_s25 + $0x10] sm:$0xff] %vm1621_vm1, %v3700_v59  ;;  %v3703_v53 = vadd.f32 %v4118_v48, %v3702_v60  ;;  %v4593_v61 = vpop.f32.mrb[7].mxu1 }
0x13c0   : > { %3716 = vst.msk [vmem:[%s6229_s25 + $0x18] sm:$0xff] %vm1621_vm1, %v3703_v53 }
0x13c3   : > { %v3707_v45 = vpop.f32.mrb[8].mxu1 }
0x13c4   : > { %v3708_v0 = vadd.f32 %v4118_v48, %v3707_v45  ;;  %v4596_v1 = vpop.f32.mrb[9].mxu1 }
0x13c5   : > { %v3710_v9 = vpop.f32.mrb[10].mxu1 }
0x13c6   : > { %3717 = vst.msk [vmem:[%s6229_s25 + $0x20] sm:$0xff] %vm1621_vm1, %v3708_v0  ;;  %v4597_v63 = vpop.f32.mrb[11].mxu1 }
0x13c7 PF: > { %s6231_s29 = sld [smem:[#allocation9_spill]]  ;;  %s3737_s9 = sshll.u32 %s5303_s12, 4  ;;  %s6063_s9 = int_to_ptr.vmem [resolvable:$true] %s3737_s9 }
0x13c8   : > { %s6232_s2 = sld [smem:[#allocation7_spill]]  ;;  %s6234_s23 = sld [smem:[#allocation39_spill]] }
0x13c9   : > { %s4910_s13 = scalar_lea.vmem %s6063_s9, 640  ;;  %s5018_s18 = smov [#allocation3]  }
0x13ca   : > { %p4911_p2 = scmp.ne.s32.totalorder %s6063_s9, %s4910_s13  ;;  %s4914_s12 = sshll.u32 %s5018_s18, 4  ;;  %s4915_s12 = int_to_ptr.vmem [resolvable:$false] %s4914_s12 }
0x13cb   : > { %s4916_s28 = scalar_lea.vmem %s4915_s12, 1280  ;;  %p4917_p6 = scmp.lt.s32.totalorder %s6063_s9, %s4915_s12 }
0x13cc   : > { %p4912_p4 = pnand %p4911_p2, %p5195_p3  ;;  %p4918_p7 = scmp.lt.s32.totalorder %s4916_s28, %s4910_s13 }
0x13cd   : > { %s4607_s19 = smul.u32 640, %s6231_s29 }
0x13ce   : > { %s6235_s27 = sand.u32 1, %s6232_s2   ;;  %p4913_p5 = pneg %p4912_p4 }
0x13cf   : > { %s6061_s30 = scalar_lea.hbm %s6234_s23, %s4607_s19  ;;  %s6067_s1 = scalar_lea.sflag [#allocation4], %s6235_s27 }
0x13d0   : > { %p4919_p8 = por %p4918_p7, %p4917_p6 }
0x13d2   : > { %p4920_p10 = pnand %p4919_p8, %p4913_p5 }
0x13d4   : > { %4923 = shalt.err (!%p4920_p10)
}
0x13d5   : > { %s4924_s5 = scalar_lea.hbm %s6061_s30, 640  ;;  %s4928_s25 = scalar_lea.hbm %s6234_s23, 1280 }
0x13d6   : > { %p4925_p11 = scmp.ne.s32.totalorder %s6061_s30, %s4924_s5  ;;  %p4929_p0 = scmp.lt.u32.totalorder %s6061_s30, %s6234_s23 }
0x13d7   : > { %p4930_p1 = scmp.lt.u32.totalorder %s4928_s25, %s4924_s5  ;;  %p4932_p4 = scmp.lt.u32.totalorder %s4924_s5, %s6061_s30 }
0x13d8   : > { %p4926_p12 = pnand %p4925_p11, %p5195_p3 }
0x13d9   : > { %p4931_p2 = por %p4930_p1, %p4929_p0 }
0x13da   : > { %p4927_p13 = pneg %p4926_p12 }
0x13db   : > { %p4933_p5 = por %p4932_p4, %p4931_p2 }
0x13dd   : > { %p4934_p6 = pnand %p4933_p5, %p4927_p13 }
0x13df   : > { %4937 = shalt.err (!%p4934_p6)
}
0x13e0   : > { %s5019_s6 = smov 128   ;;  %s5020_s29 = smov 8  }
0x13e1   : > { %4608 = dma.vmem_to_hbm [thread:$0]  (%p5195_p3), %s6063_s9, 640, %s6061_s30, %s6067_s1, %s5019_s6, %s5019_s6, %s5020_s29  }
0x13e2 PF: > { %s6236_s2 = sld [smem:[#allocation12_spill]]  ;;  %s6237_s19 = sld [smem:[#allocation6_spill]] }
0x13e8   : > { %p4614_p7 = scmp.ge.s32.totalorder %s6236_s2, 2  ;;  %s3755_s26 = sand.u32 1, %s6237_s19  }
0x13e9   : > { %s3756_s27 = scalar_lea.sflag [#allocation4], %s3755_s26 }
0x13ea   : > { %p4611_p8 = pnand %p4614_p7, %p5205_p9 }
0x13ec   : > { %4971 = dma.done.wait (!%p4611_p8), %s3756_s27, 640  }
0x13ed   : > { %4973 = vsyncadd (!%p4611_p8), %s3756_s27, 4294966656  ;;  %s38_s0 = sadd.s32 1, %s6236_s2   ;;  %s6239_s5 = sld [smem:[#allocation7_spill]] }
0x13ee   : > { %p35_p10 = scmp.ge.s32.totalorder %s38_s0, 6   ;;  %s6240_s26 = sld [smem:[#allocation8_spill]] }
0x13ef   : > { %s6241_s27 = sld [smem:[#allocation17_spill]]  ;;  %s6242_s28 = sld [smem:[#allocation10_spill]] }
0x13f0   : > { %s6243_s6 = sld [smem:[#allocation11_spill]]  ;;  %s6244_s2 = sld [smem:[#allocation13_spill]] }
0x13f1   : > { %s6245_s29 = sld [smem:[#allocation15_spill]]  ;;  %37 = sbr.rel (!%p35_p10) target bundleno = 25 (0x19), region = 209 }
0x13f8   :  { %3769 = vsyncpa [#allocation4], 1 }
0x13f9   :  { %3771 = vsyncpa [#allocation4 + $0x1], 1 }

</bundles_post_ra>
